<compile_context>
chip_gen: v6e
topology: v6e:2x2x1
jax: 0.10.0
libtpu: 0.0.40
codegen_flags: <defaults>
</compile_context>

<pallas_src>
import jax
import jax.numpy as jnp
from jax.experimental import pallas as pl
from jax.experimental.pallas import tpu as pltpu


K_IN = 174       # real input feature dim
K_PAD = 256      # padded layer-1 contraction dim (174 -> 256), lane-aligned
N_OUT_PAD = 128  # padded output width (1 -> 128), lane-dense stores


def _round_up(v, m):
    return ((v + m - 1) // m) * m


def _mlp_kernel(x_ref,
                w1_ref, b1_ref,
                w2_ref, b2_ref,
                w3_ref, b3_ref,
                w4_ref, b4_ref,
                w5_ref, b5_ref,
                o_ref,
                xpad_ref):
    # Fused pad + cast of the input tile: x is f32 (tile_b, 174); build a
    # zero-padded bf16 (tile_b, 256) copy in VMEM scratch.  Zeroing every
    # step keeps this correct when the parallel batch axis is split across
    # TensorCores (each core has its own scratch); the stores are cheap and
    # hide under the MXU work.
    xpad_ref[...] = jnp.zeros_like(xpad_ref)
    xpad_ref[:, :K_IN] = x_ref[...].astype(jnp.bfloat16)

    # All dots accumulate in f32 on the MXU; bias-add + ReLU in f32 (safe on
    # v5e which has no bf16 VALU), then cast back to bf16 for the next dot.
    h = jnp.dot(xpad_ref[...], w1_ref[...], preferred_element_type=jnp.float32)
    h = jnp.maximum(h + b1_ref[...], 0.0)

    h = jnp.dot(h.astype(jnp.bfloat16), w2_ref[...],
                preferred_element_type=jnp.float32)
    h = jnp.maximum(h + b2_ref[...], 0.0)

    h = jnp.dot(h.astype(jnp.bfloat16), w3_ref[...],
                preferred_element_type=jnp.float32)
    h = jnp.maximum(h + b3_ref[...], 0.0)

    h = jnp.dot(h.astype(jnp.bfloat16), w4_ref[...],
                preferred_element_type=jnp.float32)
    h = jnp.maximum(h + b4_ref[...], 0.0)

    # dropout (eval) = identity; BN4 is folded into w5/b5.
    out = jnp.dot(h.astype(jnp.bfloat16), w5_ref[...],
                  preferred_element_type=jnp.float32) + b5_ref[...]
    o_ref[...] = out


def net_forward(x, prep, tile_b=None):
    """x: (B, 174) float32. prep: prepared (folded/padded/bf16) params."""
    B, k_in = x.shape
    assert k_in == K_IN

    if tile_b is None:
        if B <= 32:
            # Tiny batches: single step, rounded to a 16-row sublane multiple
            # (bf16 packing).
            tile_b = max(16, _round_up(B, 16))
        else:
            # Large tiles amortize the ~0.35us per-step pipeline overhead and
            # the MXU fill/drain, but keep >= 2 grid steps so v7x's two
            # TensorCores both get work on the "parallel" batch axis.
            tile_b = min(512, _round_up(pl.cdiv(B, 2), 16))

    padded_b = pl.cdiv(B, tile_b) * tile_b
    if padded_b != B:
        # Only a cheap batch row-pad remains host-side; the K pad and the
        # f32->bf16 cast happen inside the kernel.
        x = jnp.pad(x, ((0, padded_b - B), (0, 0)))

    params = (
        prep["w1"], prep["b1"],
        prep["w2"], prep["b2"],
        prep["w3"], prep["b3"],
        prep["w4"], prep["b4"],
        prep["w5"], prep["b5"],
    )

    # x/out tiled over batch; weights/biases are whole-array blocks with a
    # constant index_map => DMA'd once and VMEM-resident across batch tiles.
    in_specs = [pl.BlockSpec((tile_b, K_IN), lambda i: (i, 0))]
    in_specs += [pl.BlockSpec(p.shape, lambda i: (0, 0)) for p in params]

    flops = 2 * padded_b * (K_PAD * 512 + 512 * 1024 + 1024 * 1024
                            + 1024 * 512 + 512 * N_OUT_PAD)
    param_bytes = sum(int(p.size) * p.dtype.itemsize for p in params)
    cost = pl.CostEstimate(
        flops=int(flops),
        bytes_accessed=int(padded_b * (K_IN + N_OUT_PAD) * 4 + param_bytes),
        transcendentals=0,
    )

    out = pl.pallas_call(
        _mlp_kernel,
        out_shape=jax.ShapeDtypeStruct((padded_b, N_OUT_PAD), jnp.float32),
        grid=(padded_b // tile_b,),
        in_specs=in_specs,
        out_specs=pl.BlockSpec((tile_b, N_OUT_PAD), lambda i: (i, 0)),
        scratch_shapes=[pltpu.VMEM((tile_b, K_PAD), jnp.bfloat16)],
        compiler_params=pltpu.CompilerParams(
            dimension_semantics=("parallel",),
            vmem_limit_bytes=32 << 20,   # safe for v7x (64 MiB/core); ample here
        ),
        cost_estimate=cost,
    )(x, *params)
    return out[:B, :1]


# ----------------------------- param handling -----------------------------

def _init_linear(key, fan_in, fan_out):
    """PyTorch-style uniform init: U(-1/sqrt(fan_in), 1/sqrt(fan_in))."""
    kw, kb = jax.random.split(key)
    bound = 1.0 / jnp.sqrt(fan_in)
    # stored transposed: (in, out) so forward is x @ W
    w = jax.random.uniform(kw, (fan_in, fan_out), jnp.float32, -bound, bound)
    b = jax.random.uniform(kb, (1, fan_out), jnp.float32, -bound, bound)
    return w, b


def _init_bn(key, n, eps=1e-5):
    """Deterministic, non-trivial eval-mode BN folded to (scale, shift)."""
    kg, kb, km, kv = jax.random.split(key, 4)
    gamma = 1.0 + 0.1 * jax.random.normal(kg, (1, n), jnp.float32)
    beta = 0.1 * jax.random.normal(kb, (1, n), jnp.float32)
    running_mean = 0.1 * jax.random.normal(km, (1, n), jnp.float32)
    running_var = jax.random.uniform(kv, (1, n), jnp.float32, 0.5, 1.5)
    scale = gamma / jnp.sqrt(running_var + eps)
    shift = beta - running_mean * scale
    return scale, shift


def make_raw_params(key):
    keys = jax.random.split(key, 9)
    w1, b1 = _init_linear(keys[0], 174, 512)
    w2, b2 = _init_linear(keys[1], 512, 1024)
    w3, b3 = _init_linear(keys[2], 1024, 1024)
    w4, b4 = _init_linear(keys[3], 1024, 512)
    w5, b5 = _init_linear(keys[4], 512, 1)
    s1, t1 = _init_bn(keys[5], 512)
    s2, t2 = _init_bn(keys[6], 1024)
    s3, t3 = _init_bn(keys[7], 1024)
    s4, t4 = _init_bn(keys[8], 512)
    return dict(w1=w1, b1=b1, s1=s1, t1=t1,
                w2=w2, b2=b2, s2=s2, t2=t2,
                w3=w3, b3=b3, s3=s3, t3=t3,
                w4=w4, b4=b4, s4=s4, t4=t4,
                w5=w5, b5=b5)


def prepare_params(p):
    """Fold BN into the next linear (in f32), pad K/N edges, cast to bf16."""
    # BN(relu(h)) @ W + b == relu(h) @ (diag(s) @ W) + (t @ W + b)
    w2 = p["w2"] * p["s1"].T
    b2 = p["b2"] + p["t1"] @ p["w2"]
    w3 = p["w3"] * p["s2"].T
    b3 = p["b3"] + p["t2"] @ p["w3"]
    w4 = p["w4"] * p["s3"].T
    b4 = p["b4"] + p["t3"] @ p["w4"]
    w5 = p["w5"] * p["s4"].T
    b5 = p["b5"] + p["t4"] @ p["w5"]

    # Pad layer-1 K dim (174 -> 256) with zero rows (matches the in-kernel
    # zero-padded x scratch).
    w1 = jnp.pad(p["w1"], ((0, K_PAD - p["w1"].shape[0]), (0, 0)))
    # Pad output N dim (1 -> 128) with zero columns for lane-dense stores.
    w5 = jnp.pad(w5, ((0, 0), (0, N_OUT_PAD - w5.shape[1])))
    b5 = jnp.pad(b5, ((0, 0), (0, N_OUT_PAD - b5.shape[1])))

    bf16 = jnp.bfloat16
    return dict(
        w1=w1.astype(bf16), b1=p["b1"],
        w2=w2.astype(bf16), b2=b2,
        w3=w3.astype(bf16), b3=b3,
        w4=w4.astype(bf16), b4=b4,
        w5=w5.astype(bf16), b5=b5,
    )


# ------------------------------- references -------------------------------

def _reference_f32(x, p):
    """Pure-JAX f32 reference with explicit ReLU + eval-mode BN."""
    h = jnp.maximum(x @ p["w1"] + p["b1"], 0.0) * p["s1"] + p["t1"]
    h = jnp.maximum(h @ p["w2"] + p["b2"], 0.0) * p["s2"] + p["t2"]
    h = jnp.maximum(h @ p["w3"] + p["b3"], 0.0) * p["s3"] + p["t3"]
    h = jnp.maximum(h @ p["w4"] + p["b4"], 0.0) * p["s4"] + p["t4"]
    return h @ p["w5"] + p["b5"]


def _reference_prepared(x, prep):
    """Pure-JAX reference using the same folded/padded bf16 params."""
    xp = jnp.pad(x, ((0, 0), (0, K_PAD - x.shape[1]))).astype(jnp.bfloat16)

    def lin(h, w, b):
        return jnp.dot(h.astype(jnp.bfloat16), w,
                       preferred_element_type=jnp.float32) + b

    h = jnp.maximum(lin(xp, prep["w1"], prep["b1"]), 0.0)
    h = jnp.maximum(lin(h, prep["w2"], prep["b2"]), 0.0)
    h = jnp.maximum(lin(h, prep["w3"], prep["b3"]), 0.0)
    h = jnp.maximum(lin(h, prep["w4"], prep["b4"]), 0.0)
    return lin(h, prep["w5"], prep["b5"])[:, :1]


if __name__ == "__main__":
    key = jax.random.PRNGKey(0)
    kx, kx2, kp = jax.random.split(key, 3)

    raw = make_raw_params(kp)
    prep = prepare_params(raw)

    # Small demo batch: single grid step, tile rounded to 16 rows.
    B = 16
    x = jax.random.normal(kx, (B, 174), jnp.float32)
    out = jax.block_until_ready(net_forward(x, prep))
    assert out.shape == (B, 1)

    # Tight check vs. a pure-JAX forward on the identical bf16 folded params.
    ref_bf16 = _reference_prepared(x, prep)
    assert jnp.allclose(out, ref_bf16, atol=2e-3, rtol=2e-3), (
        float(jnp.max(jnp.abs(out - ref_bf16))))

    # Looser sanity check vs. the original f32 (unfolded BN) reference.
    ref_f32 = _reference_f32(x, raw)
    assert jnp.allclose(out, ref_f32, atol=1e-1, rtol=1e-1), (
        float(jnp.max(jnp.abs(out - ref_f32))))

    # Multi-tile path: non-multiple batch -> batch padding + 2 grid steps,
    # exercising the parallel batch axis and in-kernel pad/cast.
    B2 = 100
    x2 = jax.random.normal(kx2, (B2, 174), jnp.float32)
    out2 = jax.block_until_ready(net_forward(x2, prep))
    assert out2.shape == (B2, 1)
    ref2 = _reference_prepared(x2, prep)
    assert jnp.allclose(out2, ref2, atol=2e-3, rtol=2e-3), (
        float(jnp.max(jnp.abs(out2 - ref2))))

    print("KERNEL_OK")
</pallas_src>

<mosaic_0001>
module attributes {stable_mosaic.version = 11 : i64} {
  func.func @_mlp_kernel(%arg0: i32, %arg1: memref<16x174xf32, #tpu.memory_space<vmem>>, %arg2: memref<256x512xbf16, #tpu.memory_space<vmem>>, %arg3: memref<1x512xf32, #tpu.memory_space<vmem>>, %arg4: memref<512x1024xbf16, #tpu.memory_space<vmem>>, %arg5: memref<1x1024xf32, #tpu.memory_space<vmem>>, %arg6: memref<1024x1024xbf16, #tpu.memory_space<vmem>>, %arg7: memref<1x1024xf32, #tpu.memory_space<vmem>>, %arg8: memref<1024x512xbf16, #tpu.memory_space<vmem>>, %arg9: memref<1x512xf32, #tpu.memory_space<vmem>>, %arg10: memref<512x128xbf16, #tpu.memory_space<vmem>>, %arg11: memref<1x128xf32, #tpu.memory_space<vmem>>, %arg12: memref<16x128xf32, #tpu.memory_space<vmem>>, %arg13: memref<16x256xbf16, #tpu.memory_space<vmem>>) attributes {dimension_semantics = [#tpu.dimension_semantics<parallel>], iteration_bounds = array<i64: 1>, scalar_prefetch = 0 : i64, scratch_operands = 1 : i64, tpu.core_type = #tpu.core_type<tc>, window_params = [{transform_indices = @transform_0, window_bounds = array<i64: 16, 174>}, {pipeline_mode = #tpu.pipeline_mode<synchronous>, transform_indices = @transform_1, window_bounds = array<i64: 256, 512>}, {pipeline_mode = #tpu.pipeline_mode<synchronous>, transform_indices = @transform_2, window_bounds = array<i64: 1, 512>}, {pipeline_mode = #tpu.pipeline_mode<synchronous>, transform_indices = @transform_3, window_bounds = array<i64: 512, 1024>}, {pipeline_mode = #tpu.pipeline_mode<synchronous>, transform_indices = @transform_4, window_bounds = array<i64: 1, 1024>}, {pipeline_mode = #tpu.pipeline_mode<synchronous>, transform_indices = @transform_5, window_bounds = array<i64: 1024, 1024>}, {pipeline_mode = #tpu.pipeline_mode<synchronous>, transform_indices = @transform_6, window_bounds = array<i64: 1, 1024>}, {pipeline_mode = #tpu.pipeline_mode<synchronous>, transform_indices = @transform_7, window_bounds = array<i64: 1024, 512>}, {pipeline_mode = #tpu.pipeline_mode<synchronous>, transform_indices = @transform_8, window_bounds = array<i64: 1, 512>}, {pipeline_mode = #tpu.pipeline_mode<synchronous>, transform_indices = @transform_9, window_bounds = array<i64: 512, 128>}, {pipeline_mode = #tpu.pipeline_mode<synchronous>, transform_indices = @transform_10, window_bounds = array<i64: 1, 128>}, {transform_indices = @transform_11, window_bounds = array<i64: 16, 128>}]} {
    %cst = arith.constant 0.000000e+00 : bf16
    %0 = vector.broadcast %cst : bf16 to vector<16x256xbf16>
    %c0 = arith.constant 0 : index
    %c0_0 = arith.constant 0 : index
    %1 = vector.load %arg13[%c0, %c0_0] : memref<16x256xbf16, #tpu.memory_space<vmem>>, vector<16x256xbf16>
    tpu.vector_store %arg13[%c0, %c0_0], %0 {strides = array<i32>} : memref<16x256xbf16, #tpu.memory_space<vmem>>, vector<16x256xbf16>,
    %c0_1 = arith.constant 0 : index
    %c0_2 = arith.constant 0 : index
    %2 = vector.load %arg1[%c0_1, %c0_2] : memref<16x174xf32, #tpu.memory_space<vmem>>, vector<16x174xf32>
    %3 = arith.truncf %2 : vector<16x174xf32> to vector<16x174xbf16>
    %c0_3 = arith.constant 0 : index
    %c0_4 = arith.constant 0 : index
    %4 = vector.load %arg13[%c0_3, %c0_4] : memref<16x256xbf16, #tpu.memory_space<vmem>>, vector<16x174xbf16>
    tpu.vector_store %arg13[%c0_3, %c0_4], %3 {strides = array<i32>} : memref<16x256xbf16, #tpu.memory_space<vmem>>, vector<16x174xbf16>,
    %c0_5 = arith.constant 0 : index
    %c0_6 = arith.constant 0 : index
    %5 = vector.load %arg13[%c0_5, %c0_6] : memref<16x256xbf16, #tpu.memory_space<vmem>>, vector<16x256xbf16>
    %c0_7 = arith.constant 0 : index
    %c0_8 = arith.constant 0 : index
    %6 = vector.load %arg2[%c0_7, %c0_8] : memref<256x512xbf16, #tpu.memory_space<vmem>>, vector<256x512xbf16>
    %cst_9 = arith.constant dense<0.000000e+00> : vector<16x512xf32>
    %7 = tpu.matmul %5, %6, %cst_9 {dimension_numbers = #tpu.dot_dimension_numbers<[1], [0], [0], [1], [0, 0, 1, 1], [], []>} : vector<16x256xbf16>, vector<256x512xbf16>, vector<16x512xf32> -> vector<16x512xf32>
    %c0_10 = arith.constant 0 : index
    %c0_11 = arith.constant 0 : index
    %8 = vector.load %arg3[%c0_10, %c0_11] : memref<1x512xf32, #tpu.memory_space<vmem>>, vector<1x512xf32>
    %9 = vector.broadcast %8 : vector<1x512xf32> to vector<16x512xf32>
    %10 = arith.addf %7, %9 : vector<16x512xf32>
    %cst_12 = arith.constant 0.000000e+00 : f32
    %11 = vector.broadcast %cst_12 : f32 to vector<16x512xf32>
    %12 = arith.maximumf %10, %11 : vector<16x512xf32>
    %13 = arith.truncf %12 : vector<16x512xf32> to vector<16x512xbf16>
    %c0_13 = arith.constant 0 : index
    %c0_14 = arith.constant 0 : index
    %14 = vector.load %arg4[%c0_13, %c0_14] : memref<512x1024xbf16, #tpu.memory_space<vmem>>, vector<512x1024xbf16>
    %cst_15 = arith.constant dense<0.000000e+00> : vector<16x1024xf32>
    %15 = tpu.matmul %13, %14, %cst_15 {dimension_numbers = #tpu.dot_dimension_numbers<[1], [0], [0], [1], [0, 0, 1, 1], [], []>} : vector<16x512xbf16>, vector<512x1024xbf16>, vector<16x1024xf32> -> vector<16x1024xf32>
    %c0_16 = arith.constant 0 : index
    %c0_17 = arith.constant 0 : index
    %16 = vector.load %arg5[%c0_16, %c0_17] : memref<1x1024xf32, #tpu.memory_space<vmem>>, vector<1x1024xf32>
    %17 = vector.broadcast %16 : vector<1x1024xf32> to vector<16x1024xf32>
    %18 = arith.addf %15, %17 : vector<16x1024xf32>
    %cst_18 = arith.constant 0.000000e+00 : f32
    %19 = vector.broadcast %cst_18 : f32 to vector<16x1024xf32>
    %20 = arith.maximumf %18, %19 : vector<16x1024xf32>
    %21 = arith.truncf %20 : vector<16x1024xf32> to vector<16x1024xbf16>
    %c0_19 = arith.constant 0 : index
    %c0_20 = arith.constant 0 : index
    %22 = vector.load %arg6[%c0_19, %c0_20] : memref<1024x1024xbf16, #tpu.memory_space<vmem>>, vector<1024x1024xbf16>
    %cst_21 = arith.constant dense<0.000000e+00> : vector<16x1024xf32>
    %23 = tpu.matmul %21, %22, %cst_21 {dimension_numbers = #tpu.dot_dimension_numbers<[1], [0], [0], [1], [0, 0, 1, 1], [], []>} : vector<16x1024xbf16>, vector<1024x1024xbf16>, vector<16x1024xf32> -> vector<16x1024xf32>
    %c0_22 = arith.constant 0 : index
    %c0_23 = arith.constant 0 : index
    %24 = vector.load %arg7[%c0_22, %c0_23] : memref<1x1024xf32, #tpu.memory_space<vmem>>, vector<1x1024xf32>
    %25 = vector.broadcast %24 : vector<1x1024xf32> to vector<16x1024xf32>
    %26 = arith.addf %23, %25 : vector<16x1024xf32>
    %cst_24 = arith.constant 0.000000e+00 : f32
    %27 = vector.broadcast %cst_24 : f32 to vector<16x1024xf32>
    %28 = arith.maximumf %26, %27 : vector<16x1024xf32>
    %29 = arith.truncf %28 : vector<16x1024xf32> to vector<16x1024xbf16>
    %c0_25 = arith.constant 0 : index
    %c0_26 = arith.constant 0 : index
    %30 = vector.load %arg8[%c0_25, %c0_26] : memref<1024x512xbf16, #tpu.memory_space<vmem>>, vector<1024x512xbf16>
    %cst_27 = arith.constant dense<0.000000e+00> : vector<16x512xf32>
    %31 = tpu.matmul %29, %30, %cst_27 {dimension_numbers = #tpu.dot_dimension_numbers<[1], [0], [0], [1], [0, 0, 1, 1], [], []>} : vector<16x1024xbf16>, vector<1024x512xbf16>, vector<16x512xf32> -> vector<16x512xf32>
    %c0_28 = arith.constant 0 : index
    %c0_29 = arith.constant 0 : index
    %32 = vector.load %arg9[%c0_28, %c0_29] : memref<1x512xf32, #tpu.memory_space<vmem>>, vector<1x512xf32>
    %33 = vector.broadcast %32 : vector<1x512xf32> to vector<16x512xf32>
    %34 = arith.addf %31, %33 : vector<16x512xf32>
    %cst_30 = arith.constant 0.000000e+00 : f32
    %35 = vector.broadcast %cst_30 : f32 to vector<16x512xf32>
    %36 = arith.maximumf %34, %35 : vector<16x512xf32>
    %37 = arith.truncf %36 : vector<16x512xf32> to vector<16x512xbf16>
    %c0_31 = arith.constant 0 : index
    %c0_32 = arith.constant 0 : index
    %38 = vector.load %arg10[%c0_31, %c0_32] : memref<512x128xbf16, #tpu.memory_space<vmem>>, vector<512x128xbf16>
    %cst_33 = arith.constant dense<0.000000e+00> : vector<16x128xf32>
    %39 = tpu.matmul %37, %38, %cst_33 {dimension_numbers = #tpu.dot_dimension_numbers<[1], [0], [0], [1], [0, 0, 1, 1], [], []>} : vector<16x512xbf16>, vector<512x128xbf16>, vector<16x128xf32> -> vector<16x128xf32>
    %c0_34 = arith.constant 0 : index
    %c0_35 = arith.constant 0 : index
    %40 = vector.load %arg11[%c0_34, %c0_35] : memref<1x128xf32, #tpu.memory_space<vmem>>, vector<1x128xf32>
    %41 = vector.broadcast %40 : vector<1x128xf32> to vector<16x128xf32>
    %42 = arith.addf %39, %41 : vector<16x128xf32>
    %c0_36 = arith.constant 0 : index
    %c0_37 = arith.constant 0 : index
    %43 = vector.load %arg12[%c0_36, %c0_37] : memref<16x128xf32, #tpu.memory_space<vmem>>, vector<16x128xf32>
    tpu.vector_store %arg12[%c0_36, %c0_37], %42 {strides = array<i32>} : memref<16x128xf32, #tpu.memory_space<vmem>>, vector<16x128xf32>,
    return
  }
  func.func @transform_0(%arg0: i32) -> (i32, i32) {
    %c0_i32 = arith.constant 0 : i32
    %c0_i32_0 = arith.constant 0 : i32
    return %arg0, %c0_i32 : i32, i32
  }
  func.func @transform_1(%arg0: i32) -> (i32, i32) {
    %c0_i32 = arith.constant 0 : i32
    %c0_i32_0 = arith.constant 0 : i32
    %c0_i32_1 = arith.constant 0 : i32
    return %c0_i32, %c0_i32_0 : i32, i32
  }
  func.func @transform_2(%arg0: i32) -> (i32, i32) {
    %c0_i32 = arith.constant 0 : i32
    %c0_i32_0 = arith.constant 0 : i32
    %c0_i32_1 = arith.constant 0 : i32
    return %c0_i32, %c0_i32_0 : i32, i32
  }
  func.func @transform_3(%arg0: i32) -> (i32, i32) {
    %c0_i32 = arith.constant 0 : i32
    %c0_i32_0 = arith.constant 0 : i32
    %c0_i32_1 = arith.constant 0 : i32
    return %c0_i32, %c0_i32_0 : i32, i32
  }
  func.func @transform_4(%arg0: i32) -> (i32, i32) {
    %c0_i32 = arith.constant 0 : i32
    %c0_i32_0 = arith.constant 0 : i32
    %c0_i32_1 = arith.constant 0 : i32
    return %c0_i32, %c0_i32_0 : i32, i32
  }
  func.func @transform_5(%arg0: i32) -> (i32, i32) {
    %c0_i32 = arith.constant 0 : i32
    %c0_i32_0 = arith.constant 0 : i32
    %c0_i32_1 = arith.constant 0 : i32
    return %c0_i32, %c0_i32_0 : i32, i32
  }
  func.func @transform_6(%arg0: i32) -> (i32, i32) {
    %c0_i32 = arith.constant 0 : i32
    %c0_i32_0 = arith.constant 0 : i32
    %c0_i32_1 = arith.constant 0 : i32
    return %c0_i32, %c0_i32_0 : i32, i32
  }
  func.func @transform_7(%arg0: i32) -> (i32, i32) {
    %c0_i32 = arith.constant 0 : i32
    %c0_i32_0 = arith.constant 0 : i32
    %c0_i32_1 = arith.constant 0 : i32
    return %c0_i32, %c0_i32_0 : i32, i32
  }
  func.func @transform_8(%arg0: i32) -> (i32, i32) {
    %c0_i32 = arith.constant 0 : i32
    %c0_i32_0 = arith.constant 0 : i32
    %c0_i32_1 = arith.constant 0 : i32
    return %c0_i32, %c0_i32_0 : i32, i32
  }
  func.func @transform_9(%arg0: i32) -> (i32, i32) {
    %c0_i32 = arith.constant 0 : i32
    %c0_i32_0 = arith.constant 0 : i32
    %c0_i32_1 = arith.constant 0 : i32
    return %c0_i32, %c0_i32_0 : i32, i32
  }
  func.func @transform_10(%arg0: i32) -> (i32, i32) {
    %c0_i32 = arith.constant 0 : i32
    %c0_i32_0 = arith.constant 0 : i32
    %c0_i32_1 = arith.constant 0 : i32
    return %c0_i32, %c0_i32_0 : i32, i32
  }
  func.func @transform_11(%arg0: i32) -> (i32, i32) {
    %c0_i32 = arith.constant 0 : i32
    %c0_i32_0 = arith.constant 0 : i32
    return %arg0, %c0_i32 : i32, i32
  }
}

</mosaic_0001>

<bundles_post_ra>
// kernel: tpu_custom_call.1
= control target key start
LH: loop header
LB: loop body
LE: loop exit
PB: predicated region body
PF: predicated region fallthrough
CT: control target
= control target key end

     0   :  { %16 = vsyncpa [#allocation4], 0  ;;  %s11147_s0 = inlined_call_operand.hbm [shape: f32[16,174], index: 0, kind: input, shape index: {}]   ;;  %s11148_s1 = inlined_call_operand.hbm [shape: bf16[256,512], index: 1, kind: input, shape index: {}]   ;;  %s11149_s2 = inlined_call_operand.hbm [shape: f32[1,512], index: 2, kind: input, shape index: {}]   ;;  %s11150_s3 = inlined_call_operand.hbm [shape: bf16[512,1024], index: 3, kind: input, shape index: {}]   ;;  %s11151_s4 = inlined_call_operand.hbm [shape: f32[1,1024], index: 4, kind: input, shape index: {}]   ;;  %s11152_s5 = inlined_call_operand.hbm [shape: bf16[1024,1024], index: 5, kind: input, shape index: {}]   ;;  %s11153_s6 = inlined_call_operand.hbm [shape: f32[1,1024], index: 6, kind: input, shape index: {}]   ;;  %s11154_s7 = inlined_call_operand.hbm [shape: bf16[1024,512], index: 7, kind: input, shape index: {}]   ;;  %s11155_s8 = inlined_call_operand.hbm [shape: f32[1,512], index: 8, kind: input, shape index: {}]   ;;  %s11156_s9 = inlined_call_operand.hbm [shape: bf16[512,128], index: 9, kind: input, shape index: {}]   ;;  %s11157_s10 = inlined_call_operand.hbm [shape: f32[1,128], index: 10, kind: input, shape index: {}]   ;;  %s11158_s11 = inlined_call_operand.hbm [shape: f32[16,128], index: 11, kind: output, shape index: {}]  }
   0x1   :  { %17 = vsyncpa [#allocation7], 0 }
   0x2   :  { %18 = vsyncpa [#allocation10], 0 }
   0x3   :  { %19 = vsyncpa [#allocation13], 0 }
   0x4   :  { %20 = vsyncpa [#allocation16], 0 }
   0x5   :  { %21 = vsyncpa [#allocation19], 0 }
   0x6   :  { %22 = vsyncpa [#allocation5], 0  ;;  %s10737_s17 = smov [#allocation6]   ;;  %s10738_s19 = smov [#allocation9]  }
   0x7   :  { %s40_s18 = sshll.u32 %s10737_s17, 4  ;;  %s62_s20 = sshll.u32 %s10738_s19, 4  ;;  %s41_s18 = int_to_ptr.vmem [resolvable:$true] %s40_s18  ;;  %s63_s20 = int_to_ptr.vmem [resolvable:$true] %s62_s20 }
   0x8   :  { %s10491_s21 = scalar_lea.vmem %s41_s18, 8192  ;;  %p10496_p1 = scmp.lt.s32.totalorder %s41_s18, %s41_s18 }
   0x9   :  { %p10492_p0 = scmp.ne.s32.totalorder %s41_s18, %s10491_s21  ;;  %p10497_p2 = scmp.lt.s32.totalorder %s10491_s21, %s10491_s21 }
   0xb   :  { %p10498_p3 = por %p10497_p2, %p10496_p1 }
   0xd   :  { %p10499_p4 = pnand %p10498_p3, %p10492_p0 }
   0xf   :  { %10502 = shalt.err (!%p10499_p4)
}
  0x10   :  { %s10739_s22 = smov 256   ;;  %s10740_s23 = smov 16  }
  0x11   :  { %46 = dma.hbm_to_vmem [thread:$0]  %s11148_s1, 8192, %s41_s18, [#allocation7], %s10739_s22, %s10739_s22, %s10740_s23  }
  0x12   :  { %s10511_s26 = scalar_lea.vmem %s63_s20, 32768  ;;  %p10516_p6 = scmp.lt.s32.totalorder %s63_s20, %s63_s20 }
  0x13   :  { %p10512_p5 = scmp.ne.s32.totalorder %s63_s20, %s10511_s26  ;;  %p10517_p7 = scmp.lt.s32.totalorder %s10511_s26, %s10511_s26 }
  0x15   :  { %p10518_p8 = por %p10517_p7, %p10516_p6 }
  0x17   :  { %p10519_p9 = pnand %p10518_p8, %p10512_p5 }
  0x19   :  { %10522 = shalt.err (!%p10519_p9)
}
  0x1a   :  { %s10741_s27 = smov 512   ;;  %s10742_s28 = smov 32  }
  0x1b   :  { %68 = dma.hbm_to_vmem [thread:$0]  %s11150_s3, 32768, %s63_s20, [#allocation10], %s10741_s27, %s10741_s27, %s10742_s28  }
  0x1c   :  { %s10743_s12 = smov [#allocation12]   ;;  %s10744_s14 = smov [#allocation15]  }
  0x1d   :  { %s84_s13 = sshll.u32 %s10743_s12, 4  ;;  %s106_s15 = sshll.u32 %s10744_s14, 4  ;;  %s85_s13 = int_to_ptr.vmem [resolvable:$true] %s84_s13  ;;  %s107_s15 = int_to_ptr.vmem [resolvable:$true] %s106_s15 }
  0x1e   :  { %s10531_s1 = scalar_lea.vmem %s85_s13, 65536  ;;  %p10536_p11 = scmp.lt.s32.totalorder %s85_s13, %s85_s13 }
  0x1f   :  { %p10532_p10 = scmp.ne.s32.totalorder %s85_s13, %s10531_s1  ;;  %p10537_p12 = scmp.lt.s32.totalorder %s10531_s1, %s10531_s1 }
  0x21   :  { %p10538_p13 = por %p10537_p12, %p10536_p11 }
  0x23   :  { %p10539_p0 = pnand %p10538_p13, %p10532_p10 }
  0x25   :  { %10542 = shalt.err (!%p10539_p0)
}
  0x26   :  { %90 = dma.hbm_to_vmem [thread:$0]  %s11152_s5, 65536, %s85_s13, [#allocation13], %s10741_s27, %s10741_s27, %s10742_s28  }
  0x27   :  { %s10551_s18 = scalar_lea.vmem %s107_s15, 32768  ;;  %p10556_p2 = scmp.lt.s32.totalorder %s107_s15, %s107_s15 }
  0x28   :  { %p10552_p1 = scmp.ne.s32.totalorder %s107_s15, %s10551_s18  ;;  %p10557_p3 = scmp.lt.s32.totalorder %s10551_s18, %s10551_s18 }
  0x2a   :  { %p10558_p4 = por %p10557_p3, %p10556_p2 }
  0x2c   :  { %p10559_p5 = pnand %p10558_p4, %p10552_p1 }
  0x2e   :  { %10562 = shalt.err (!%p10559_p5)
}
  0x2f   :  { %112 = dma.hbm_to_vmem [thread:$0]  %s11154_s7, 32768, %s107_s15, [#allocation16], %s10739_s22, %s10739_s22, %s10740_s23  }
  0x30   :  { %s10745_s20 = smov [#allocation18]  }
  0x31   :  { %s128_s21 = sshll.u32 %s10745_s20, 4  ;;  %s129_s21 = int_to_ptr.vmem [resolvable:$true] %s128_s21 }
  0x32   :  { %s10571_s24 = scalar_lea.vmem %s129_s21, 4096  ;;  %p10576_p7 = scmp.lt.s32.totalorder %s129_s21, %s129_s21 }
  0x33   :  { %p10572_p6 = scmp.ne.s32.totalorder %s129_s21, %s10571_s24  ;;  %p10577_p8 = scmp.lt.s32.totalorder %s10571_s24, %s10571_s24 }
  0x35   :  { %p10578_p9 = por %p10577_p8, %p10576_p7 }
  0x37   :  { %p10579_p10 = pnand %p10578_p9, %p10572_p6 }
  0x39   :  { %10582 = shalt.err (!%p10579_p10)
}
  0x3a   :  { %s10746_s5 = smov 64   ;;  %s10747_s25 = smov 4  }
  0x3b   :  { %134 = dma.hbm_to_vmem [thread:$0]  %s11156_s9, 4096, %s129_s21, [#allocation19], %s10746_s5, %s10746_s5, %s10747_s25  }
  0x3c   :  { %s10748_s28 = smov [#allocation3]   ;;  %s10749_s7 = smov [#allocation8]  }
  0x3d   :  { %s28_s29 = sshll.u32 %s10748_s28, 4  ;;  %s53_s30 = sshll.u32 %s10749_s7, 4  ;;  %s29_s29 = int_to_ptr.vmem [resolvable:$true] %s28_s29  ;;  %s54_s30 = int_to_ptr.vmem [resolvable:$true] %s53_s30 }
  0x3e   :  { %s10591_s12 = scalar_lea.vmem %s29_s29, 512  ;;  %p10596_p12 = scmp.lt.s32.totalorder %s29_s29, %s29_s29 }
  0x3f   :  { %p10592_p11 = scmp.ne.s32.totalorder %s29_s29, %s10591_s12  ;;  %p10597_p13 = scmp.lt.s32.totalorder %s10591_s12, %s10591_s12 }
  0x41   :  { %p10598_p0 = por %p10597_p13, %p10596_p12 }
  0x43   :  { %p10599_p1 = pnand %p10598_p0, %p10592_p11 }
  0x45   :  { %10602 = shalt.err (!%p10599_p1)
}
  0x46   :  { %34 = dma.hbm_to_vmem [thread:$0]  %s11147_s0, 512, %s29_s29, [#allocation4], %s10739_s22, %s10739_s22, %s10740_s23  }
  0x47   :  { %s10611_s9 = scalar_lea.vmem %s54_s30, 64  ;;  %p10616_p3 = scmp.lt.s32.totalorder %s54_s30, %s54_s30 }
  0x48   :  { %p10612_p2 = scmp.ne.s32.totalorder %s54_s30, %s10611_s9  ;;  %p10617_p4 = scmp.lt.s32.totalorder %s10611_s9, %s10611_s9 }
  0x4a   :  { %p10618_p5 = por %p10617_p4, %p10616_p3 }
  0x4c   :  { %p10619_p6 = pnand %p10618_p5, %p10612_p2 }
  0x4e   :  { %10622 = shalt.err (!%p10619_p6)
}
  0x4f   :  { %56 = dma.hbm_to_vmem [thread:$0]  %s11149_s2, 64, %s54_s30, [#allocation7]  }
  0x50   :  { %s10750_s16 = smov [#allocation11]   ;;  %s10751_s18 = smov [#allocation14]  }
  0x51   :  { %s75_s17 = sshll.u32 %s10750_s16, 4  ;;  %s97_s3 = sshll.u32 %s10751_s18, 4  ;;  %s76_s17 = int_to_ptr.vmem [resolvable:$true] %s75_s17  ;;  %s98_s3 = int_to_ptr.vmem [resolvable:$true] %s97_s3 }
  0x52   :  { %s10631_s19 = scalar_lea.vmem %s76_s17, 128  ;;  %p10636_p8 = scmp.lt.s32.totalorder %s76_s17, %s76_s17 }
  0x53   :  { %p10632_p7 = scmp.ne.s32.totalorder %s76_s17, %s10631_s19  ;;  %p10637_p9 = scmp.lt.s32.totalorder %s10631_s19, %s10631_s19 }
  0x55   :  { %p10638_p10 = por %p10637_p9, %p10636_p8 }
  0x57   :  { %p10639_p11 = pnand %p10638_p10, %p10632_p7 }
  0x59   :  { %10642 = shalt.err (!%p10639_p11)
}
  0x5a   :  { %78 = dma.hbm_to_vmem [thread:$0]  %s11151_s4, 128, %s76_s17, [#allocation10]  }
  0x5b   :  { %s10651_s23 = scalar_lea.vmem %s98_s3, 128  ;;  %p10656_p13 = scmp.lt.s32.totalorder %s98_s3, %s98_s3 }
  0x5c   :  { %p10652_p12 = scmp.ne.s32.totalorder %s98_s3, %s10651_s23  ;;  %p10657_p0 = scmp.lt.s32.totalorder %s10651_s23, %s10651_s23 }
  0x5e   :  { %p10658_p1 = por %p10657_p0, %p10656_p13 }
  0x60   :  { %p10659_p2 = pnand %p10658_p1, %p10652_p12 }
  0x62   :  { %10662 = shalt.err (!%p10659_p2)
}
  0x63   :  { %100 = dma.hbm_to_vmem [thread:$0]  %s11153_s6, 128, %s98_s3, [#allocation13]  }
  0x64   :  { %s10752_s21 = smov [#allocation17]   ;;  %s10753_s5 = smov [#allocation20]  }
  0x65   :  { %s119_s24 = sshll.u32 %s10752_s21, 4  ;;  %s141_s25 = sshll.u32 %s10753_s5, 4  ;;  %s120_s24 = int_to_ptr.vmem [resolvable:$true] %s119_s24  ;;  %s142_s25 = int_to_ptr.vmem [resolvable:$true] %s141_s25 }
  0x66   :  { %s10671_s26 = scalar_lea.vmem %s120_s24, 64  ;;  %p10676_p4 = scmp.lt.s32.totalorder %s120_s24, %s120_s24 }
  0x67   :  { %p10672_p3 = scmp.ne.s32.totalorder %s120_s24, %s10671_s26  ;;  %p10677_p5 = scmp.lt.s32.totalorder %s10671_s26, %s10671_s26 }
  0x69   :  { %p10678_p6 = por %p10677_p5, %p10676_p4 }
  0x6b   :  { %p10679_p7 = pnand %p10678_p6, %p10672_p3 }
  0x6d   :  { %10682 = shalt.err (!%p10679_p7)
}
  0x6e   :  { %122 = dma.hbm_to_vmem [thread:$0]  %s11155_s8, 64, %s120_s24, [#allocation16]  }
  0x6f   :  { %s10691_s28 = scalar_lea.vmem %s142_s25, 16  ;;  %s10695_s6 = scalar_lea.vmem %s142_s25, 32 }
  0x70   :  { %p10692_p8 = scmp.ne.s32.totalorder %s142_s25, %s10691_s28  ;;  %p10696_p9 = scmp.lt.s32.totalorder %s142_s25, %s142_s25 }
  0x71   :  { %p10697_p10 = scmp.lt.s32.totalorder %s10695_s6, %s10691_s28 }
  0x73   :  { %p10698_p11 = por %p10697_p10, %p10696_p9 }
  0x75   :  { %p10699_p12 = pnand %p10698_p11, %p10692_p8 }
  0x77   :  { %10702 = shalt.err (!%p10699_p12)
}
  0x78   :  { %144 = dma.hbm_to_vmem [thread:$0]  %s11157_s10, 16, %s142_s25, [#allocation19]  }
  0x79   :  { %10723 = dma.done.wait [#allocation4], 512  }
  0x7a   :  { %10724 = vsyncadd [#allocation4], 4294966784 }
  0x7b   :  { %10725 = dma.done.wait [#allocation7], 8256  }
  0x7c   :  { %10726 = vsyncadd [#allocation7], 4294959040 }
  0x7d   :  { %10727 = dma.done.wait [#allocation10], 32896  }
  0x7e   :  { %10728 = vsyncadd [#allocation10], 4294934400 }
  0x7f   :  { %10729 = dma.done.wait [#allocation13], 65664  }
  0x80   :  { %10730 = vsyncadd [#allocation13], 4294901632 }
  0x81   :  { %10731 = dma.done.wait [#allocation16], 32832  }
  0x82   :  { %10732 = vsyncadd [#allocation16], 4294934464 }
  0x83   :  { %10733 = dma.done.wait [#allocation19], 4112  }
  0x84   :  { %10734 = vsyncadd [#allocation19], 4294963184  ;;  %v10754_v0 = vmov 0   ;;  %v9965_v1 = vld [vmem:[#allocation6 + $0xe4] ss:$16 sps:$4 sm:$0xff]   ;;  %vm197_vm0 = vcmask 1043456  }
  0x85   :  { %179 = vst [vmem:[#allocation2] sm:$0xff] %v10754_v0  ;;  %180 = vst [vmem:[#allocation2 + $0x8] sm:$0xff] %v10754_v0  ;;  %v9967_v2 = vld [vmem:[#allocation6 + $0xec] ss:$16 sps:$4 sm:$0xff]   ;;  %620 = vmatprep.subr.bf16.mxu0 %v9965_v1  ;;  %v9969_v3 = vld [vmem:[#allocation6 + $0xe0] ss:$16 sps:$4 sm:$0xff]  }
  0x86   :  { %v9970_v4 = vld [vmem:[#allocation6 + $0xe8] ss:$16 sps:$4 sm:$0xff]   ;;  %663 = vmatprep.subr.bf16.mxu1 %v9967_v2  ;;  %v9971_v5 = vld [vmem:[#allocation6 + $0xc4] ss:$16 sps:$4 sm:$0xff]   ;;  %621 = vmatpush1.bf16.msra.mxu0 %v9969_v3  ;;  %v9973_v6 = vld [vmem:[#allocation6 + $0xcc] ss:$16 sps:$4 sm:$0xff]  }
  0x87   :  { %664 = vmatpush1.bf16.msra.mxu1 %v9970_v4  ;;  %v9975_v7 = vld [vmem:[#allocation6 + $0xc0] ss:$16 sps:$4 sm:$0xff]   ;;  %622 = vmatprep.subr.bf16.mxu0 %v9971_v5  ;;  %v9976_v8 = vld [vmem:[#allocation6 + $0xc8] ss:$16 sps:$4 sm:$0xff]   ;;  %v9977_v9 = vld [vmem:[#allocation6 + $0xa4] ss:$16 sps:$4 sm:$0xff]  }
  0x88   :  { %665 = vmatprep.subr.bf16.mxu1 %v9973_v6  ;;  %v9979_v10 = vld [vmem:[#allocation6 + $0xac] ss:$16 sps:$4 sm:$0xff]   ;;  %v9981_v11 = vld [vmem:[#allocation6 + $0xa0] ss:$16 sps:$4 sm:$0xff]   ;;  %v9982_v12 = vld [vmem:[#allocation6 + $0xa8] ss:$16 sps:$4 sm:$0xff]  }
  0x89   :  { %v9983_v13 = vld [vmem:[#allocation6 + $0x84] ss:$16 sps:$4 sm:$0xff]   ;;  %v9985_v14 = vld [vmem:[#allocation6 + $0x8c] ss:$16 sps:$4 sm:$0xff]   ;;  %v9987_v15 = vld [vmem:[#allocation6 + $0x80] ss:$16 sps:$4 sm:$0xff]  }
  0x8a   :  { %623 = vmatpush1.bf16.msra.mxu0 %v9975_v7  ;;  %v9988_v16 = vld [vmem:[#allocation6 + $0x88] ss:$16 sps:$4 sm:$0xff]   ;;  %v9989_v17 = vld [vmem:[#allocation6 + $0x64] ss:$16 sps:$4 sm:$0xff]   ;;  %v9991_v18 = vld [vmem:[#allocation6 + $0x6c] ss:$16 sps:$4 sm:$0xff]  }
  0x8b   :  { %666 = vmatpush1.bf16.msra.mxu1 %v9976_v8  ;;  %624 = vmatprep.subr.bf16.mxu0 %v9977_v9  ;;  %v9993_v19 = vld [vmem:[#allocation6 + $0x60] ss:$16 sps:$4 sm:$0xff]   ;;  %v9994_v20 = vld [vmem:[#allocation6 + $0x68] ss:$16 sps:$4 sm:$0xff]   ;;  %v9995_v21 = vld [vmem:[#allocation6 + $0x44] ss:$16 sps:$4 sm:$0xff]  }
  0x8c   :  { %667 = vmatprep.subr.bf16.mxu1 %v9979_v10  ;;  %v9997_v22 = vld [vmem:[#allocation6 + $0x4c] ss:$16 sps:$4 sm:$0xff]   ;;  %v9999_v23 = vld [vmem:[#allocation6 + $0x40] ss:$16 sps:$4 sm:$0xff]   ;;  %v10000_v24 = vld [vmem:[#allocation6 + $0x48] ss:$16 sps:$4 sm:$0xff]  }
  0x8d   :  { %v10001_v25 = vld [vmem:[#allocation6 + $0x24] ss:$16 sps:$4 sm:$0xff]   ;;  %v10003_v26 = vld [vmem:[#allocation6 + $0x2c] ss:$16 sps:$4 sm:$0xff]   ;;  %v10005_v27 = vld [vmem:[#allocation6 + $0x20] ss:$16 sps:$4 sm:$0xff]  }
  0x8e   :  { %625 = vmatpush1.bf16.msra.mxu0 %v9981_v11  ;;  %v10006_v28 = vld [vmem:[#allocation6 + $0x28] ss:$16 sps:$4 sm:$0xff]   ;;  %v10007_v29 = vld [vmem:[#allocation6 + $0x4] ss:$16 sps:$4 sm:$0xff]   ;;  %v10009_v30 = vld [vmem:[#allocation6 + $0xc] ss:$16 sps:$4 sm:$0xff]  }
  0x8f   :  { %668 = vmatpush1.bf16.msra.mxu1 %v9982_v12  ;;  %626 = vmatprep.subr.bf16.mxu0 %v9983_v13  ;;  %v10011_v31 = vld [vmem:[#allocation6] ss:$16 sps:$4 sm:$0xff]   ;;  %v10012_v32 = vld [vmem:[#allocation6 + $0x8] ss:$16 sps:$4 sm:$0xff]   ;;  %v10013_v33 = vld [vmem:[#allocation6 + $0x1e4] ss:$16 sps:$4 sm:$0xff]  }
  0x90   :  { %669 = vmatprep.subr.bf16.mxu1 %v9985_v14  ;;  %v10015_v34 = vld [vmem:[#allocation6 + $0x1ec] ss:$16 sps:$4 sm:$0xff]   ;;  %v10017_v35 = vld [vmem:[#allocation6 + $0x1e0] ss:$16 sps:$4 sm:$0xff]   ;;  %v10018_v36 = vld [vmem:[#allocation6 + $0x1e8] ss:$16 sps:$4 sm:$0xff]  }
  0x91   :  { %v10019_v37 = vld [vmem:[#allocation6 + $0x1c4] ss:$16 sps:$4 sm:$0xff]   ;;  %v10021_v38 = vld [vmem:[#allocation6 + $0x1cc] ss:$16 sps:$4 sm:$0xff]   ;;  %v10023_v39 = vld [vmem:[#allocation6 + $0x1c0] ss:$16 sps:$4 sm:$0xff]  }
  0x92   :  { %627 = vmatpush1.bf16.msra.mxu0 %v9987_v15  ;;  %v10024_v40 = vld [vmem:[#allocation6 + $0x1c8] ss:$16 sps:$4 sm:$0xff]   ;;  %v10025_v41 = vld [vmem:[#allocation6 + $0x1a4] ss:$16 sps:$4 sm:$0xff]   ;;  %v10027_v42 = vld [vmem:[#allocation6 + $0x1ac] ss:$16 sps:$4 sm:$0xff]  }
  0x93   :  { %670 = vmatpush1.bf16.msra.mxu1 %v9988_v16  ;;  %628 = vmatprep.subr.bf16.mxu0 %v9989_v17  ;;  %v10029_v43 = vld [vmem:[#allocation6 + $0x1a0] ss:$16 sps:$4 sm:$0xff]   ;;  %v10030_v44 = vld [vmem:[#allocation6 + $0x1a8] ss:$16 sps:$4 sm:$0xff]   ;;  %vm198_vm1 = vcmask 375812   ;;  %s10755_s8 = smov [#allocation21]  }
  0x94   :  { %671 = vmatprep.subr.bf16.mxu1 %v9991_v18  ;;  %v10031_v45 = vld [vmem:[#allocation6 + $0x184] ss:$16 sps:$4 sm:$0xff]   ;;  %v10033_v46 = vld [vmem:[#allocation6 + $0x18c] ss:$16 sps:$4 sm:$0xff]   ;;  %vm199_vm2 = vmor %vm198_vm1, %vm197_vm0  ;;  %s8756_s10 = sshll.u32 %s10755_s8, 4  ;;  %s8757_s10 = int_to_ptr.vmem [resolvable:$true] %s8756_s10 }
  0x95   :  { %v181_v47 = vld [vmem:[#allocation3] sm:$0xff]  ;;  %v182_v48 = vld [vmem:[#allocation3 + $0x8] sm:$0xff]  ;;  %v183_v49 = vld [vmem:[#allocation3 + $0x10] sm:$0xff]  ;;  %s10703_s30 = scalar_lea.vmem %s8757_s10, 256  ;;  %p10708_p0 = scmp.lt.s32.totalorder %s8757_s10, %s8757_s10 }
  0x96   :  { %629 = vmatpush1.bf16.msra.mxu0 %v9993_v19  ;;  %v184_v50 = vld [vmem:[#allocation3 + $0x18] sm:$0xff]  ;;  %v10035_v51 = vld [vmem:[#allocation6 + $0x180] ss:$16 sps:$4 sm:$0xff]   ;;  %v9898_v53 = vpack.c.bf16 %v182_v48, %v181_v47  ;;  %v10037_v55 = vld [vmem:[#allocation6 + $0x164] ss:$16 sps:$4 sm:$0xff]   ;;  %p10704_p13 = scmp.ne.s32.totalorder %s8757_s10, %s10703_s30  ;;  %p10709_p1 = scmp.lt.s32.totalorder %s10703_s30, %s10703_s30 }
  0x97   :  { %672 = vmatpush1.bf16.msra.mxu1 %v9994_v20  ;;  %630 = vmatprep.subr.bf16.mxu0 %v9995_v21  ;;  %v10036_v52 = vld [vmem:[#allocation6 + $0x188] ss:$16 sps:$4 sm:$0xff]   ;;  %v9899_v54 = vpack.c.bf16 %v184_v50, %v183_v49  ;;  %v10039_v56 = vld [vmem:[#allocation6 + $0x16c] ss:$16 sps:$4 sm:$0xff]   ;;  %v10041_v57 = vld [vmem:[#allocation6 + $0x160] ss:$16 sps:$4 sm:$0xff]  }
  0x98   :  { %673 = vmatprep.subr.bf16.mxu1 %v9997_v22  ;;  %200 = vst.msk [vmem:[#allocation2] sm:$0xff] %vm199_vm2, %v9898_v53  ;;  %v10042_v58 = vld [vmem:[#allocation6 + $0x168] ss:$16 sps:$4 sm:$0xff]   ;;  %v10043_v59 = vld [vmem:[#allocation6 + $0x144] ss:$16 sps:$4 sm:$0xff]   ;;  %p10710_p2 = por %p10709_p1, %p10708_p0 }
  0x99   :  { %201 = vst.msk [vmem:[#allocation2 + $0x8] sm:$0xff] %vm199_vm2, %v9899_v54  ;;  %v10045_v60 = vld [vmem:[#allocation6 + $0x14c] ss:$16 sps:$4 sm:$0xff]   ;;  %v10047_v61 = vld [vmem:[#allocation6 + $0x140] ss:$16 sps:$4 sm:$0xff]   ;;  %v774_v6 = vld [vmem:[#allocation9 + $0x1c0] sm:$0xff] }
  0x9a   :  { %631 = vmatpush1.bf16.msra.mxu0 %v9999_v23  ;;  %v10048_v62 = vld [vmem:[#allocation6 + $0x148] ss:$16 sps:$4 sm:$0xff]   ;;  %v10049_v63 = vld [vmem:[#allocation6 + $0x124] ss:$16 sps:$4 sm:$0xff]   ;;  %v10051_v0 = vld [vmem:[#allocation6 + $0x12c] ss:$16 sps:$4 sm:$0xff]   ;;  %p10711_p3 = pnand %p10710_p2, %p10704_p13 }
  0x9b   :  { %674 = vmatpush1.bf16.msra.mxu1 %v10000_v24  ;;  %632 = vmatprep.subr.bf16.mxu0 %v10001_v25  ;;  %v10053_v2 = vld [vmem:[#allocation6 + $0x120] ss:$16 sps:$4 sm:$0xff]   ;;  %v10054_v3 = vld [vmem:[#allocation6 + $0x128] ss:$16 sps:$4 sm:$0xff]   ;;  %v10055_v4 = vld [vmem:[#allocation6 + $0x104] ss:$16 sps:$4 sm:$0xff]  }
  0x9c   :  { %675 = vmatprep.subr.bf16.mxu1 %v10003_v26  ;;  %v10057_v5 = vld [vmem:[#allocation6 + $0x10c] ss:$16 sps:$4 sm:$0xff]   ;;  %v778_v7 = vld [vmem:[#allocation9 + $0x1e0] sm:$0xff]  ;;  %v10059_v10 = vld [vmem:[#allocation6 + $0x100] ss:$16 sps:$4 sm:$0xff]  }
  0x9d   :  { %v902_v8 = vld [vmem:[#allocation9 + $0x5c0] sm:$0xff]  ;;  %v8898_v12 = vcombine.high %v774_v6, %v778_v7  ;;  %v8897_v19 = vcombine.low %v774_v6, %v778_v7 }
  0x9e   :  { %633 = vmatpush1.bf16.msra.mxu0 %v10005_v27  ;;  %v906_v9 = vld [vmem:[#allocation9 + $0x5e0] sm:$0xff] }
  0x9f   :  { %676 = vmatpush1.bf16.msra.mxu1 %v10006_v28  ;;  %634 = vmatprep.subr.bf16.mxu0 %v10007_v29  ;;  %v10060_v11 = vld [vmem:[#allocation6 + $0x108] ss:$16 sps:$4 sm:$0xff]   ;;  %v9026_v13 = vcombine.high %v902_v8, %v906_v9  ;;  %v9025_v20 = vcombine.low %v902_v8, %v906_v9 }
  0xa0   :  { %677 = vmatprep.subr.bf16.mxu1 %v10009_v30  ;;  %v10063_v1 = vld [vmem:[#allocation2 + $0x4] ss:$8 sps:$4 sm:$0xff]   ;;  %v766_v14 = vld [vmem:[#allocation9 + $0x180] sm:$0xff]  ;;  %v10061_v16 = vld [vmem:[#allocation2] ss:$8 sps:$4 sm:$0xff]  }
  0xa1   :  { %652 = vmatprep.mubr.bf16.mxu0 %v10063_v1  ;;  %695 = vmatprep.mubr.bf16.mxu1 %v10063_v1  ;;  %v770_v15 = vld [vmem:[#allocation9 + $0x1a0] sm:$0xff] }
  0xa2   :  { %635 = vmatpush1.bf16.msra.mxu0 %v10011_v31  ;;  %v894_v17 = vld [vmem:[#allocation9 + $0x580] sm:$0xff]  ;;  %v8890_v25 = vcombine.high %v766_v14, %v770_v15  ;;  %v8889_v27 = vcombine.low %v766_v14, %v770_v15 }
  0xa3   :  { %678 = vmatpush1.bf16.msra.mxu1 %v10012_v32  ;;  %636 = vmatprep.subr.bf16.mxu0 %v10013_v33  ;;  %v898_v18 = vld [vmem:[#allocation9 + $0x5a0] sm:$0xff] }
  0xa4   :  { %679 = vmatprep.subr.bf16.mxu1 %v10015_v34  ;;  %v758_v21 = vld [vmem:[#allocation9 + $0x140] sm:$0xff]  ;;  %v9018_v26 = vcombine.high %v894_v17, %v898_v18  ;;  %v9017_v28 = vcombine.low %v894_v17, %v898_v18 }
  0xa5   :  { %v762_v22 = vld [vmem:[#allocation9 + $0x160] sm:$0xff] }
  0xa6   :  { %637 = vmatpush2.bf16.msra.mxu0 %v10017_v35  ;;  %v886_v23 = vld [vmem:[#allocation9 + $0x540] sm:$0xff]  ;;  %v8882_v33 = vcombine.high %v758_v21, %v762_v22  ;;  %v8881_v35 = vcombine.low %v758_v21, %v762_v22 }
  0xa7   :  { %680 = vmatpush2.bf16.msra.mxu1 %v10018_v36  ;;  %638 = vmatprep.subr.bf16.mxu0 %v10019_v37  ;;  %v890_v24 = vld [vmem:[#allocation9 + $0x560] sm:$0xff] }
  0xa8   :  { %681 = vmatprep.subr.bf16.mxu1 %v10021_v38  ;;  %v750_v29 = vld [vmem:[#allocation9 + $0x100] sm:$0xff]  ;;  %v9010_v34 = vcombine.high %v886_v23, %v890_v24  ;;  %v9009_v36 = vcombine.low %v886_v23, %v890_v24 }
  0xa9   :  { %v754_v30 = vld [vmem:[#allocation9 + $0x120] sm:$0xff] }
  0xaa   :  { %639 = vmatpush2.bf16.msra.mxu0 %v10023_v39  ;;  %v878_v31 = vld [vmem:[#allocation9 + $0x500] sm:$0xff] }
  0xab   :  { %682 = vmatpush2.bf16.msra.mxu1 %v10024_v40  ;;  %640 = vmatprep.subr.bf16.mxu0 %v10025_v41  ;;  %v882_v32 = vld [vmem:[#allocation9 + $0x520] sm:$0xff]  ;;  %v8874_v41 = vcombine.high %v750_v29, %v754_v30 }
  0xac   :  { %683 = vmatprep.subr.bf16.mxu1 %v10027_v42  ;;  %v742_v37 = vld [vmem:[#allocation9 + $0xc0] sm:$0xff]  ;;  %v9002_v42 = vcombine.high %v878_v31, %v882_v32 }
  0xad   :  { %v746_v38 = vld [vmem:[#allocation9 + $0xe0] sm:$0xff] }
  0xae   :  { %641 = vmatpush2.bf16.msra.mxu0 %v10029_v43  ;;  %v870_v39 = vld [vmem:[#allocation9 + $0x4c0] sm:$0xff]  ;;  %v8873_v43 = vcombine.low %v750_v29, %v754_v30  ;;  %v8866_v49 = vcombine.high %v742_v37, %v746_v38 }
  0xaf   :  { %684 = vmatpush2.bf16.msra.mxu1 %v10030_v44  ;;  %642 = vmatprep.subr.bf16.mxu0 %v10031_v45  ;;  %v874_v40 = vld [vmem:[#allocation9 + $0x4e0] sm:$0xff]  ;;  %v9001_v44 = vcombine.low %v878_v31, %v882_v32 }
  0xb0   :  { %685 = vmatprep.subr.bf16.mxu1 %v10033_v46  ;;  %v734_v45 = vld [vmem:[#allocation9 + $0x80] sm:$0xff]  ;;  %v8994_v50 = vcombine.high %v870_v39, %v874_v40 }
  0xb1   :  { %v738_v46 = vld [vmem:[#allocation9 + $0xa0] sm:$0xff] }
  0xb2   :  { %643 = vmatpush2.bf16.msra.mxu0 %v10035_v51  ;;  %v862_v47 = vld [vmem:[#allocation9 + $0x480] sm:$0xff]  ;;  %v8865_v51 = vcombine.low %v742_v37, %v746_v38 }
  0xb3   :  { %686 = vmatpush2.bf16.msra.mxu1 %v10036_v52  ;;  %644 = vmatprep.subr.bf16.mxu0 %v10037_v55  ;;  %v866_v48 = vld [vmem:[#allocation9 + $0x4a0] sm:$0xff]  ;;  %v8993_v52 = vcombine.low %v870_v39, %v874_v40 }
  0xb4   :  { %687 = vmatprep.subr.bf16.mxu1 %v10039_v56  ;;  %v726_v53 = vld [vmem:[#allocation9 + $0x40] sm:$0xff] }
  0xb5   :  { %v730_v54 = vld [vmem:[#allocation9 + $0x60] sm:$0xff] }
  0xb6   :  { %645 = vmatpush2.bf16.msra.mxu0 %v10041_v57  ;;  %v854_v55 = vld [vmem:[#allocation9 + $0x440] sm:$0xff]  ;;  %v8858_v57 = vcombine.high %v734_v45, %v738_v46  ;;  %v8850_v1 = vcombine.high %v726_v53, %v730_v54 }
  0xb7   :  { %688 = vmatpush2.bf16.msra.mxu1 %v10042_v58  ;;  %646 = vmatprep.subr.bf16.mxu0 %v10043_v59  ;;  %v858_v56 = vld [vmem:[#allocation9 + $0x460] sm:$0xff]  ;;  %v8986_v58 = vcombine.high %v862_v47, %v866_v48  ;;  %v8857_v59 = vcombine.low %v734_v45, %v738_v46 }
  0xb8   :  { %689 = vmatprep.subr.bf16.mxu1 %v10045_v60  ;;  %v8985_v60 = vcombine.low %v862_v47, %v866_v48  ;;  %v842_v6 = vld [vmem:[#allocation9 + $0x3e0] sm:$0xff] }
  0xb9   :  { %v966_v7 = vld [vmem:[#allocation9 + $0x7c0] sm:$0xff] }
  0xba   :  { %647 = vmatpush2.bf16.msra.mxu0 %v10047_v61  ;;  %v718_v61 = vld [vmem:[#allocation9] sm:$0xff] }
  0xbb   :  { %690 = vmatpush2.bf16.msra.mxu1 %v10048_v62  ;;  %648 = vmatprep.subr.bf16.mxu0 %v10049_v63  ;;  %v722_v62 = vld [vmem:[#allocation9 + $0x20] sm:$0xff] }
  0xbc   :  { %691 = vmatprep.subr.bf16.mxu1 %v10051_v0  ;;  %v846_v63 = vld [vmem:[#allocation9 + $0x400] sm:$0xff]  ;;  %v8842_v9 = vcombine.high %v718_v61, %v722_v62 }
  0xbd   :  { %v850_v0 = vld [vmem:[#allocation9 + $0x420] sm:$0xff] }
  0xbe   :  { %649 = vmatpush2.bf16.msra.mxu0 %v10053_v2  ;;  %v8978_v2 = vcombine.high %v854_v55, %v858_v56  ;;  %v970_v8 = vld [vmem:[#allocation9 + $0x7e0] sm:$0xff] }
  0xbf   :  { %692 = vmatpush2.bf16.msra.mxu1 %v10054_v3  ;;  %650 = vmatprep.subr.bf16.mxu0 %v10055_v4  ;;  %v8849_v3 = vcombine.low %v726_v53, %v730_v54  ;;  %v8977_v4 = vcombine.low %v854_v55, %v858_v56  ;;  %v834_v14 = vld [vmem:[#allocation9 + $0x3a0] sm:$0xff]  ;;  %v9090_v18 = vcombine.high %v966_v7, %v970_v8 }
  0xc0   :  { %693 = vmatprep.subr.bf16.mxu1 %v10057_v5  ;;  %v838_v5 = vld [vmem:[#allocation9 + $0x3c0] sm:$0xff] }
  0xc1   :  { %v958_v15 = vld [vmem:[#allocation9 + $0x780] sm:$0xff]  ;;  %v8962_v17 = vcombine.high %v838_v5, %v842_v6 }
  0xc2   :  { %651 = vmatpush2.bf16.msra.mxu0 %v10059_v10  ;;  %v8970_v10 = vcombine.high %v846_v63, %v850_v0  ;;  %v822_v21 = vld [vmem:[#allocation9 + $0x340] sm:$0xff] }
  0xc3   :  { %694 = vmatpush2.bf16.msra.mxu1 %v10060_v11  ;;  %2296 = vmatprep.subr.bf16.mxu0 %v8898_v12  ;;  %v8841_v11 = vcombine.low %v718_v61, %v722_v62  ;;  %v8969_v12 = vcombine.low %v846_v63, %v850_v0  ;;  %v826_v22 = vld [vmem:[#allocation9 + $0x360] sm:$0xff] }
  0xc4   :  { %2339 = vmatprep.subr.bf16.mxu1 %v9026_v13  ;;  %v830_v13 = vld [vmem:[#allocation9 + $0x380] sm:$0xff] }
  0xc5   :  { %653 = vmatmul.mubr.bf16.vlgmr.msra.gmra.mxu0 %v10061_v16  ;;  %v950_v23 = vld [vmem:[#allocation9 + $0x740] sm:$0xff] }
  0xc6   :  { %696 = vmatmul.mubr.bf16.vlgmr.msra.gmra.mxu1 %v10061_v16  ;;  %2297 = vmatpush1.bf16.msra.mxu0 %v8897_v19  ;;  %v962_v16 = vld [vmem:[#allocation9 + $0x7a0] sm:$0xff]  ;;  %v8961_v19 = vcombine.low %v838_v5, %v842_v6 }
  0xc7   :  { %2340 = vmatpush1.bf16.msra.mxu1 %v9025_v20  ;;  %2298 = vmatprep.subr.bf16.mxu0 %v8890_v25  ;;  %v9089_v20 = vcombine.low %v966_v7, %v970_v8  ;;  %v954_v24 = vld [vmem:[#allocation9 + $0x760] sm:$0xff]  ;;  %v8954_v25 = vcombine.high %v830_v13, %v834_v14 }
  0xc8   :  { %2341 = vmatprep.subr.bf16.mxu1 %v9018_v26  ;;  %v9082_v26 = vcombine.high %v958_v15, %v962_v16  ;;  %v814_v29 = vld [vmem:[#allocation9 + $0x300] sm:$0xff] }
  0xc9   :  { %v818_v30 = vld [vmem:[#allocation9 + $0x320] sm:$0xff] }
  0xca   :  { %2299 = vmatpush1.bf16.msra.mxu0 %v8889_v27  ;;  %v8953_v27 = vcombine.low %v830_v13, %v834_v14  ;;  %v942_v31 = vld [vmem:[#allocation9 + $0x700] sm:$0xff]  ;;  %v907_v13 = vld [vmem:[#allocation9 + $0x5e8] sm:$0xff] }
  0xcb   :  { %2342 = vmatpush1.bf16.msra.mxu1 %v9017_v28  ;;  %2300 = vmatprep.subr.bf16.mxu0 %v8882_v33  ;;  %v9081_v28 = vcombine.low %v958_v15, %v962_v16  ;;  %v946_v32 = vld [vmem:[#allocation9 + $0x720] sm:$0xff]  ;;  %v8946_v33 = vcombine.high %v822_v21, %v826_v22 }
  0xcc   :  { %2343 = vmatprep.subr.bf16.mxu1 %v9010_v34  ;;  %v9074_v34 = vcombine.high %v950_v23, %v954_v24  ;;  %v806_v37 = vld [vmem:[#allocation9 + $0x2c0] sm:$0xff] }
  0xcd   :  { %v810_v38 = vld [vmem:[#allocation9 + $0x2e0] sm:$0xff] }
  0xce   :  { %2301 = vmatpush1.bf16.msra.mxu0 %v8881_v35  ;;  %v8945_v35 = vcombine.low %v822_v21, %v826_v22  ;;  %v934_v39 = vld [vmem:[#allocation9 + $0x6c0] sm:$0xff]  ;;  %v8930_v45 = vcombine.high %v806_v37, %v810_v38  ;;  %v8929_v47 = vcombine.low %v806_v37, %v810_v38 }
  0xcf   :  { %2344 = vmatpush1.bf16.msra.mxu1 %v9009_v36  ;;  %2302 = vmatprep.subr.bf16.mxu0 %v8874_v41  ;;  %v9073_v36 = vcombine.low %v950_v23, %v954_v24  ;;  %v938_v40 = vld [vmem:[#allocation9 + $0x6e0] sm:$0xff]  ;;  %v8938_v41 = vcombine.high %v814_v29, %v818_v30  ;;  %v268_v23 = vld [vmem:[#allocation8] sm:$0xf] }
  0xd0   :  { %2345 = vmatprep.subr.bf16.mxu1 %v9002_v42  ;;  %v9066_v42 = vcombine.high %v942_v31, %v946_v32  ;;  %v9058_v46 = vcombine.high %v934_v39, %v938_v40  ;;  %v9057_v48 = vcombine.low %v934_v39, %v938_v40  ;;  %v930_v53 = vld [vmem:[#allocation9 + $0x6a0] sm:$0xff] }
  0xd1   :  { %v922_v61 = vld [vmem:[#allocation9 + $0x660] sm:$0xff] }
  0xd2   :  { %2303 = vmatpush1.bf16.msra.mxu0 %v8873_v43  ;;  %v8937_v43 = vcombine.low %v814_v29, %v818_v30  ;;  %v914_v5 = vld [vmem:[#allocation9 + $0x620] sm:$0xff] }
  0xd3   :  { %2346 = vmatpush1.bf16.msra.mxu1 %v9001_v44  ;;  %2304 = vmatprep.subr.bf16.mxu0 %v8866_v49  ;;  %v9065_v44 = vcombine.low %v942_v31, %v946_v32  ;;  %v798_v49 = vld [vmem:[#allocation9 + $0x280] sm:$0xff] }
  0xd4   :  { %2347 = vmatprep.subr.bf16.mxu1 %v8994_v50  ;;  %v802_v50 = vld [vmem:[#allocation9 + $0x2a0] sm:$0xff] }
  0xd5   :  { %v8921_v54 = vcombine.low %v798_v49, %v802_v50 }
  0xd6   :  { %2305 = vmatpush1.bf16.msra.mxu0 %v8865_v51  ;;  %v926_v51 = vld [vmem:[#allocation9 + $0x680] sm:$0xff] }
  0xd7   :  { %2348 = vmatpush1.bf16.msra.mxu1 %v8993_v52  ;;  %2306 = vmatprep.subr.bf16.mxu0 %v8858_v57  ;;  %v8922_v52 = vcombine.high %v798_v49, %v802_v50  ;;  %v9049_v55 = vcombine.low %v926_v51, %v930_v53  ;;  %v9050_v56 = vcombine.high %v926_v51, %v930_v53  ;;  %v790_v57 = vld [vmem:[#allocation9 + $0x240] sm:$0xff]  ;;  %v767_v50 = vld [vmem:[#allocation9 + $0x188] sm:$0xff] }
  0xd8   :  { %2349 = vmatprep.subr.bf16.mxu1 %v8986_v58  ;;  %v794_v58 = vld [vmem:[#allocation9 + $0x260] sm:$0xff]  ;;  %v771_v53 = vld [vmem:[#allocation9 + $0x1a8] sm:$0xff] }
  0xd9   :  { %v8913_v62 = vcombine.low %v790_v57, %v794_v58 }
  0xda   :  { %2307 = vmatpush1.bf16.msra.mxu0 %v8857_v59  ;;  %v918_v59 = vld [vmem:[#allocation9 + $0x640] sm:$0xff] }
  0xdb   :  { %2350 = vmatpush1.bf16.msra.mxu1 %v8985_v60  ;;  %2308 = vmatprep.subr.bf16.mxu0 %v8850_v1  ;;  %v8914_v60 = vcombine.high %v790_v57, %v794_v58  ;;  %v9041_v63 = vcombine.low %v918_v59, %v922_v61  ;;  %v9042_v0 = vcombine.high %v918_v59, %v922_v61  ;;  %v782_v1 = vld [vmem:[#allocation9 + $0x200] sm:$0xff] }
  0xdc   :  { %2351 = vmatprep.subr.bf16.mxu1 %v8978_v2  ;;  %v786_v2 = vld [vmem:[#allocation9 + $0x220] sm:$0xff]  ;;  %v8892_v61 = vcombine.high %v767_v50, %v771_v53 }
  0xdd   :  { %v8905_v6 = vcombine.low %v782_v1, %v786_v2 }
  0xde   :  { %2309 = vmatpush1.bf16.msra.mxu0 %v8849_v3  ;;  %v910_v3 = vld [vmem:[#allocation9 + $0x600] sm:$0xff] }
  0xdf   :  { %2352 = vmatpush1.bf16.msra.mxu1 %v8977_v4  ;;  %2310 = vmatprep.subr.bf16.mxu0 %v8842_v9  ;;  %v8906_v4 = vcombine.high %v782_v1, %v786_v2  ;;  %v9033_v7 = vcombine.low %v910_v3, %v914_v5  ;;  %v9034_v8 = vcombine.high %v910_v3, %v914_v5  ;;  %v10860_v9 = vld [vmem:[#allocation9 + $0x1c8] sm:$0xff] }
  0xe0   :  { %2353 = vmatprep.subr.bf16.mxu1 %v8970_v10  ;;  %v10862_v10 = vld [vmem:[#allocation9 + $0x1e8] sm:$0xff]  ;;  %v8891_v2 = vcombine.low %v767_v50, %v771_v53 }
  0xe1   :  { %v8899_v14 = vcombine.low %v10860_v9, %v10862_v10  ;;  %v891_v1 = vld [vmem:[#allocation9 + $0x568] sm:$0xff] }
  0xe2   :  { %2311 = vmatpush1.bf16.msra.mxu0 %v8841_v11  ;;  %v10864_v11 = vld [vmem:[#allocation9 + $0x5c8] sm:$0xff] }
  0xe3   :  { %2354 = vmatpush1.bf16.msra.mxu1 %v8969_v12  ;;  %2312 = vmatprep.subr.bf16.mxu0 %v8962_v17  ;;  %v8900_v12 = vcombine.high %v10860_v9, %v10862_v10  ;;  %v9027_v15 = vcombine.low %v10864_v11, %v907_v13  ;;  %v9028_v16 = vcombine.high %v10864_v11, %v907_v13  ;;  %v270_v17 = vlaneseq  ;;  %v883_v9 = vld [vmem:[#allocation9 + $0x528] sm:$0xff] }
  0xe4   :  { %2355 = vmatprep.subr.bf16.mxu1 %v9090_v18  ;;  %v967_v53 = vld [vmem:[#allocation9 + $0x7c8] sm:$0xff] }
  0xe5   :  { %v10872_v18 = vshrl.u32 %v270_v17, 7  ;;  %v875_v17 = vld [vmem:[#allocation9 + $0x4e8] sm:$0xff] }
  0xe6   :  { %2313 = vmatpush2.bf16.msra.mxu0 %v8961_v19 }
  0xe7   :  { %2356 = vmatpush2.bf16.msra.mxu1 %v9089_v20  ;;  %2314 = vmatprep.subr.bf16.mxu0 %v8954_v25  ;;  %v10875_v19 = vsub.s32 1, %v10872_v18  ;;  %v10878_v20 = vsub.s32 3, %v10872_v18  ;;  %v10881_v21 = vsub.s32 0, %v10872_v18  ;;  %v10884_v22 = vsub.s32 2, %v10872_v18 }
  0xe8   :  { %2357 = vmatprep.subr.bf16.mxu1 %v9082_v26 }
  0xe9   :  { %v277_v26 = vrot.slane %v268_v23, %v10875_v19  ;;  %v281_v29 = vrot.slane %v268_v23, %v10884_v22 }
  0xea   :  { %2315 = vmatpush2.bf16.msra.mxu0 %v8953_v27  ;;  %v285_v27 = vrot.slane %v268_v23, %v10878_v20 }
  0xeb   :  { %2358 = vmatpush2.bf16.msra.mxu1 %v9081_v28  ;;  %2316 = vmatprep.subr.bf16.mxu0 %v8946_v33  ;;  %v273_v28 = vrot.slane %v268_v23, %v10881_v21 }
  0xec   :  { %2359 = vmatprep.subr.bf16.mxu1 %v9074_v34 }
  0xee   :  { %2317 = vmatpush2.bf16.msra.mxu0 %v8945_v35 }
  0xef   :  { %2360 = vmatpush2.bf16.msra.mxu1 %v9073_v36  ;;  %2318 = vmatprep.subr.bf16.mxu0 %v8938_v41 }
  0xf0   :  { %2361 = vmatprep.subr.bf16.mxu1 %v9066_v42 }
  0xf2   :  { %2319 = vmatpush2.bf16.msra.mxu0 %v8937_v43 }
  0xf3   :  { %2362 = vmatpush2.bf16.msra.mxu1 %v9065_v44  ;;  %2320 = vmatprep.subr.bf16.mxu0 %v8930_v45 }
  0xf4   :  { %2363 = vmatprep.subr.bf16.mxu1 %v9058_v46 }
  0xf6   :  { %2321 = vmatpush2.bf16.msra.mxu0 %v8929_v47 }
  0xf7   :  { %2364 = vmatpush2.bf16.msra.mxu1 %v9057_v48  ;;  %2322 = vmatprep.subr.bf16.mxu0 %v8922_v52 }
  0xf8   :  { %2365 = vmatprep.subr.bf16.mxu1 %v9050_v56 }
  0xfa   :  { %2323 = vmatpush2.bf16.msra.mxu0 %v8921_v54  ;;  %v895_v54 = vld [vmem:[#allocation9 + $0x588] sm:$0xff] }
  0xfb   :  { %2366 = vmatpush2.bf16.msra.mxu1 %v9049_v55  ;;  %2324 = vmatprep.subr.bf16.mxu0 %v8914_v60  ;;  %v899_v55 = vld [vmem:[#allocation9 + $0x5a8] sm:$0xff] }
  0xfc   :  { %2367 = vmatprep.subr.bf16.mxu1 %v9042_v0  ;;  %v759_v60 = vld [vmem:[#allocation9 + $0x148] sm:$0xff]  ;;  %v9019_v3 = vcombine.low %v895_v54, %v899_v55 }
  0xfd   :  { %v887_v0 = vld [vmem:[#allocation9 + $0x548] sm:$0xff] }
  0xfe   :  { %2325 = vmatpush2.bf16.msra.mxu0 %v8913_v62  ;;  %v9020_v62 = vcombine.high %v895_v54, %v899_v55  ;;  %v9012_v5 = vcombine.high %v887_v0, %v891_v1  ;;  %v9011_v11 = vcombine.low %v887_v0, %v891_v1  ;;  %v971_v54 = vld [vmem:[#allocation9 + $0x7e8] sm:$0xff] }
  0xff   :  { %2368 = vmatpush2.bf16.msra.mxu1 %v9041_v63  ;;  %2326 = vmatprep.subr.bf16.mxu0 %v8906_v4  ;;  %v763_v63 = vld [vmem:[#allocation9 + $0x168] sm:$0xff] }
 0x100   :  { %2369 = vmatprep.subr.bf16.mxu1 %v9034_v8  ;;  %v8884_v4 = vcombine.high %v759_v60, %v763_v63  ;;  %v879_v8 = vld [vmem:[#allocation9 + $0x508] sm:$0xff]  ;;  %v8883_v10 = vcombine.low %v759_v60, %v763_v63 }
 0x101   :  { %v9004_v13 = vcombine.high %v879_v8, %v883_v9  ;;  %v831_v63 = vld [vmem:[#allocation9 + $0x388] sm:$0xff] }
 0x102   :  { %2327 = vmatpush2.bf16.msra.mxu0 %v8905_v6  ;;  %v751_v6 = vld [vmem:[#allocation9 + $0x108] sm:$0xff] }
 0x103   :  { %2370 = vmatpush2.bf16.msra.mxu1 %v9033_v7  ;;  %2382 = vmatprep.subr.bf16.mxu0 %v8900_v12  ;;  %v755_v7 = vld [vmem:[#allocation9 + $0x128] sm:$0xff] }
 0x104   :  { %2425 = vmatprep.subr.bf16.mxu1 %v9028_v16  ;;  %v8876_v12 = vcombine.high %v751_v6, %v755_v7  ;;  %v871_v16 = vld [vmem:[#allocation9 + $0x4c8] sm:$0xff]  ;;  %v8875_v23 = vcombine.low %v751_v6, %v755_v7 }
 0x105   :  { %v835_v0 = vld [vmem:[#allocation9 + $0x3a8] sm:$0xff] }
 0x106   :  { %v959_v1 = vld [vmem:[#allocation9 + $0x788] sm:$0xff] }
 0x107   :  { %v823_v7 = vld [vmem:[#allocation9 + $0x348] sm:$0xff] }
 0x185   :  { %v654_v24 = vpop.f32.mrf.mxu0 }
 0x186   :  { %v697_v25 = vpop.f32.mrf.mxu1  ;;  %v655_v38 = vadd.f32 %v654_v24, %v273_v28  ;;  %v9003_v24 = vcombine.low %v879_v8, %v883_v9  ;;  %v827_v8 = vld [vmem:[#allocation9 + $0x368] sm:$0xff] }
 0x187   :  { %v656_v30 = vpop.f32.mrf.mxu0  ;;  %v698_v39 = vadd.f32 %v697_v25, %v281_v29  ;;  %v951_v9 = vld [vmem:[#allocation9 + $0x748] sm:$0xff] }
 0x188   :  { %v699_v31 = vpop.f32.mrf.mxu1  ;;  %v657_v34 = vadd.f32 %v656_v30, %v277_v26  ;;  %v706_v51 = vmax.f32 %v655_v38, 0.0  ;;  %v867_v30 = vld [vmem:[#allocation9 + $0x4a8] sm:$0xff] }
 0x189   :  { %v658_v32 = vpop.f32.mrf.mxu0  ;;  %v700_v35 = vadd.f32 %v699_v31, %v285_v27  ;;  %v708_v52 = vmax.f32 %v698_v39, 0.0  ;;  %v859_v38 = vld [vmem:[#allocation9 + $0x468] sm:$0xff] }
 0x18a   :  { %v701_v33 = vpop.f32.mrf.mxu1  ;;  %v659_v36 = vadd.f32 %v658_v32, %v273_v28  ;;  %v707_v46 = vmax.f32 %v657_v34, 0.0  ;;  %v739_v28 = vld [vmem:[#allocation9 + $0xa8] sm:$0xff]  ;;  %v8995_v32 = vcombine.low %v871_v16, %v875_v17 }
 0x18b   :  { %v702_v37 = vadd.f32 %v701_v33, %v281_v29  ;;  %v660_v40 = vpop.f32.mrf.mxu0  ;;  %v709_v47 = vmax.f32 %v700_v35, 0.0  ;;  %v863_v29 = vld [vmem:[#allocation9 + $0x488] sm:$0xff] }
 0x18c   :  { %v703_v41 = vpop.f32.mrf.mxu1  ;;  %v661_v42 = vadd.f32 %v660_v40, %v277_v26  ;;  %v710_v44 = vmax.f32 %v659_v36, 0.0  ;;  %v8996_v26 = vcombine.high %v871_v16, %v875_v17  ;;  %v8988_v34 = vcombine.high %v863_v29, %v867_v30  ;;  %v727_v35 = vld [vmem:[#allocation9 + $0x48] sm:$0xff] }
 0x18d   :  { %v704_v43 = vadd.f32 %v703_v41, %v285_v27  ;;  %v712_v45 = vmax.f32 %v702_v37, 0.0  ;;  %v735_v27 = vld [vmem:[#allocation9 + $0x88] sm:$0xff]  ;;  %v8987_v40 = vcombine.low %v863_v29, %v867_v30 }
 0x18e   :  { %v711_v48 = vmax.f32 %v661_v42, 0.0  ;;  %v10894_v58 = vpack.c.bf16 %v710_v44, %v706_v51  ;;  %v8860_v33 = vcombine.high %v735_v27, %v739_v28  ;;  %v731_v36 = vld [vmem:[#allocation9 + $0x68] sm:$0xff]  ;;  %v8859_v39 = vcombine.low %v735_v27, %v739_v28 }
 0x18f   :  { %v713_v49 = vmax.f32 %v704_v43, 0.0  ;;  %v10896_v59 = vpack.c.bf16 %v712_v45, %v708_v52  ;;  %v855_v37 = vld [vmem:[#allocation9 + $0x448] sm:$0xff]  ;;  %v8852_v41 = vcombine.high %v727_v35, %v731_v36 }
 0x190   :  { %v10890_v56 = vpack.c.bf16 %v711_v48, %v707_v46  ;;  %v8980_v42 = vcombine.high %v855_v37, %v859_v38  ;;  %v719_v43 = vld [vmem:[#allocation9 + $0x8] sm:$0xff]  ;;  %v8979_v48 = vcombine.low %v855_v37, %v859_v38 }
 0x191   :  { %v10892_v57 = vpack.c.bf16 %v713_v49, %v709_v47  ;;  %v723_v44 = vld [vmem:[#allocation9 + $0x28] sm:$0xff]  ;;  %v8851_v47 = vcombine.low %v727_v35, %v731_v36 }
 0x192   :  { %2328 = vmatprep.mubr.bf16.mxu0 %v10890_v56  ;;  %v847_v45 = vld [vmem:[#allocation9 + $0x408] sm:$0xff]  ;;  %v8844_v49 = vcombine.high %v719_v43, %v723_v44  ;;  %v8843_v55 = vcombine.low %v719_v43, %v723_v44 }
 0x193   :  { %2371 = vmatprep.mubr.bf16.mxu1 %v10892_v57  ;;  %2329 = vmatmul.mubr.bf16.vlgmr.msra.gmra.mxu0 %v10894_v58  ;;  %v851_v46 = vld [vmem:[#allocation9 + $0x428] sm:$0xff] }
 0x194   :  { %2372 = vmatmul.mubr.bf16.vlgmr.msra.gmra.mxu1 %v10896_v59  ;;  %2383 = vmatpush1.bf16.msra.mxu0 %v8899_v14  ;;  %v743_v14 = vld [vmem:[#allocation9 + $0xc8] sm:$0xff]  ;;  %v8972_v50 = vcombine.high %v847_v45, %v851_v46  ;;  %v8971_v60 = vcombine.low %v847_v45, %v851_v46 }
 0x195   :  { %2426 = vmatpush1.bf16.msra.mxu1 %v9027_v15  ;;  %2414 = vmatprep.mubr.bf16.mxu0 %v10890_v56  ;;  %v747_v15 = vld [vmem:[#allocation9 + $0xe8] sm:$0xff] }
 0x196   :  { %2457 = vmatprep.mubr.bf16.mxu1 %v10892_v57  ;;  %2384 = vmatprep.subr.bf16.mxu0 %v8892_v61  ;;  %v8868_v25 = vcombine.high %v743_v14, %v747_v15  ;;  %v8867_v31 = vcombine.low %v743_v14, %v747_v15  ;;  %v839_v51 = vld [vmem:[#allocation9 + $0x3c8] sm:$0xff] }
 0x197   :  { %2427 = vmatprep.subr.bf16.mxu1 %v9020_v62  ;;  %v843_v52 = vld [vmem:[#allocation9 + $0x3e8] sm:$0xff]  ;;  %v9092_v62 = vcombine.high %v967_v53, %v971_v54 }
 0x198   :  { %2385 = vmatpush1.bf16.msra.mxu0 %v8891_v2  ;;  %v8964_v61 = vcombine.high %v839_v51, %v843_v52  ;;  %v963_v2 = vld [vmem:[#allocation9 + $0x7a8] sm:$0xff] }
 0x199   :  { %2428 = vmatpush1.bf16.msra.mxu1 %v9019_v3  ;;  %2386 = vmatprep.subr.bf16.mxu0 %v8884_v4  ;;  %v8963_v3 = vcombine.low %v839_v51, %v843_v52  ;;  %v9091_v4 = vcombine.low %v967_v53, %v971_v54  ;;  %v9084_v6 = vcombine.high %v959_v1, %v963_v2  ;;  %v815_v15 = vld [vmem:[#allocation9 + $0x308] sm:$0xff] }
 0x19a   :  { %2429 = vmatprep.subr.bf16.mxu1 %v9012_v5  ;;  %v8956_v5 = vcombine.high %v831_v63, %v835_v0  ;;  %v819_v16 = vld [vmem:[#allocation9 + $0x328] sm:$0xff] }
 0x19b   :  { %v943_v17 = vld [vmem:[#allocation9 + $0x708] sm:$0xff] }
 0x19c   :  { %2387 = vmatpush1.bf16.msra.mxu0 %v8883_v10  ;;  %v955_v10 = vld [vmem:[#allocation9 + $0x768] sm:$0xff] }
 0x19d   :  { %2430 = vmatpush1.bf16.msra.mxu1 %v9011_v11  ;;  %2388 = vmatprep.subr.bf16.mxu0 %v8876_v12  ;;  %v8955_v11 = vcombine.low %v831_v63, %v835_v0  ;;  %v9083_v12 = vcombine.low %v959_v1, %v963_v2  ;;  %v9076_v14 = vcombine.high %v951_v9, %v955_v10  ;;  %v807_v28 = vld [vmem:[#allocation9 + $0x2c8] sm:$0xff]  ;;  %v776_v0 = vld [vmem:[#allocation9 + $0x1d0] sm:$0xff] }
 0x19e   :  { %2431 = vmatprep.subr.bf16.mxu1 %v9004_v13  ;;  %v8948_v13 = vcombine.high %v823_v7, %v827_v8  ;;  %v811_v29 = vld [vmem:[#allocation9 + $0x2e8] sm:$0xff]  ;;  %v780_v1 = vld [vmem:[#allocation9 + $0x1f0] sm:$0xff] }
 0x19f   :  { %v935_v30 = vld [vmem:[#allocation9 + $0x6c8] sm:$0xff]  ;;  %v904_v2 = vld [vmem:[#allocation9 + $0x5d0] sm:$0xff] }
 0x1a0   :  { %2389 = vmatpush1.bf16.msra.mxu0 %v8875_v23  ;;  %v947_v23 = vld [vmem:[#allocation9 + $0x728] sm:$0xff] }
 0x1a1   :  { %2432 = vmatpush1.bf16.msra.mxu1 %v9003_v24  ;;  %2390 = vmatprep.subr.bf16.mxu0 %v8868_v25  ;;  %v8947_v24 = vcombine.low %v823_v7, %v827_v8  ;;  %v9075_v25 = vcombine.low %v951_v9, %v955_v10  ;;  %v9068_v27 = vcombine.high %v943_v17, %v947_v23  ;;  %v799_v36 = vld [vmem:[#allocation9 + $0x288] sm:$0xff]  ;;  %v768_v8 = vld [vmem:[#allocation9 + $0x190] sm:$0xff] }
 0x1a2   :  { %2433 = vmatprep.subr.bf16.mxu1 %v8996_v26  ;;  %v8940_v26 = vcombine.high %v815_v15, %v819_v16  ;;  %v803_v37 = vld [vmem:[#allocation9 + $0x2a8] sm:$0xff]  ;;  %v772_v9 = vld [vmem:[#allocation9 + $0x1b0] sm:$0xff] }
 0x1a3   :  { %v927_v38 = vld [vmem:[#allocation9 + $0x688] sm:$0xff]  ;;  %v896_v10 = vld [vmem:[#allocation9 + $0x590] sm:$0xff] }
 0x1a4   :  { %2391 = vmatpush1.bf16.msra.mxu0 %v8867_v31  ;;  %v939_v31 = vld [vmem:[#allocation9 + $0x6e8] sm:$0xff] }
 0x1a5   :  { %2434 = vmatpush1.bf16.msra.mxu1 %v8995_v32  ;;  %2392 = vmatprep.subr.bf16.mxu0 %v8860_v33  ;;  %v8939_v32 = vcombine.low %v815_v15, %v819_v16  ;;  %v9067_v33 = vcombine.low %v943_v17, %v947_v23  ;;  %v9060_v35 = vcombine.high %v935_v30, %v939_v31  ;;  %v791_v44 = vld [vmem:[#allocation9 + $0x248] sm:$0xff]  ;;  %v760_v16 = vld [vmem:[#allocation9 + $0x150] sm:$0xff] }
 0x1a6   :  { %2435 = vmatprep.subr.bf16.mxu1 %v8988_v34  ;;  %v8932_v34 = vcombine.high %v807_v28, %v811_v29  ;;  %v795_v45 = vld [vmem:[#allocation9 + $0x268] sm:$0xff]  ;;  %v764_v17 = vld [vmem:[#allocation9 + $0x170] sm:$0xff] }
 0x1a7   :  { %v919_v46 = vld [vmem:[#allocation9 + $0x648] sm:$0xff]  ;;  %v888_v23 = vld [vmem:[#allocation9 + $0x550] sm:$0xff] }
 0x1a8   :  { %2393 = vmatpush1.bf16.msra.mxu0 %v8859_v39  ;;  %v931_v39 = vld [vmem:[#allocation9 + $0x6a8] sm:$0xff] }
 0x1a9   :  { %2436 = vmatpush1.bf16.msra.mxu1 %v8987_v40  ;;  %2394 = vmatprep.subr.bf16.mxu0 %v8852_v41  ;;  %v8931_v40 = vcombine.low %v807_v28, %v811_v29  ;;  %v9059_v41 = vcombine.low %v935_v30, %v939_v31  ;;  %v9052_v43 = vcombine.high %v927_v38, %v931_v39  ;;  %v783_v52 = vld [vmem:[#allocation9 + $0x208] sm:$0xff]  ;;  %v752_v29 = vld [vmem:[#allocation9 + $0x110] sm:$0xff] }
 0x1aa   :  { %2437 = vmatprep.subr.bf16.mxu1 %v8980_v42  ;;  %v8924_v42 = vcombine.high %v799_v36, %v803_v37  ;;  %v787_v53 = vld [vmem:[#allocation9 + $0x228] sm:$0xff]  ;;  %v756_v30 = vld [vmem:[#allocation9 + $0x130] sm:$0xff] }
 0x1ab   :  { %v911_v54 = vld [vmem:[#allocation9 + $0x608] sm:$0xff]  ;;  %v880_v31 = vld [vmem:[#allocation9 + $0x510] sm:$0xff] }
 0x1ac   :  { %2395 = vmatpush1.bf16.msra.mxu0 %v8851_v47  ;;  %v923_v47 = vld [vmem:[#allocation9 + $0x668] sm:$0xff] }
 0x1ad   :  { %2438 = vmatpush1.bf16.msra.mxu1 %v8979_v48  ;;  %2396 = vmatprep.subr.bf16.mxu0 %v8844_v49  ;;  %v8923_v48 = vcombine.low %v799_v36, %v803_v37  ;;  %v9051_v49 = vcombine.low %v927_v38, %v931_v39  ;;  %v9044_v51 = vcombine.high %v919_v46, %v923_v47  ;;  %v744_v37 = vld [vmem:[#allocation9 + $0xd0] sm:$0xff] }
 0x1ae   :  { %2439 = vmatprep.subr.bf16.mxu1 %v8972_v50  ;;  %v8916_v50 = vcombine.high %v791_v44, %v795_v45  ;;  %v748_v38 = vld [vmem:[#allocation9 + $0xf0] sm:$0xff] }
 0x1af   :  { %v872_v39 = vld [vmem:[#allocation9 + $0x4d0] sm:$0xff] }
 0x1b0   :  { %2397 = vmatpush1.bf16.msra.mxu0 %v8843_v55  ;;  %v915_v55 = vld [vmem:[#allocation9 + $0x628] sm:$0xff] }
 0x1b1   :  { %2440 = vmatpush1.bf16.msra.mxu1 %v8971_v60  ;;  %2398 = vmatprep.subr.bf16.mxu0 %v8964_v61  ;;  %v8915_v60 = vcombine.low %v791_v44, %v795_v45  ;;  %v9043_v61 = vcombine.low %v919_v46, %v923_v47  ;;  %v9036_v63 = vcombine.high %v911_v54, %v915_v55  ;;  %v736_v45 = vld [vmem:[#allocation9 + $0x90] sm:$0xff] }
 0x1b2   :  { %2441 = vmatprep.subr.bf16.mxu1 %v9092_v62  ;;  %v8908_v62 = vcombine.high %v783_v52, %v787_v53  ;;  %v740_v46 = vld [vmem:[#allocation9 + $0xb0] sm:$0xff] }
 0x1b3   :  { %v864_v47 = vld [vmem:[#allocation9 + $0x490] sm:$0xff] }
 0x1b4   :  { %2399 = vmatpush2.bf16.msra.mxu0 %v8963_v3  ;;  %v908_v3 = vld [vmem:[#allocation9 + $0x5f0] sm:$0xff] }
 0x1b5   :  { %2442 = vmatpush2.bf16.msra.mxu1 %v9091_v4  ;;  %2400 = vmatprep.subr.bf16.mxu0 %v8956_v5  ;;  %v8907_v4 = vcombine.low %v783_v52, %v787_v53  ;;  %v9035_v5 = vcombine.low %v911_v54, %v915_v55  ;;  %v9030_v7 = vcombine.high %v904_v2, %v908_v3  ;;  %v728_v53 = vld [vmem:[#allocation9 + $0x50] sm:$0xff] }
 0x1b6   :  { %2443 = vmatprep.subr.bf16.mxu1 %v9084_v6  ;;  %v8902_v6 = vcombine.high %v776_v0, %v780_v1  ;;  %v732_v54 = vld [vmem:[#allocation9 + $0x70] sm:$0xff] }
 0x1b7   :  { %v856_v55 = vld [vmem:[#allocation9 + $0x450] sm:$0xff] }
 0x1b8   :  { %2401 = vmatpush2.bf16.msra.mxu0 %v8955_v11  ;;  %v900_v11 = vld [vmem:[#allocation9 + $0x5b0] sm:$0xff] }
 0x1b9   :  { %2444 = vmatpush2.bf16.msra.mxu1 %v9083_v12  ;;  %2402 = vmatprep.subr.bf16.mxu0 %v8948_v13  ;;  %v8901_v12 = vcombine.low %v776_v0, %v780_v1  ;;  %v9029_v13 = vcombine.low %v904_v2, %v908_v3  ;;  %v9022_v15 = vcombine.high %v896_v10, %v900_v11  ;;  %v720_v1 = vld [vmem:[#allocation9 + $0x10] sm:$0xff] }
 0x1ba   :  { %2445 = vmatprep.subr.bf16.mxu1 %v9076_v14  ;;  %v8894_v14 = vcombine.high %v768_v8, %v772_v9  ;;  %v724_v2 = vld [vmem:[#allocation9 + $0x30] sm:$0xff] }
 0x1bb   :  { %v848_v3 = vld [vmem:[#allocation9 + $0x410] sm:$0xff] }
 0x1bc   :  { %2403 = vmatpush2.bf16.msra.mxu0 %v8947_v24  ;;  %v892_v24 = vld [vmem:[#allocation9 + $0x570] sm:$0xff] }
 0x1bd   :  { %2446 = vmatpush2.bf16.msra.mxu1 %v9075_v25  ;;  %2404 = vmatprep.subr.bf16.mxu0 %v8940_v26  ;;  %v8893_v25 = vcombine.low %v768_v8, %v772_v9  ;;  %v9021_v26 = vcombine.low %v896_v10, %v900_v11  ;;  %v9014_v28 = vcombine.high %v888_v23, %v892_v24  ;;  %v840_v9 = vld [vmem:[#allocation9 + $0x3d0] sm:$0xff] }
 0x1be   :  { %2447 = vmatprep.subr.bf16.mxu1 %v9068_v27  ;;  %v8886_v27 = vcombine.high %v760_v16, %v764_v17  ;;  %v844_v10 = vld [vmem:[#allocation9 + $0x3f0] sm:$0xff] }
 0x1bf   :  { %v968_v11 = vld [vmem:[#allocation9 + $0x7d0] sm:$0xff] }
 0x1c0   :  { %2405 = vmatpush2.bf16.msra.mxu0 %v8939_v32  ;;  %v884_v32 = vld [vmem:[#allocation9 + $0x530] sm:$0xff] }
 0x1c1   :  { %2448 = vmatpush2.bf16.msra.mxu1 %v9067_v33  ;;  %2406 = vmatprep.subr.bf16.mxu0 %v8932_v34  ;;  %v8885_v33 = vcombine.low %v760_v16, %v764_v17  ;;  %v9013_v34 = vcombine.low %v888_v23, %v892_v24  ;;  %v9006_v36 = vcombine.high %v880_v31, %v884_v32  ;;  %v832_v17 = vld [vmem:[#allocation9 + $0x390] sm:$0xff] }
 0x1c2   :  { %2449 = vmatprep.subr.bf16.mxu1 %v9060_v35  ;;  %v8878_v35 = vcombine.high %v752_v29, %v756_v30  ;;  %v836_v23 = vld [vmem:[#allocation9 + $0x3b0] sm:$0xff] }
 0x1c3   :  { %v960_v24 = vld [vmem:[#allocation9 + $0x790] sm:$0xff] }
 0x1c4   :  { %2407 = vmatpush2.bf16.msra.mxu0 %v8931_v40  ;;  %v876_v40 = vld [vmem:[#allocation9 + $0x4f0] sm:$0xff] }
 0x1c5   :  { %2450 = vmatpush2.bf16.msra.mxu1 %v9059_v41  ;;  %2408 = vmatprep.subr.bf16.mxu0 %v8924_v42  ;;  %v8877_v41 = vcombine.low %v752_v29, %v756_v30  ;;  %v9005_v42 = vcombine.low %v880_v31, %v884_v32  ;;  %v8998_v44 = vcombine.high %v872_v39, %v876_v40  ;;  %v824_v30 = vld [vmem:[#allocation9 + $0x350] sm:$0xff] }
 0x1c6   :  { %2451 = vmatprep.subr.bf16.mxu1 %v9052_v43  ;;  %v8870_v43 = vcombine.high %v744_v37, %v748_v38  ;;  %v828_v31 = vld [vmem:[#allocation9 + $0x370] sm:$0xff] }
 0x1c7   :  { %v952_v32 = vld [vmem:[#allocation9 + $0x750] sm:$0xff] }
 0x1c8   :  { %2409 = vmatpush2.bf16.msra.mxu0 %v8923_v48  ;;  %v868_v48 = vld [vmem:[#allocation9 + $0x4b0] sm:$0xff] }
 0x1c9   :  { %2452 = vmatpush2.bf16.msra.mxu1 %v9051_v49  ;;  %2410 = vmatprep.subr.bf16.mxu0 %v8916_v50  ;;  %v8869_v49 = vcombine.low %v744_v37, %v748_v38  ;;  %v8997_v50 = vcombine.low %v872_v39, %v876_v40  ;;  %v8990_v52 = vcombine.high %v864_v47, %v868_v48  ;;  %v816_v38 = vld [vmem:[#allocation9 + $0x310] sm:$0xff] }
 0x1ca   :  { %2453 = vmatprep.subr.bf16.mxu1 %v9044_v51  ;;  %v8862_v51 = vcombine.high %v736_v45, %v740_v46  ;;  %v820_v39 = vld [vmem:[#allocation9 + $0x330] sm:$0xff] }
 0x1cb   :  { %v944_v40 = vld [vmem:[#allocation9 + $0x710] sm:$0xff] }
 0x1cc   :  { %2411 = vmatpush2.bf16.msra.mxu0 %v8915_v60  ;;  %v860_v60 = vld [vmem:[#allocation9 + $0x470] sm:$0xff] }
 0x1cd   :  { %2454 = vmatpush2.bf16.msra.mxu1 %v9043_v61  ;;  %2412 = vmatprep.subr.bf16.mxu0 %v8908_v62  ;;  %v8861_v61 = vcombine.low %v736_v45, %v740_v46  ;;  %v8989_v62 = vcombine.low %v864_v47, %v868_v48  ;;  %v8982_v0 = vcombine.high %v856_v55, %v860_v60  ;;  %v808_v46 = vld [vmem:[#allocation9 + $0x2d0] sm:$0xff] }
 0x1ce   :  { %2455 = vmatprep.subr.bf16.mxu1 %v9036_v63  ;;  %v8854_v63 = vcombine.high %v728_v53, %v732_v54  ;;  %v812_v47 = vld [vmem:[#allocation9 + $0x2f0] sm:$0xff] }
 0x1cf   :  { %v936_v48 = vld [vmem:[#allocation9 + $0x6d0] sm:$0xff] }
 0x1d0   :  { %2413 = vmatpush2.bf16.msra.mxu0 %v8907_v4  ;;  %v852_v4 = vld [vmem:[#allocation9 + $0x430] sm:$0xff] }
 0x1d1   :  { %2456 = vmatpush2.bf16.msra.mxu1 %v9035_v5  ;;  %2468 = vmatprep.subr.bf16.mxu0 %v8902_v6  ;;  %v8853_v5 = vcombine.low %v728_v53, %v732_v54  ;;  %v8981_v6 = vcombine.low %v856_v55, %v860_v60  ;;  %v8974_v8 = vcombine.high %v848_v3, %v852_v4  ;;  %v800_v54 = vld [vmem:[#allocation9 + $0x290] sm:$0xff] }
 0x1d2   :  { %2511 = vmatprep.subr.bf16.mxu1 %v9030_v7  ;;  %v8846_v7 = vcombine.high %v720_v1, %v724_v2  ;;  %v804_v55 = vld [vmem:[#allocation9 + $0x2b0] sm:$0xff] }
 0x1d3   :  { %2415 = vmatmul.mubr.bf16.vlgmr.msra.gmra.mxu0 %v10894_v58  ;;  %v928_v60 = vld [vmem:[#allocation9 + $0x690] sm:$0xff] }
 0x1d4   :  { %2458 = vmatmul.mubr.bf16.vlgmr.msra.gmra.mxu1 %v10896_v59  ;;  %2469 = vmatpush1.bf16.msra.mxu0 %v8901_v12  ;;  %v972_v12 = vld [vmem:[#allocation9 + $0x7f0] sm:$0xff] }
 0x1d5   :  { %2500 = vmatprep.mubr.bf16.mxu0 %v10890_v56  ;;  %2512 = vmatpush1.bf16.msra.mxu1 %v9029_v13  ;;  %v8845_v13 = vcombine.low %v720_v1, %v724_v2  ;;  %v9094_v16 = vcombine.high %v968_v11, %v972_v12  ;;  %v792_v2 = vld [vmem:[#allocation9 + $0x250] sm:$0xff] }
 0x1d6   :  { %2543 = vmatprep.mubr.bf16.mxu1 %v10892_v57  ;;  %2470 = vmatprep.subr.bf16.mxu0 %v8894_v14  ;;  %v8973_v14 = vcombine.low %v848_v3, %v852_v4  ;;  %v796_v3 = vld [vmem:[#allocation9 + $0x270] sm:$0xff] }
 0x1d7   :  { %2513 = vmatprep.subr.bf16.mxu1 %v9022_v15  ;;  %v8966_v15 = vcombine.high %v840_v9, %v844_v10  ;;  %v920_v4 = vld [vmem:[#allocation9 + $0x650] sm:$0xff] }
 0x1d8   :  { %2471 = vmatpush1.bf16.msra.mxu0 %v8893_v25  ;;  %v964_v25 = vld [vmem:[#allocation9 + $0x7b0] sm:$0xff] }
 0x1d9   :  { %2514 = vmatpush1.bf16.msra.mxu1 %v9021_v26  ;;  %2472 = vmatprep.subr.bf16.mxu0 %v8886_v27  ;;  %v8965_v26 = vcombine.low %v840_v9, %v844_v10  ;;  %v9093_v27 = vcombine.low %v968_v11, %v972_v12  ;;  %v9086_v29 = vcombine.high %v960_v24, %v964_v25  ;;  %v784_v10 = vld [vmem:[#allocation9 + $0x210] sm:$0xff] }
 0x1da   :  { %2515 = vmatprep.subr.bf16.mxu1 %v9014_v28  ;;  %v8958_v28 = vcombine.high %v832_v17, %v836_v23  ;;  %v788_v11 = vld [vmem:[#allocation9 + $0x230] sm:$0xff] }
 0x1db   :  { %v912_v12 = vld [vmem:[#allocation9 + $0x610] sm:$0xff] }
 0x1dc   :  { %2473 = vmatpush1.bf16.msra.mxu0 %v8885_v33  ;;  %v956_v33 = vld [vmem:[#allocation9 + $0x770] sm:$0xff] }
 0x1dd   :  { %2516 = vmatpush1.bf16.msra.mxu1 %v9013_v34  ;;  %2474 = vmatprep.subr.bf16.mxu0 %v8878_v35  ;;  %v8957_v34 = vcombine.low %v832_v17, %v836_v23  ;;  %v9085_v35 = vcombine.low %v960_v24, %v964_v25  ;;  %v9078_v37 = vcombine.high %v952_v32, %v956_v33  ;;  %v777_v23 = vld [vmem:[#allocation9 + $0x1d8] sm:$0xff] }
 0x1de   :  { %2517 = vmatprep.subr.bf16.mxu1 %v9006_v36  ;;  %v8950_v36 = vcombine.high %v824_v30, %v828_v31  ;;  %v781_v24 = vld [vmem:[#allocation9 + $0x1f8] sm:$0xff] }
 0x1df   :  { %v905_v25 = vld [vmem:[#allocation9 + $0x5d8] sm:$0xff] }
 0x1e0   :  { %2475 = vmatpush1.bf16.msra.mxu0 %v8877_v41  ;;  %v948_v41 = vld [vmem:[#allocation9 + $0x730] sm:$0xff] }
 0x1e1   :  { %2518 = vmatpush1.bf16.msra.mxu1 %v9005_v42  ;;  %2476 = vmatprep.subr.bf16.mxu0 %v8870_v43  ;;  %v8949_v42 = vcombine.low %v824_v30, %v828_v31  ;;  %v9077_v43 = vcombine.low %v952_v32, %v956_v33  ;;  %v9070_v45 = vcombine.high %v944_v40, %v948_v41  ;;  %v769_v31 = vld [vmem:[#allocation9 + $0x198] sm:$0xff] }
 0x1e2   :  { %2519 = vmatprep.subr.bf16.mxu1 %v8998_v44  ;;  %v8942_v44 = vcombine.high %v816_v38, %v820_v39  ;;  %v773_v32 = vld [vmem:[#allocation9 + $0x1b8] sm:$0xff]  ;;  %v8903_v33 = vcombine.low %v777_v23, %v781_v24 }
 0x1e4   :  { %2477 = vmatpush1.bf16.msra.mxu0 %v8869_v49  ;;  %v940_v49 = vld [vmem:[#allocation9 + $0x6f0] sm:$0xff] }
 0x1e5   :  { %2520 = vmatpush1.bf16.msra.mxu1 %v8997_v50  ;;  %2478 = vmatprep.subr.bf16.mxu0 %v8862_v51  ;;  %v8941_v50 = vcombine.low %v816_v38, %v820_v39  ;;  %v9069_v51 = vcombine.low %v944_v40, %v948_v41  ;;  %v9062_v53 = vcombine.high %v936_v48, %v940_v49  ;;  %v761_v38 = vld [vmem:[#allocation9 + $0x158] sm:$0xff] }
 0x1e6   :  { %2521 = vmatprep.subr.bf16.mxu1 %v8990_v52  ;;  %v8934_v52 = vcombine.high %v808_v46, %v812_v47  ;;  %v765_v39 = vld [vmem:[#allocation9 + $0x178] sm:$0xff] }
 0x1e7   :  { %v889_v41 = vld [vmem:[#allocation9 + $0x558] sm:$0xff] }
 0x1e8   :  { %2479 = vmatpush1.bf16.msra.mxu0 %v8861_v61  ;;  %v932_v61 = vld [vmem:[#allocation9 + $0x6b0] sm:$0xff] }
 0x1e9   :  { %2522 = vmatpush1.bf16.msra.mxu1 %v8989_v62  ;;  %2480 = vmatprep.subr.bf16.mxu0 %v8854_v63  ;;  %v8933_v62 = vcombine.low %v808_v46, %v812_v47  ;;  %v9061_v63 = vcombine.low %v936_v48, %v940_v49  ;;  %v9054_v1 = vcombine.high %v928_v60, %v932_v61  ;;  %v753_v47 = vld [vmem:[#allocation9 + $0x118] sm:$0xff] }
 0x1ea   :  { %2523 = vmatprep.subr.bf16.mxu1 %v8982_v0  ;;  %v8926_v0 = vcombine.high %v800_v54, %v804_v55  ;;  %v757_v48 = vld [vmem:[#allocation9 + $0x138] sm:$0xff] }
 0x1eb   :  { %v881_v49 = vld [vmem:[#allocation9 + $0x518] sm:$0xff] }
 0x1ec   :  { %2481 = vmatpush1.bf16.msra.mxu0 %v8853_v5  ;;  %v924_v5 = vld [vmem:[#allocation9 + $0x670] sm:$0xff] }
 0x1ed   :  { %2524 = vmatpush1.bf16.msra.mxu1 %v8981_v6  ;;  %2482 = vmatprep.subr.bf16.mxu0 %v8846_v7  ;;  %v8925_v6 = vcombine.low %v800_v54, %v804_v55  ;;  %v9053_v7 = vcombine.low %v928_v60, %v932_v61  ;;  %v9046_v9 = vcombine.high %v920_v4, %v924_v5  ;;  %v745_v54 = vld [vmem:[#allocation9 + $0xd8] sm:$0xff] }
 0x1ee   :  { %2525 = vmatprep.subr.bf16.mxu1 %v8974_v8  ;;  %v8918_v8 = vcombine.high %v792_v2, %v796_v3  ;;  %v749_v55 = vld [vmem:[#allocation9 + $0xf8] sm:$0xff] }
 0x1ef   :  { %v873_v60 = vld [vmem:[#allocation9 + $0x4d8] sm:$0xff] }
 0x1f0   :  { %2483 = vmatpush1.bf16.msra.mxu0 %v8845_v13  ;;  %v916_v13 = vld [vmem:[#allocation9 + $0x630] sm:$0xff]  ;;  %v877_v61 = vld [vmem:[#allocation9 + $0x4f8] sm:$0xff] }
 0x1f1   :  { %2526 = vmatpush1.bf16.msra.mxu1 %v8973_v14  ;;  %2484 = vmatprep.subr.bf16.mxu0 %v8966_v15  ;;  %v8917_v14 = vcombine.low %v792_v2, %v796_v3  ;;  %v9045_v15 = vcombine.low %v920_v4, %v924_v5  ;;  %v9038_v17 = vcombine.high %v912_v12, %v916_v13  ;;  %v741_v2 = vld [vmem:[#allocation9 + $0xb8] sm:$0xff] }
 0x1f2   :  { %2527 = vmatprep.subr.bf16.mxu1 %v9094_v16  ;;  %v8910_v16 = vcombine.high %v784_v10, %v788_v11  ;;  %v865_v3 = vld [vmem:[#allocation9 + $0x498] sm:$0xff]  ;;  %v8871_v5 = vcombine.low %v745_v54, %v749_v55 }
 0x1f3   :  { %v869_v4 = vld [vmem:[#allocation9 + $0x4b8] sm:$0xff] }
 0x1f4   :  { %2485 = vmatpush2.bf16.msra.mxu0 %v8965_v26  ;;  %v909_v26 = vld [vmem:[#allocation9 + $0x5f8] sm:$0xff] }
 0x1f5   :  { %2528 = vmatpush2.bf16.msra.mxu1 %v9093_v27  ;;  %2486 = vmatprep.subr.bf16.mxu0 %v8958_v28  ;;  %v8909_v27 = vcombine.low %v784_v10, %v788_v11  ;;  %v9037_v28 = vcombine.low %v912_v12, %v916_v13  ;;  %v9032_v30 = vcombine.high %v905_v25, %v909_v26  ;;  %v733_v10 = vld [vmem:[#allocation9 + $0x78] sm:$0xff] }
 0x1f6   :  { %2529 = vmatprep.subr.bf16.mxu1 %v9086_v29  ;;  %v8904_v29 = vcombine.high %v777_v23, %v781_v24  ;;  %v857_v11 = vld [vmem:[#allocation9 + $0x458] sm:$0xff] }
 0x1f7   :  { %v861_v12 = vld [vmem:[#allocation9 + $0x478] sm:$0xff] }
 0x1f8   :  { %2487 = vmatpush2.bf16.msra.mxu0 %v8957_v34  ;;  %v897_v34 = vld [vmem:[#allocation9 + $0x598] sm:$0xff] }
 0x1f9   :  { %2530 = vmatpush2.bf16.msra.mxu1 %v9085_v35  ;;  %2488 = vmatprep.subr.bf16.mxu0 %v8950_v36  ;;  %v901_v35 = vld [vmem:[#allocation9 + $0x5b8] sm:$0xff]  ;;  %v9031_v36 = vcombine.low %v905_v25, %v909_v26 }
 0x1fa   :  { %2531 = vmatprep.subr.bf16.mxu1 %v9078_v37  ;;  %v8896_v37 = vcombine.high %v769_v31, %v773_v32  ;;  %v9024_v40 = vcombine.high %v897_v34, %v901_v35  ;;  %v725_v23 = vld [vmem:[#allocation9 + $0x38] sm:$0xff] }
 0x1fb   :  { %v849_v24 = vld [vmem:[#allocation9 + $0x418] sm:$0xff] }
 0x1fc   :  { %2489 = vmatpush2.bf16.msra.mxu0 %v8949_v42  ;;  %v893_v42 = vld [vmem:[#allocation9 + $0x578] sm:$0xff] }
 0x1fd   :  { %2532 = vmatpush2.bf16.msra.mxu1 %v9077_v43  ;;  %2490 = vmatprep.subr.bf16.mxu0 %v8942_v44  ;;  %v8895_v43 = vcombine.low %v769_v31, %v773_v32  ;;  %v9023_v44 = vcombine.low %v897_v34, %v901_v35  ;;  %v9016_v46 = vcombine.high %v889_v41, %v893_v42  ;;  %v853_v25 = vld [vmem:[#allocation9 + $0x438] sm:$0xff] }
 0x1fe   :  { %2533 = vmatprep.subr.bf16.mxu1 %v9070_v45  ;;  %v8888_v45 = vcombine.high %v761_v38, %v765_v39  ;;  %v845_v31 = vld [vmem:[#allocation9 + $0x3f8] sm:$0xff]  ;;  %v8975_v35 = vcombine.low %v849_v24, %v853_v25 }
 0x1ff   :  { %v969_v32 = vld [vmem:[#allocation9 + $0x7d8] sm:$0xff] }
 0x200   :  { %2491 = vmatpush2.bf16.msra.mxu0 %v8941_v50  ;;  %v885_v50 = vld [vmem:[#allocation9 + $0x538] sm:$0xff] }
 0x201   :  { %2534 = vmatpush2.bf16.msra.mxu1 %v9069_v51  ;;  %2492 = vmatprep.subr.bf16.mxu0 %v8934_v52  ;;  %v8887_v51 = vcombine.low %v761_v38, %v765_v39  ;;  %v9015_v52 = vcombine.low %v889_v41, %v893_v42  ;;  %v833_v38 = vld [vmem:[#allocation9 + $0x398] sm:$0xff] }
 0x202   :  { %2535 = vmatprep.subr.bf16.mxu1 %v9062_v53  ;;  %v8880_v53 = vcombine.high %v753_v47, %v757_v48  ;;  %v837_v39 = vld [vmem:[#allocation9 + $0x3b8] sm:$0xff] }
 0x203   :  { %v965_v41 = vld [vmem:[#allocation9 + $0x7b8] sm:$0xff] }
 0x204   :  { %2493 = vmatpush2.bf16.msra.mxu0 %v8933_v62  ;;  %v9007_v62 = vcombine.low %v881_v49, %v885_v50 }
 0x205   :  { %2536 = vmatpush2.bf16.msra.mxu1 %v9061_v63  ;;  %2494 = vmatprep.subr.bf16.mxu0 %v8926_v0  ;;  %v8872_v63 = vcombine.high %v745_v54, %v749_v55  ;;  %v9000_v0 = vcombine.high %v873_v60, %v877_v61  ;;  %v821_v54 = vld [vmem:[#allocation9 + $0x338] sm:$0xff] }
 0x206   :  { %2537 = vmatprep.subr.bf16.mxu1 %v9054_v1  ;;  %v737_v1 = vld [vmem:[#allocation9 + $0x98] sm:$0xff] }
 0x207   :  { %v8863_v13 = vcombine.low %v737_v1, %v741_v2  ;;  %v945_v55 = vld [vmem:[#allocation9 + $0x718] sm:$0xff] }
 0x208   :  { %2495 = vmatpush2.bf16.msra.mxu0 %v8925_v6  ;;  %v8999_v6 = vcombine.low %v873_v60, %v877_v61  ;;  %v949_v60 = vld [vmem:[#allocation9 + $0x738] sm:$0xff] }
 0x209   :  { %2538 = vmatpush2.bf16.msra.mxu1 %v9053_v7  ;;  %2496 = vmatprep.subr.bf16.mxu0 %v8918_v8  ;;  %v8864_v7 = vcombine.high %v737_v1, %v741_v2  ;;  %v8992_v8 = vcombine.high %v865_v3, %v869_v4  ;;  %v813_v1 = vld [vmem:[#allocation9 + $0x2f8] sm:$0xff] }
 0x20a   :  { %2539 = vmatprep.subr.bf16.mxu1 %v9046_v9  ;;  %v729_v9 = vld [vmem:[#allocation9 + $0x58] sm:$0xff] }
 0x20b   :  { %v8855_v26 = vcombine.low %v729_v9, %v733_v10  ;;  %v937_v2 = vld [vmem:[#allocation9 + $0x6d8] sm:$0xff] }
 0x20c   :  { %2497 = vmatpush2.bf16.msra.mxu0 %v8917_v14  ;;  %v8991_v14 = vcombine.low %v865_v3, %v869_v4  ;;  %v941_v3 = vld [vmem:[#allocation9 + $0x6f8] sm:$0xff] }
 0x20d   :  { %2540 = vmatpush2.bf16.msra.mxu1 %v9045_v15  ;;  %2498 = vmatprep.subr.bf16.mxu0 %v8910_v16  ;;  %v8856_v15 = vcombine.high %v729_v9, %v733_v10  ;;  %v8984_v16 = vcombine.high %v857_v11, %v861_v12  ;;  %v805_v9 = vld [vmem:[#allocation9 + $0x2b8] sm:$0xff] }
 0x20e   :  { %2541 = vmatprep.subr.bf16.mxu1 %v9038_v17  ;;  %v721_v17 = vld [vmem:[#allocation9 + $0x18] sm:$0xff] }
 0x20f   :  { %v8847_v34 = vcombine.low %v721_v17, %v725_v23  ;;  %v929_v10 = vld [vmem:[#allocation9 + $0x698] sm:$0xff] }
 0x210   :  { %2499 = vmatpush2.bf16.msra.mxu0 %v8909_v27  ;;  %v8983_v27 = vcombine.low %v857_v11, %v861_v12  ;;  %v933_v11 = vld [vmem:[#allocation9 + $0x6b8] sm:$0xff] }
 0x211   :  { %2542 = vmatpush2.bf16.msra.mxu1 %v9037_v28  ;;  %2554 = vmatprep.subr.bf16.mxu0 %v8904_v29  ;;  %v8848_v28 = vcombine.high %v721_v17, %v725_v23  ;;  %v8976_v29 = vcombine.high %v849_v24, %v853_v25  ;;  %v797_v17 = vld [vmem:[#allocation9 + $0x278] sm:$0xff] }
 0x212   :  { %2597 = vmatprep.subr.bf16.mxu1 %v9032_v30  ;;  %v841_v30 = vld [vmem:[#allocation9 + $0x3d8] sm:$0xff] }
 0x213   :  { %2501 = vmatmul.mubr.bf16.vlgmr.msra.gmra.mxu0 %v10894_v58  ;;  %v8967_v42 = vcombine.low %v841_v30, %v845_v31  ;;  %v921_v23 = vld [vmem:[#allocation9 + $0x658] sm:$0xff] }
 0x214   :  { %2544 = vmatmul.mubr.bf16.vlgmr.msra.gmra.mxu1 %v10896_v59  ;;  %2555 = vmatpush1.bf16.msra.mxu0 %v8903_v33  ;;  %v973_v33 = vld [vmem:[#allocation9 + $0x7f8] sm:$0xff] }
 0x215   :  { %2586 = vmatprep.mubr.bf16.mxu0 %v10890_v56  ;;  %2598 = vmatpush1.bf16.msra.mxu1 %v9031_v36  ;;  %v9008_v56 = vcombine.high %v881_v49, %v885_v50  ;;  %v8968_v36 = vcombine.high %v841_v30, %v845_v31  ;;  %v957_v49 = vld [vmem:[#allocation9 + $0x778] sm:$0xff]  ;;  %v8959_v50 = vcombine.low %v833_v38, %v837_v39 }
 0x216   :  { %2629 = vmatprep.mubr.bf16.mxu1 %v10892_v57  ;;  %2556 = vmatprep.subr.bf16.mxu0 %v8896_v37  ;;  %v8879_v57 = vcombine.low %v753_v47, %v757_v48  ;;  %v9096_v37 = vcombine.high %v969_v32, %v973_v33  ;;  %v829_v47 = vld [vmem:[#allocation9 + $0x378] sm:$0xff] }
 0x217   :  { %2599 = vmatprep.subr.bf16.mxu1 %v9024_v40  ;;  %v961_v40 = vld [vmem:[#allocation9 + $0x798] sm:$0xff] }
 0x218   :  { %2557 = vmatpush1.bf16.msra.mxu0 %v8895_v43  ;;  %v9095_v43 = vcombine.low %v969_v32, %v973_v33  ;;  %v953_v48 = vld [vmem:[#allocation9 + $0x758] sm:$0xff] }
 0x219   :  { %2600 = vmatpush1.bf16.msra.mxu1 %v9023_v44  ;;  %2558 = vmatprep.subr.bf16.mxu0 %v8888_v45  ;;  %v8960_v44 = vcombine.high %v833_v38, %v837_v39  ;;  %v9088_v45 = vcombine.high %v961_v40, %v965_v41  ;;  %v925_v24 = vld [vmem:[#allocation9 + $0x678] sm:$0xff]  ;;  %v2724_v38 = vld [vmem:[#allocation12 + $0x1e0] sm:$0xff] }
 0x21a   :  { %2601 = vmatprep.subr.bf16.mxu1 %v9016_v46  ;;  %v825_v46 = vld [vmem:[#allocation9 + $0x358] sm:$0xff]  ;;  %v2848_v39 = vld [vmem:[#allocation12 + $0x5c0] sm:$0xff] }
 0x21b   :  { %v8951_v61 = vcombine.low %v825_v46, %v829_v47  ;;  %v789_v30 = vld [vmem:[#allocation9 + $0x238] sm:$0xff] }
 0x21c   :  { %2559 = vmatpush1.bf16.msra.mxu0 %v8887_v51  ;;  %v9087_v51 = vcombine.low %v961_v40, %v965_v41  ;;  %v913_v31 = vld [vmem:[#allocation9 + $0x618] sm:$0xff]  ;;  %v2852_v40 = vld [vmem:[#allocation12 + $0x5e0] sm:$0xff] }
 0x21d   :  { %2602 = vmatpush1.bf16.msra.mxu1 %v9015_v52  ;;  %2560 = vmatprep.subr.bf16.mxu0 %v8880_v53  ;;  %v8952_v52 = vcombine.high %v825_v46, %v829_v47  ;;  %v9080_v53 = vcombine.high %v953_v48, %v957_v49  ;;  %v917_v32 = vld [vmem:[#allocation9 + $0x638] sm:$0xff]  ;;  %v9282_v46 = vcombine.high %v2848_v39, %v2852_v40  ;;  %v2840_v47 = vld [vmem:[#allocation12 + $0x580] sm:$0xff] }
 0x21e   :  { %2603 = vmatprep.subr.bf16.mxu1 %v9008_v56  ;;  %v817_v56 = vld [vmem:[#allocation9 + $0x318] sm:$0xff] }
 0x21f   :  { %v8943_v4 = vcombine.low %v817_v56, %v821_v54 }
 0x220   :  { %2561 = vmatpush1.bf16.msra.mxu0 %v8879_v57  ;;  %v9079_v57 = vcombine.low %v953_v48, %v957_v49  ;;  %v2844_v48 = vld [vmem:[#allocation12 + $0x5a0] sm:$0xff] }
 0x221   :  { %2604 = vmatpush1.bf16.msra.mxu1 %v9007_v62  ;;  %2562 = vmatprep.subr.bf16.mxu0 %v8872_v63  ;;  %v8944_v62 = vcombine.high %v817_v56, %v821_v54  ;;  %v9072_v63 = vcombine.high %v945_v55, %v949_v60  ;;  %v2704_v56 = vld [vmem:[#allocation12 + $0x140] sm:$0xff] }
 0x222   :  { %2605 = vmatprep.subr.bf16.mxu1 %v9000_v0  ;;  %v809_v0 = vld [vmem:[#allocation9 + $0x2d8] sm:$0xff]  ;;  %v2708_v54 = vld [vmem:[#allocation12 + $0x160] sm:$0xff] }
 0x223   :  { %v8935_v12 = vcombine.low %v809_v0, %v813_v1 }
 0x224   :  { %2563 = vmatpush1.bf16.msra.mxu0 %v8871_v5  ;;  %v9071_v5 = vcombine.low %v945_v55, %v949_v60  ;;  %v9274_v55 = vcombine.high %v2840_v47, %v2844_v48 }
 0x225   :  { %2606 = vmatpush1.bf16.msra.mxu1 %v8999_v6  ;;  %2564 = vmatprep.subr.bf16.mxu0 %v8864_v7  ;;  %v8936_v6 = vcombine.high %v809_v0, %v813_v1  ;;  %v9064_v7 = vcombine.high %v937_v2, %v941_v3 }
 0x226   :  { %2607 = vmatprep.subr.bf16.mxu1 %v8992_v8  ;;  %v801_v8 = vld [vmem:[#allocation9 + $0x298] sm:$0xff] }
 0x227   :  { %v8927_v25 = vcombine.low %v801_v8, %v805_v9 }
 0x228   :  { %2565 = vmatpush1.bf16.msra.mxu0 %v8863_v13  ;;  %v9063_v13 = vcombine.low %v937_v2, %v941_v3  ;;  %v9138_v2 = vcombine.high %v2704_v56, %v2708_v54  ;;  %v9273_v3 = vcombine.low %v2840_v47, %v2844_v48 }
 0x229   :  { %2608 = vmatpush1.bf16.msra.mxu1 %v8991_v14  ;;  %2566 = vmatprep.subr.bf16.mxu0 %v8856_v15  ;;  %v8928_v14 = vcombine.high %v801_v8, %v805_v9  ;;  %v9056_v15 = vcombine.high %v929_v10, %v933_v11  ;;  %v2824_v9 = vld [vmem:[#allocation12 + $0x500] sm:$0xff] }
 0x22a   :  { %2609 = vmatprep.subr.bf16.mxu1 %v8984_v16  ;;  %v793_v16 = vld [vmem:[#allocation9 + $0x258] sm:$0xff] }
 0x22b   :  { %v8919_v33 = vcombine.low %v793_v16, %v797_v17 }
 0x22c   :  { %2567 = vmatpush1.bf16.msra.mxu0 %v8855_v26  ;;  %v9055_v26 = vcombine.low %v929_v10, %v933_v11  ;;  %v2828_v10 = vld [vmem:[#allocation12 + $0x520] sm:$0xff] }
 0x22d   :  { %2610 = vmatpush1.bf16.msra.mxu1 %v8983_v27  ;;  %2568 = vmatprep.subr.bf16.mxu0 %v8848_v28  ;;  %v8920_v27 = vcombine.high %v793_v16, %v797_v17  ;;  %v9048_v28 = vcombine.high %v921_v23, %v925_v24  ;;  %v2688_v16 = vld [vmem:[#allocation12 + $0xc0] sm:$0xff] }
 0x22e   :  { %2611 = vmatprep.subr.bf16.mxu1 %v8976_v29  ;;  %v785_v29 = vld [vmem:[#allocation9 + $0x218] sm:$0xff]  ;;  %v2692_v17 = vld [vmem:[#allocation12 + $0xe0] sm:$0xff] }
 0x22f   :  { %v8911_v41 = vcombine.low %v785_v29, %v789_v30 }
 0x230   :  { %2569 = vmatpush1.bf16.msra.mxu0 %v8847_v34  ;;  %v9047_v34 = vcombine.low %v921_v23, %v925_v24  ;;  %v9258_v23 = vcombine.high %v2824_v9, %v2828_v10 }
 0x231   :  { %2612 = vmatpush1.bf16.msra.mxu1 %v8975_v35  ;;  %2570 = vmatprep.subr.bf16.mxu0 %v8968_v36  ;;  %v8912_v35 = vcombine.high %v785_v29, %v789_v30  ;;  %v9040_v36 = vcombine.high %v913_v31, %v917_v32  ;;  %v9122_v29 = vcombine.high %v2688_v16, %v2692_v17 }
 0x232   :  { %2613 = vmatprep.subr.bf16.mxu1 %v9096_v37  ;;  %v2720_v37 = vld [vmem:[#allocation12 + $0x1c0] sm:$0xff]  ;;  %v9257_v30 = vcombine.low %v2824_v9, %v2828_v10 }
 0x233   :  { %v9153_v49 = vcombine.low %v2720_v37, %v2724_v38  ;;  %v2780_v9 = vld [vmem:[#allocation12 + $0x3a0] sm:$0xff] }
 0x234   :  { %2571 = vmatpush2.bf16.msra.mxu0 %v8967_v42  ;;  %v9039_v42 = vcombine.low %v913_v31, %v917_v32 }
 0x235   :  { %2614 = vmatpush2.bf16.msra.mxu1 %v9095_v43  ;;  %2572 = vmatprep.subr.bf16.mxu0 %v8960_v44  ;;  %v9154_v43 = vcombine.high %v2720_v37, %v2724_v38  ;;  %v2712_v44 = vld [vmem:[#allocation12 + $0x180] sm:$0xff] }
 0x236   :  { %2615 = vmatprep.subr.bf16.mxu1 %v9088_v45  ;;  %v2716_v45 = vld [vmem:[#allocation12 + $0x1a0] sm:$0xff] }
 0x237   :  { %v2812_v37 = vld [vmem:[#allocation12 + $0x4a0] sm:$0xff] }
 0x238   :  { %2573 = vmatpush2.bf16.msra.mxu0 %v8959_v50  ;;  %v10912_v50 = vld [vmem:[#allocation11] sm:$0xff] }
 0x239   :  { %2616 = vmatpush2.bf16.msra.mxu1 %v9087_v51  ;;  %2574 = vmatprep.subr.bf16.mxu0 %v8952_v52  ;;  %v9146_v51 = vcombine.high %v2712_v44, %v2716_v45  ;;  %v9281_v52 = vcombine.low %v2848_v39, %v2852_v40  ;;  %v9121_v39 = vcombine.low %v2688_v16, %v2692_v17  ;;  %v2772_v16 = vld [vmem:[#allocation12 + $0x360] sm:$0xff] }
 0x23a   :  { %2617 = vmatprep.subr.bf16.mxu1 %v9080_v53  ;;  %v983_v53 = vrot.slane %v10912_v50, %v10875_v19 }
 0x23c   :  { %2575 = vmatpush2.bf16.msra.mxu0 %v8951_v61 }
 0x23d   :  { %2618 = vmatpush2.bf16.msra.mxu1 %v9079_v57  ;;  %2576 = vmatprep.subr.bf16.mxu0 %v8944_v62  ;;  %v2832_v57 = vld [vmem:[#allocation12 + $0x540] sm:$0xff] }
 0x23e   :  { %2619 = vmatprep.subr.bf16.mxu1 %v9072_v63  ;;  %v2836_v62 = vld [vmem:[#allocation12 + $0x560] sm:$0xff]  ;;  %v9145_v63 = vcombine.low %v2712_v44, %v2716_v45 }
 0x23f   :  { %v2800_v45 = vld [vmem:[#allocation12 + $0x440] sm:$0xff] }
 0x240   :  { %2577 = vmatpush2.bf16.msra.mxu0 %v8943_v4 }
 0x241   :  { %2620 = vmatpush2.bf16.msra.mxu1 %v9071_v5  ;;  %2578 = vmatprep.subr.bf16.mxu0 %v8936_v6  ;;  %v2696_v5 = vld [vmem:[#allocation12 + $0x100] sm:$0xff] }
 0x242   :  { %2621 = vmatprep.subr.bf16.mxu1 %v9064_v7  ;;  %v2700_v6 = vld [vmem:[#allocation12 + $0x120] sm:$0xff] }
 0x244   :  { %2579 = vmatpush2.bf16.msra.mxu0 %v8935_v12  ;;  %v9130_v12 = vcombine.high %v2696_v5, %v2700_v6 }
 0x245   :  { %2622 = vmatpush2.bf16.msra.mxu1 %v9063_v13  ;;  %2580 = vmatprep.subr.bf16.mxu0 %v8928_v14  ;;  %v9265_v13 = vcombine.low %v2832_v57, %v2836_v62 }
 0x246   :  { %2623 = vmatprep.subr.bf16.mxu1 %v9056_v15 }
 0x248   :  { %2581 = vmatpush2.bf16.msra.mxu0 %v8927_v25  ;;  %v2816_v25 = vld [vmem:[#allocation12 + $0x4c0] sm:$0xff] }
 0x249   :  { %2624 = vmatpush2.bf16.msra.mxu1 %v9055_v26  ;;  %2582 = vmatprep.subr.bf16.mxu0 %v8920_v27  ;;  %v2820_v26 = vld [vmem:[#allocation12 + $0x4e0] sm:$0xff] }
 0x24a   :  { %2625 = vmatprep.subr.bf16.mxu1 %v9048_v28  ;;  %v9129_v28 = vcombine.low %v2696_v5, %v2700_v6 }
 0x24c   :  { %2583 = vmatpush2.bf16.msra.mxu0 %v8919_v33  ;;  %v2680_v33 = vld [vmem:[#allocation12 + $0x80] sm:$0xff] }
 0x24d   :  { %2626 = vmatpush2.bf16.msra.mxu1 %v9047_v34  ;;  %2584 = vmatprep.subr.bf16.mxu0 %v8912_v35  ;;  %v2684_v34 = vld [vmem:[#allocation12 + $0xa0] sm:$0xff]  ;;  %v9250_v35 = vcombine.high %v2816_v25, %v2820_v26 }
 0x24e   :  { %2627 = vmatprep.subr.bf16.mxu1 %v9040_v36  ;;  %v2808_v36 = vld [vmem:[#allocation12 + $0x480] sm:$0xff]  ;;  %v9114_v40 = vcombine.high %v2680_v33, %v2684_v34  ;;  %v9113_v47 = vcombine.low %v2680_v33, %v2684_v34 }
 0x24f   :  { %v9242_v44 = vcombine.high %v2808_v36, %v2812_v37 }
 0x250   :  { %2585 = vmatpush2.bf16.msra.mxu0 %v8911_v41  ;;  %v9249_v41 = vcombine.low %v2816_v25, %v2820_v26 }
 0x251   :  { %2628 = vmatpush2.bf16.msra.mxu1 %v9039_v42  ;;  %5778 = vmatprep.subr.bf16.mxu0 %v9154_v43  ;;  %v2672_v42 = vld [vmem:[#allocation12 + $0x40] sm:$0xff] }
 0x252   :  { %5821 = vmatprep.subr.bf16.mxu1 %v9282_v46  ;;  %v2676_v43 = vld [vmem:[#allocation12 + $0x60] sm:$0xff] }
 0x253   :  { %2587 = vmatmul.mubr.bf16.vlgmr.msra.gmra.mxu0 %v10894_v58  ;;  %v10917_v60 = vpop.f32.mrf.mxu0  ;;  %v9266_v58 = vcombine.high %v2832_v57, %v2836_v62  ;;  %v2804_v46 = vld [vmem:[#allocation12 + $0x460] sm:$0xff]  ;;  %v9106_v48 = vcombine.high %v2672_v42, %v2676_v43 }
 0x254   :  { %v10919_v61 = vpop.f32.mrf.mxu1  ;;  %2630 = vmatmul.mubr.bf16.vlgmr.msra.gmra.mxu1 %v10896_v59  ;;  %5779 = vmatpush1.bf16.msra.mxu0 %v9153_v49  ;;  %v9137_v59 = vcombine.low %v2704_v56, %v2708_v54  ;;  %v9241_v49 = vcombine.low %v2808_v36, %v2812_v37  ;;  %v2792_v56 = vld [vmem:[#allocation12 + $0x400] sm:$0xff]  ;;  %v9233_v62 = vcombine.low %v2800_v45, %v2804_v46 }
 0x255   :  { %v2332_v0 = vpop.f32.mrf.mxu0  ;;  %5780 = vmatprep.subr.bf16.mxu0 %v9146_v51  ;;  %5822 = vmatpush1.bf16.msra.mxu1 %v9281_v52  ;;  %v2664_v51 = vld [vmem:[#allocation12] sm:$0xff] }
 0x256   :  { %v2375_v1 = vpop.f32.mrf.mxu1  ;;  %v2333_v4 = vadd.f32 %v2332_v0, %v983_v53  ;;  %5823 = vmatprep.subr.bf16.mxu1 %v9274_v55  ;;  %v2668_v52 = vld [vmem:[#allocation12 + $0x20] sm:$0xff]  ;;  %v9105_v55 = vcombine.low %v2672_v42, %v2676_v43 }
 0x257   :  { %v10922_v7 = vpop.f32.mrf.mxu0  ;;  %v2796_v54 = vld [vmem:[#allocation12 + $0x420] sm:$0xff]  ;;  %v9098_v57 = vcombine.high %v2664_v51, %v2668_v52 }
 0x258   :  { %v10924_v8 = vpop.f32.mrf.mxu1  ;;  %5781 = vmatpush1.bf16.msra.mxu0 %v9145_v63  ;;  %v2376_v14 = vadd.f32 %v2375_v1, %v2333_v4  ;;  %v2784_v63 = vld [vmem:[#allocation12 + $0x3c0] sm:$0xff]  ;;  %v9226_v1 = vcombine.high %v2792_v56, %v2796_v54  ;;  %v9097_v4 = vcombine.low %v2664_v51, %v2668_v52  ;;  %v9225_v6 = vcombine.low %v2792_v56, %v2796_v54 }
 0x259   :  { %v2336_v11 = vpop.f32.mrf.mxu0  ;;  %5782 = vmatprep.subr.bf16.mxu0 %v9138_v2  ;;  %5824 = vmatpush1.bf16.msra.mxu1 %v9273_v3  ;;  %v2788_v0 = vld [vmem:[#allocation12 + $0x3e0] sm:$0xff] }
 0x25a   :  { %v2337_v15 = vadd.f32 %v2336_v11, %v983_v53  ;;  %5825 = vmatprep.subr.bf16.mxu1 %v9266_v58  ;;  %v2379_v24 = vpop.f32.mrf.mxu1  ;;  %v2641_v31 = vmax.f32 %v2376_v14, 0.0  ;;  %v9234_v53 = vcombine.high %v2800_v45, %v2804_v46  ;;  %v2912_v2 = vld [vmem:[#allocation12 + $0x7c0] sm:$0xff]  ;;  %v9218_v5 = vcombine.high %v2784_v63, %v2788_v0 }
 0x25b   :  { %v2916_v3 = vld [vmem:[#allocation12 + $0x7e0] sm:$0xff] }
 0x25c   :  { %v2380_v27 = vadd.f32 %v2379_v24, %v2337_v15  ;;  %5783 = vmatpush1.bf16.msra.mxu0 %v9137_v59  ;;  %v2776_v58 = vld [vmem:[#allocation12 + $0x380] sm:$0xff]  ;;  %v9346_v10 = vcombine.high %v2912_v2, %v2916_v3  ;;  %v9345_v14 = vcombine.low %v2912_v2, %v2916_v3 }
 0x25d   :  { %5784 = vmatprep.subr.bf16.mxu0 %v9130_v12  ;;  %5826 = vmatpush1.bf16.msra.mxu1 %v9265_v13  ;;  %v2904_v59 = vld [vmem:[#allocation12 + $0x780] sm:$0xff]  ;;  %v9217_v12 = vcombine.low %v2784_v63, %v2788_v0  ;;  %v9210_v13 = vcombine.high %v2776_v58, %v2780_v9  ;;  %v9209_v25 = vcombine.low %v2776_v58, %v2780_v9 }
 0x25e   :  { %v2649_v32 = vmax.f32 %v2380_v27, 0.0  ;;  %5827 = vmatprep.subr.bf16.mxu1 %v9258_v23  ;;  %v2908_v11 = vld [vmem:[#allocation12 + $0x7a0] sm:$0xff] }
 0x25f   :  { %v2768_v15 = vld [vmem:[#allocation12 + $0x340] sm:$0xff]  ;;  %v9338_v17 = vcombine.high %v2904_v59, %v2908_v11  ;;  %v9337_v27 = vcombine.low %v2904_v59, %v2908_v11 }
 0x260   :  { %v10926_v38 = vpack.c.bf16 %v2649_v32, %v2641_v31  ;;  %5785 = vmatpush1.bf16.msra.mxu0 %v9129_v28  ;;  %v2896_v23 = vld [vmem:[#allocation12 + $0x740] sm:$0xff]  ;;  %v9202_v26 = vcombine.high %v2768_v15, %v2772_v16  ;;  %v9201_v33 = vcombine.low %v2768_v15, %v2772_v16 }
 0x261   :  { %5786 = vmatprep.subr.bf16.mxu0 %v9122_v29  ;;  %5828 = vmatpush1.bf16.msra.mxu1 %v9257_v30  ;;  %v2900_v24 = vld [vmem:[#allocation12 + $0x760] sm:$0xff] }
 0x262   :  { %5810 = vmatprep.mubr.bf16.mxu0 %v10926_v38  ;;  %5829 = vmatprep.subr.bf16.mxu1 %v9250_v35  ;;  %v2760_v28 = vld [vmem:[#allocation12 + $0x300] sm:$0xff]  ;;  %v9330_v30 = vcombine.high %v2896_v23, %v2900_v24  ;;  %v9329_v35 = vcombine.low %v2896_v23, %v2900_v24 }
 0x263   :  { %v2764_v29 = vld [vmem:[#allocation12 + $0x320] sm:$0xff] }
 0x264   :  { %5787 = vmatpush1.bf16.msra.mxu0 %v9121_v39  ;;  %v2888_v31 = vld [vmem:[#allocation12 + $0x700] sm:$0xff]  ;;  %v9194_v34 = vcombine.high %v2760_v28, %v2764_v29  ;;  %v9193_v42 = vcombine.low %v2760_v28, %v2764_v29 }
 0x265   :  { %5788 = vmatprep.subr.bf16.mxu0 %v9114_v40  ;;  %5830 = vmatpush1.bf16.msra.mxu1 %v9249_v41  ;;  %v2892_v32 = vld [vmem:[#allocation12 + $0x720] sm:$0xff] }
 0x266   :  { %5831 = vmatprep.subr.bf16.mxu1 %v9242_v44  ;;  %v2752_v36 = vld [vmem:[#allocation12 + $0x2c0] sm:$0xff]  ;;  %v9322_v39 = vcombine.high %v2888_v31, %v2892_v32  ;;  %v9321_v44 = vcombine.low %v2888_v31, %v2892_v32  ;;  %v991_v32 = vrot.slane %v10912_v50, %v10878_v20 }
 0x267   :  { %v2756_v37 = vld [vmem:[#allocation12 + $0x2e0] sm:$0xff] }
 0x268   :  { %5789 = vmatpush1.bf16.msra.mxu0 %v9113_v47  ;;  %v2880_v40 = vld [vmem:[#allocation12 + $0x6c0] sm:$0xff]  ;;  %v9186_v43 = vcombine.high %v2752_v36, %v2756_v37  ;;  %v9185_v51 = vcombine.low %v2752_v36, %v2756_v37 }
 0x269   :  { %5790 = vmatprep.subr.bf16.mxu0 %v9106_v48  ;;  %5832 = vmatpush1.bf16.msra.mxu1 %v9241_v49  ;;  %v2884_v41 = vld [vmem:[#allocation12 + $0x6e0] sm:$0xff] }
 0x26a   :  { %5833 = vmatprep.subr.bf16.mxu1 %v9234_v53  ;;  %v2744_v45 = vld [vmem:[#allocation12 + $0x280] sm:$0xff]  ;;  %v9314_v47 = vcombine.high %v2880_v40, %v2884_v41  ;;  %v9313_v53 = vcombine.low %v2880_v40, %v2884_v41 }
 0x26b   :  { %v2748_v46 = vld [vmem:[#allocation12 + $0x2a0] sm:$0xff] }
 0x26c   :  { %5791 = vmatpush1.bf16.msra.mxu0 %v9105_v55  ;;  %v2872_v48 = vld [vmem:[#allocation12 + $0x680] sm:$0xff]  ;;  %v9178_v52 = vcombine.high %v2744_v45, %v2748_v46  ;;  %v9177_v0 = vcombine.low %v2744_v45, %v2748_v46 }
 0x26d   :  { %5792 = vmatprep.subr.bf16.mxu0 %v9098_v57  ;;  %5834 = vmatpush1.bf16.msra.mxu1 %v9233_v62  ;;  %v2876_v49 = vld [vmem:[#allocation12 + $0x6a0] sm:$0xff]  ;;  %v979_v57 = vrot.slane %v10912_v50, %v10881_v21 }
 0x26e   :  { %5835 = vmatprep.subr.bf16.mxu1 %v9226_v1  ;;  %v2736_v56 = vld [vmem:[#allocation12 + $0x240] sm:$0xff]  ;;  %v9306_v55 = vcombine.high %v2872_v48, %v2876_v49  ;;  %v9305_v3 = vcombine.low %v2872_v48, %v2876_v49 }
 0x26f   :  { %v2740_v54 = vld [vmem:[#allocation12 + $0x260] sm:$0xff]  ;;  %v2335_v1 = vadd.f32 %v10922_v7, %v979_v57  ;;  %v2331_v58 = vadd.f32 %v10917_v60, %v979_v57 }
 0x270   :  { %5793 = vmatpush1.bf16.msra.mxu0 %v9097_v4  ;;  %v2864_v62 = vld [vmem:[#allocation12 + $0x640] sm:$0xff]  ;;  %v9170_v2 = vcombine.high %v2736_v56, %v2740_v54  ;;  %v9169_v59 = vcombine.low %v2736_v56, %v2740_v54 }
 0x271   :  { %5794 = vmatprep.subr.bf16.mxu0 %v9218_v5  ;;  %5836 = vmatpush1.bf16.msra.mxu1 %v9225_v6  ;;  %v2868_v63 = vld [vmem:[#allocation12 + $0x660] sm:$0xff]  ;;  %v2378_v11 = vadd.f32 %v10924_v8, %v2335_v1  ;;  %v2374_v16 = vadd.f32 %v10919_v61, %v2331_v58 }
 0x272   :  { %5837 = vmatprep.subr.bf16.mxu1 %v9346_v10  ;;  %v2728_v4 = vld [vmem:[#allocation12 + $0x200] sm:$0xff]  ;;  %v9298_v6 = vcombine.high %v2864_v62, %v2868_v63  ;;  %v9297_v7 = vcombine.low %v2864_v62, %v2868_v63 }
 0x273   :  { %v2732_v5 = vld [vmem:[#allocation12 + $0x220] sm:$0xff]  ;;  %v2648_v24 = vmax.f32 %v2378_v11, 0.0  ;;  %v2640_v29 = vmax.f32 %v2374_v16, 0.0 }
 0x274   :  { %5795 = vmatpush2.bf16.msra.mxu0 %v9217_v12  ;;  %v2856_v9 = vld [vmem:[#allocation12 + $0x600] sm:$0xff]  ;;  %v9162_v12 = vcombine.high %v2728_v4, %v2732_v5  ;;  %v9161_v60 = vcombine.low %v2728_v4, %v2732_v5 }
 0x275   :  { %5796 = vmatprep.subr.bf16.mxu0 %v9210_v13  ;;  %5838 = vmatpush2.bf16.msra.mxu1 %v9345_v14  ;;  %v2860_v10 = vld [vmem:[#allocation12 + $0x620] sm:$0xff] }
 0x276   :  { %5839 = vmatprep.subr.bf16.mxu1 %v9338_v17  ;;  %v9290_v13 = vcombine.high %v2856_v9, %v2860_v10  ;;  %v2976_v14 = vld [vmem:[#allocation12 + $0x9c0] sm:$0xff]  ;;  %v9289_v8 = vcombine.low %v2856_v9, %v2860_v10 }
 0x277   :  { %v2980_v15 = vld [vmem:[#allocation12 + $0x9e0] sm:$0xff] }
 0x278   :  { %5797 = vmatpush2.bf16.msra.mxu0 %v9209_v25  ;;  %v10935_v17 = vld [vmem:[#allocation12 + $0xdc0] sm:$0xff]  ;;  %v9410_v25 = vcombine.high %v2976_v14, %v2980_v15  ;;  %v9409_v61 = vcombine.low %v2976_v14, %v2980_v15 }
 0x279   :  { %5798 = vmatprep.subr.bf16.mxu0 %v9202_v26  ;;  %5840 = vmatpush2.bf16.msra.mxu1 %v9337_v27  ;;  %v10937_v23 = vld [vmem:[#allocation12 + $0xde0] sm:$0xff] }
 0x27a   :  { %5841 = vmatprep.subr.bf16.mxu1 %v9330_v30  ;;  %v2968_v26 = vld [vmem:[#allocation12 + $0x980] sm:$0xff]  ;;  %v9538_v28 = vcombine.high %v10935_v17, %v10937_v23  ;;  %v10941_v30 = vpack.c.bf16 %v2648_v24, %v2640_v29  ;;  %v10954_v24 = vld [vmem:[#allocation12 + $0x5c8] sm:$0xff] }
 0x27b   :  { %v2972_v27 = vld [vmem:[#allocation12 + $0x9a0] sm:$0xff] }
 0x27c   :  { %5799 = vmatpush2.bf16.msra.mxu0 %v9201_v33  ;;  %v9402_v31 = vcombine.high %v2968_v26, %v2972_v27  ;;  %v2960_v33 = vld [vmem:[#allocation12 + $0x940] sm:$0xff] }
 0x27d   :  { %5800 = vmatprep.subr.bf16.mxu0 %v9194_v34  ;;  %5842 = vmatpush2.bf16.msra.mxu1 %v9329_v35  ;;  %v2964_v34 = vld [vmem:[#allocation12 + $0x960] sm:$0xff]  ;;  %v987_v35 = vrot.slane %v10912_v50, %v10884_v22 }
 0x27e   :  { %5843 = vmatprep.subr.bf16.mxu1 %v9322_v39  ;;  %v9401_v39 = vcombine.low %v2968_v26, %v2972_v27  ;;  %v2956_v45 = vld [vmem:[#allocation12 + $0x920] sm:$0xff] }
 0x27f   :  { %v2944_v57 = vld [vmem:[#allocation12 + $0x8c0] sm:$0xff] }
 0x280   :  { %5801 = vmatpush2.bf16.msra.mxu0 %v9193_v42  ;;  %v9394_v42 = vcombine.high %v2960_v33, %v2964_v34  ;;  %v2948_v62 = vld [vmem:[#allocation12 + $0x8e0] sm:$0xff] }
 0x281   :  { %5802 = vmatprep.subr.bf16.mxu0 %v9186_v43  ;;  %5844 = vmatpush2.bf16.msra.mxu1 %v9321_v44  ;;  %v2952_v44 = vld [vmem:[#allocation12 + $0x900] sm:$0xff]  ;;  %v9378_v4 = vcombine.high %v2944_v57, %v2948_v62 }
 0x282   :  { %5845 = vmatprep.subr.bf16.mxu1 %v9314_v47  ;;  %v2936_v5 = vld [vmem:[#allocation12 + $0x880] sm:$0xff] }
 0x283   :  { %v2940_v9 = vld [vmem:[#allocation12 + $0x8a0] sm:$0xff] }
 0x284   :  { %5803 = vmatpush2.bf16.msra.mxu0 %v9185_v51  ;;  %v9393_v51 = vcombine.low %v2960_v33, %v2964_v34  ;;  %v3096_v10 = vld [vmem:[#allocation12 + $0xd80] sm:$0xff]  ;;  %v9370_v15 = vcombine.high %v2936_v5, %v2940_v9 }
 0x285   :  { %5804 = vmatprep.subr.bf16.mxu0 %v9178_v52  ;;  %5846 = vmatpush2.bf16.msra.mxu1 %v9313_v53  ;;  %v9386_v53 = vcombine.high %v2952_v44, %v2956_v45  ;;  %v2928_v16 = vld [vmem:[#allocation12 + $0x840] sm:$0xff] }
 0x286   :  { %5847 = vmatprep.subr.bf16.mxu1 %v9306_v55  ;;  %v3088_v26 = vld [vmem:[#allocation12 + $0xd40] sm:$0xff] }
 0x287   :  { %v3092_v27 = vld [vmem:[#allocation12 + $0xd60] sm:$0xff] }
 0x288   :  { %5805 = vmatpush2.bf16.msra.mxu0 %v9177_v0  ;;  %v3080_v33 = vld [vmem:[#allocation12 + $0xd00] sm:$0xff] }
 0x289   :  { %5806 = vmatprep.subr.bf16.mxu0 %v9170_v2  ;;  %5848 = vmatpush2.bf16.msra.mxu1 %v9305_v3  ;;  %v9385_v2 = vcombine.low %v2952_v44, %v2956_v45  ;;  %v3084_v34 = vld [vmem:[#allocation12 + $0xd20] sm:$0xff] }
 0x28a   :  { %5849 = vmatprep.subr.bf16.mxu1 %v9298_v6  ;;  %v9513_v45 = vcombine.low %v3080_v33, %v3084_v34 }
 0x28c   :  { %5807 = vmatpush2.bf16.msra.mxu0 %v9169_v59  ;;  %v3100_v59 = vld [vmem:[#allocation12 + $0xda0] sm:$0xff] }
 0x28d   :  { %5808 = vmatprep.subr.bf16.mxu0 %v9162_v12  ;;  %5850 = vmatpush2.bf16.msra.mxu1 %v9297_v7  ;;  %v9377_v7 = vcombine.low %v2944_v57, %v2948_v62  ;;  %v3028_v62 = vld [vmem:[#allocation12 + $0xb60] sm:$0xff] }
 0x28e   :  { %5851 = vmatprep.subr.bf16.mxu1 %v9290_v13  ;;  %v9537_v13 = vcombine.low %v10935_v17, %v10937_v23  ;;  %v9369_v23 = vcombine.low %v2936_v5, %v2940_v9  ;;  %v3052_v9 = vld [vmem:[#allocation12 + $0xc20] sm:$0xff] }
 0x290   :  { %5809 = vmatpush2.bf16.msra.mxu0 %v9161_v60  ;;  %v9530_v60 = vcombine.high %v3096_v10, %v3100_v59 }
 0x291   :  { %5852 = vmatpush2.bf16.msra.mxu1 %v9289_v8  ;;  %5864 = vmatprep.subr.bf16.mxu0 %v9410_v25  ;;  %v10956_v8 = vld [vmem:[#allocation12 + $0x5e8] sm:$0xff]  ;;  %v2932_v25 = vld [vmem:[#allocation12 + $0x860] sm:$0xff] }
 0x292   :  { %5907 = vmatprep.subr.bf16.mxu1 %v9538_v28  ;;  %v9283_v17 = vcombine.low %v10954_v24, %v10956_v8  ;;  %v9529_v28 = vcombine.low %v3096_v10, %v3100_v59  ;;  %v9362_v29 = vcombine.high %v2928_v16, %v2932_v25 }
 0x293   :  { %v2416_v36 = vpop.f32.mrf.mxu0  ;;  %5811 = vmatmul.mubr.bf16.vlgmr.msra.gmra.mxu0 %v10941_v30 }
 0x294   :  { %v2459_v37 = vpop.f32.mrf.mxu1  ;;  %5865 = vmatpush1.bf16.msra.mxu0 %v9409_v61  ;;  %v2417_v46 = vadd.f32 %v2416_v36, %v987_v35  ;;  %v2920_v61 = vld [vmem:[#allocation12 + $0x800] sm:$0xff]  ;;  %v9521_v36 = vcombine.low %v3088_v26, %v3092_v27 }
 0x295   :  { %v2418_v40 = vpop.f32.mrf.mxu0  ;;  %5866 = vmatprep.subr.bf16.mxu0 %v9402_v31  ;;  %v9522_v31 = vcombine.high %v3088_v26, %v3092_v27 }
 0x296   :  { %v2461_v41 = vpop.f32.mrf.mxu1  ;;  %v2419_v43 = vadd.f32 %v2418_v40, %v991_v32  ;;  %v2460_v63 = vadd.f32 %v2459_v37, %v2417_v46  ;;  %v9514_v40 = vcombine.high %v3080_v33, %v3084_v34 }
 0x297   :  { %v2420_v47 = vpop.f32.mrf.mxu0 }
 0x298   :  { %v2463_v48 = vpop.f32.mrf.mxu1  ;;  %v2421_v49 = vadd.f32 %v2420_v47, %v987_v35  ;;  %5867 = vmatpush1.bf16.msra.mxu0 %v9401_v39  ;;  %v2462_v56 = vadd.f32 %v2461_v41, %v2419_v43  ;;  %v2642_v11 = vmax.f32 %v2460_v63, 0.0  ;;  %v9361_v35 = vcombine.low %v2928_v16, %v2932_v25  ;;  %v3040_v39 = vld [vmem:[#allocation12 + $0xbc0] sm:$0xff] }
 0x299   :  { %v2422_v52 = vpop.f32.mrf.mxu0  ;;  %5868 = vmatprep.subr.bf16.mxu0 %v9394_v42  ;;  %v3044_v41 = vld [vmem:[#allocation12 + $0xbe0] sm:$0xff] }
 0x29a   :  { %v2464_v54 = vadd.f32 %v2463_v48, %v2421_v49  ;;  %v2423_v55 = vadd.f32 %v2422_v52, %v991_v32  ;;  %v2465_v0 = vpop.f32.mrf.mxu1  ;;  %v2643_v6 = vmax.f32 %v2462_v56, 0.0  ;;  %v2924_v32 = vld [vmem:[#allocation12 + $0x820] sm:$0xff]  ;;  %v9474_v46 = vcombine.high %v3040_v39, %v3044_v41 }
 0x29b   :  { %v9354_v37 = vcombine.high %v2920_v61, %v2924_v32  ;;  %v3072_v42 = vld [vmem:[#allocation12 + $0xcc0] sm:$0xff]  ;;  %v9353_v44 = vcombine.low %v2920_v61, %v2924_v32 }
 0x29c   :  { %v2466_v1 = vadd.f32 %v2465_v0, %v2423_v55  ;;  %5869 = vmatpush1.bf16.msra.mxu0 %v9393_v51  ;;  %v2650_v3 = vmax.f32 %v2464_v54, 0.0  ;;  %v3076_v43 = vld [vmem:[#allocation12 + $0xce0] sm:$0xff] }
 0x29d   :  { %5870 = vmatprep.subr.bf16.mxu0 %v9386_v53  ;;  %v3032_v47 = vld [vmem:[#allocation12 + $0xb80] sm:$0xff]  ;;  %v9506_v48 = vcombine.high %v3072_v42, %v3076_v43  ;;  %v9473_v53 = vcombine.low %v3040_v39, %v3044_v41  ;;  %v9505_v56 = vcombine.low %v3072_v42, %v3076_v43 }
 0x29e   :  { %v2651_v58 = vmax.f32 %v2466_v1, 0.0  ;;  %v10952_v14 = vpack.c.bf16 %v2650_v3, %v2642_v11  ;;  %v3036_v49 = vld [vmem:[#allocation12 + $0xba0] sm:$0xff] }
 0x29f   :  { %v3064_v51 = vld [vmem:[#allocation12 + $0xc80] sm:$0xff]  ;;  %v9466_v54 = vcombine.high %v3032_v47, %v3036_v49  ;;  %v9465_v1 = vcombine.low %v3032_v47, %v3036_v49 }
 0x2a0   :  { %v10948_v12 = vpack.c.bf16 %v2651_v58, %v2643_v6  ;;  %5871 = vmatpush1.bf16.msra.mxu0 %v9385_v2  ;;  %v3068_v52 = vld [vmem:[#allocation12 + $0xca0] sm:$0xff] }
 0x2a1   :  { %5872 = vmatprep.subr.bf16.mxu0 %v9378_v4  ;;  %v3024_v55 = vld [vmem:[#allocation12 + $0xb40] sm:$0xff]  ;;  %v9498_v57 = vcombine.high %v3064_v51, %v3068_v52  ;;  %v9497_v2 = vcombine.low %v3064_v51, %v3068_v52 }
 0x2a2   :  { %5853 = vmatprep.mubr.bf16.mxu1 %v10948_v12  ;;  %v3056_v63 = vld [vmem:[#allocation12 + $0xc40] sm:$0xff]  ;;  %v9458_v3 = vcombine.high %v3024_v55, %v3028_v62  ;;  %v9457_v10 = vcombine.low %v3024_v55, %v3028_v62 }
 0x2a3   :  { %5854 = vmatmul.mubr.bf16.vlgmr.msra.gmra.mxu1 %v10952_v14  ;;  %v3060_v0 = vld [vmem:[#allocation12 + $0xc60] sm:$0xff] }
 0x2a4   :  { %5873 = vmatpush1.bf16.msra.mxu0 %v9377_v7  ;;  %5908 = vmatpush1.bf16.msra.mxu1 %v9537_v13  ;;  %v3016_v4 = vld [vmem:[#allocation12 + $0xb00] sm:$0xff]  ;;  %v9490_v5 = vcombine.high %v3056_v63, %v3060_v0  ;;  %v9489_v59 = vcombine.low %v3056_v63, %v3060_v0 }
 0x2a5   :  { %5874 = vmatprep.subr.bf16.mxu0 %v9370_v15  ;;  %5909 = vmatprep.subr.bf16.mxu1 %v9530_v60  ;;  %v3020_v6 = vld [vmem:[#allocation12 + $0xb20] sm:$0xff] }
 0x2a6   :  { %v3048_v58 = vld [vmem:[#allocation12 + $0xc00] sm:$0xff]  ;;  %v9450_v11 = vcombine.high %v3016_v4, %v3020_v6  ;;  %v9449_v25 = vcombine.low %v3016_v4, %v3020_v6 }
 0x2a7   :  { %v3008_v7 = vld [vmem:[#allocation12 + $0xac0] sm:$0xff]  ;;  %v9482_v13 = vcombine.high %v3048_v58, %v3052_v9  ;;  %v9481_v26 = vcombine.low %v3048_v58, %v3052_v9 }
 0x2a8   :  { %5875 = vmatpush1.bf16.msra.mxu0 %v9369_v23  ;;  %5910 = vmatpush1.bf16.msra.mxu1 %v9529_v28  ;;  %v3012_v15 = vld [vmem:[#allocation12 + $0xae0] sm:$0xff] }
 0x2a9   :  { %5876 = vmatprep.subr.bf16.mxu0 %v9362_v29  ;;  %5911 = vmatprep.subr.bf16.mxu1 %v9522_v31  ;;  %v3168_v16 = vld [vmem:[#allocation12 + $0xfc0] sm:$0xff]  ;;  %v9442_v27 = vcombine.high %v3008_v7, %v3012_v15  ;;  %v9441_v32 = vcombine.low %v3008_v7, %v3012_v15 }
 0x2aa   :  { %v3172_v60 = vld [vmem:[#allocation12 + $0xfe0] sm:$0xff] }
 0x2ab   :  { %v3000_v23 = vld [vmem:[#allocation12 + $0xa80] sm:$0xff]  ;;  %v9602_v28 = vcombine.high %v3168_v16, %v3172_v60  ;;  %v9601_v33 = vcombine.low %v3168_v16, %v3172_v60 }
 0x2ac   :  { %5877 = vmatpush1.bf16.msra.mxu0 %v9361_v35  ;;  %5912 = vmatpush1.bf16.msra.mxu1 %v9521_v36  ;;  %v3004_v29 = vld [vmem:[#allocation12 + $0xaa0] sm:$0xff] }
 0x2ad   :  { %5878 = vmatprep.subr.bf16.mxu0 %v9354_v37  ;;  %5913 = vmatprep.subr.bf16.mxu1 %v9514_v40  ;;  %v3160_v61 = vld [vmem:[#allocation12 + $0xf80] sm:$0xff]  ;;  %v9434_v34 = vcombine.high %v3000_v23, %v3004_v29  ;;  %v9433_v41 = vcombine.low %v3000_v23, %v3004_v29 }
 0x2ae   :  { %v3164_v31 = vld [vmem:[#allocation12 + $0xfa0] sm:$0xff] }
 0x2af   :  { %v2992_v35 = vld [vmem:[#allocation12 + $0xa40] sm:$0xff]  ;;  %v9594_v36 = vcombine.high %v3160_v61, %v3164_v31  ;;  %v9593_v42 = vcombine.low %v3160_v61, %v3164_v31 }
 0x2b0   :  { %5879 = vmatpush1.bf16.msra.mxu0 %v9353_v44  ;;  %5914 = vmatpush1.bf16.msra.mxu1 %v9513_v45  ;;  %v2996_v37 = vld [vmem:[#allocation12 + $0xa60] sm:$0xff] }
 0x2b1   :  { %5880 = vmatprep.subr.bf16.mxu0 %v9474_v46  ;;  %5915 = vmatprep.subr.bf16.mxu1 %v9506_v48  ;;  %v3152_v39 = vld [vmem:[#allocation12 + $0xf40] sm:$0xff]  ;;  %v9426_v43 = vcombine.high %v2992_v35, %v2996_v37  ;;  %v9425_v49 = vcombine.low %v2992_v35, %v2996_v37 }
 0x2b2   :  { %v3156_v40 = vld [vmem:[#allocation12 + $0xf60] sm:$0xff] }
 0x2b3   :  { %v2984_v44 = vld [vmem:[#allocation12 + $0xa00] sm:$0xff]  ;;  %v9586_v45 = vcombine.high %v3152_v39, %v3156_v40  ;;  %v9585_v51 = vcombine.low %v3152_v39, %v3156_v40 }
 0x2b4   :  { %5881 = vmatpush2.bf16.msra.mxu0 %v9473_v53  ;;  %5916 = vmatpush1.bf16.msra.mxu1 %v9505_v56  ;;  %v2988_v46 = vld [vmem:[#allocation12 + $0xa20] sm:$0xff]  ;;  %v10962_v53 = vld [vmem:[#allocation12 + $0x1c8] sm:$0xff] }
 0x2b5   :  { %5882 = vmatprep.subr.bf16.mxu0 %v9466_v54  ;;  %5917 = vmatprep.subr.bf16.mxu1 %v9498_v57  ;;  %v3144_v47 = vld [vmem:[#allocation12 + $0xf00] sm:$0xff]  ;;  %v9418_v52 = vcombine.high %v2984_v44, %v2988_v46  ;;  %v10964_v54 = vld [vmem:[#allocation12 + $0x1e8] sm:$0xff]  ;;  %v9417_v62 = vcombine.low %v2984_v44, %v2988_v46 }
 0x2b6   :  { %v3148_v48 = vld [vmem:[#allocation12 + $0xf20] sm:$0xff]  ;;  %v9156_v0 = vcombine.high %v10962_v53, %v10964_v54  ;;  %v2713_v46 = vld [vmem:[#allocation12 + $0x188] sm:$0xff] }
 0x2b7   :  { %v9578_v56 = vcombine.high %v3144_v47, %v3148_v48  ;;  %v3136_v55 = vld [vmem:[#allocation12 + $0xec0] sm:$0xff]  ;;  %v9577_v63 = vcombine.low %v3144_v47, %v3148_v48  ;;  %v2717_v47 = vld [vmem:[#allocation12 + $0x1a8] sm:$0xff] }
 0x2b8   :  { %5883 = vmatpush2.bf16.msra.mxu0 %v9465_v1  ;;  %5918 = vmatpush1.bf16.msra.mxu1 %v9497_v2  ;;  %v3140_v57 = vld [vmem:[#allocation12 + $0xee0] sm:$0xff]  ;;  %v998_v2 = vsub.s32 5, %v10872_v18 }
 0x2b9   :  { %5884 = vmatprep.subr.bf16.mxu0 %v9458_v3  ;;  %5919 = vmatprep.subr.bf16.mxu1 %v9490_v5  ;;  %v9570_v1 = vcombine.high %v3136_v55, %v3140_v57  ;;  %v3128_v3 = vld [vmem:[#allocation12 + $0xe80] sm:$0xff]  ;;  %v994_v5 = vsub.s32 4, %v10872_v18  ;;  %v9569_v6 = vcombine.low %v3136_v55, %v3140_v57  ;;  %v2705_v55 = vld [vmem:[#allocation12 + $0x148] sm:$0xff] }
 0x2ba   :  { %v3132_v4 = vld [vmem:[#allocation12 + $0xea0] sm:$0xff]  ;;  %v999_v9 = vrot.slane %v10912_v50, %v998_v2  ;;  %v2709_v57 = vld [vmem:[#allocation12 + $0x168] sm:$0xff] }
 0x2bb   :  { %v9562_v58 = vcombine.high %v3128_v3, %v3132_v4  ;;  %v9561_v15 = vcombine.low %v3128_v3, %v3132_v4  ;;  %v3116_v23 = vld [vmem:[#allocation12 + $0xe20] sm:$0xff]  ;;  %v2689_v3 = vld [vmem:[#allocation12 + $0xc8] sm:$0xff] }
 0x2bc   :  { %5885 = vmatpush2.bf16.msra.mxu0 %v9457_v10  ;;  %5920 = vmatpush1.bf16.msra.mxu1 %v9489_v59  ;;  %v3120_v10 = vld [vmem:[#allocation12 + $0xe40] sm:$0xff]  ;;  %v2693_v4 = vld [vmem:[#allocation12 + $0xe8] sm:$0xff] }
 0x2bd   :  { %5886 = vmatprep.subr.bf16.mxu0 %v9450_v11  ;;  %5921 = vmatprep.subr.bf16.mxu1 %v9482_v13  ;;  %v3124_v59 = vld [vmem:[#allocation12 + $0xe60] sm:$0xff]  ;;  %v995_v11 = vrot.slane %v10912_v50, %v994_v5 }
 0x2be   :  { %v9554_v60 = vcombine.high %v3120_v10, %v3124_v59 }
 0x2c0   :  { %5887 = vmatpush2.bf16.msra.mxu0 %v9449_v25  ;;  %5922 = vmatpush1.bf16.msra.mxu1 %v9481_v26 }
 0x2c1   :  { %5888 = vmatprep.subr.bf16.mxu0 %v9442_v27  ;;  %5923 = vmatprep.subr.bf16.mxu1 %v9602_v28  ;;  %v3112_v27 = vld [vmem:[#allocation12 + $0xe00] sm:$0xff] }
 0x2c2   :  { %v9546_v50 = vcombine.high %v3112_v27, %v3116_v23 }
 0x2c4   :  { %5889 = vmatpush2.bf16.msra.mxu0 %v9441_v32  ;;  %5924 = vmatpush2.bf16.msra.mxu1 %v9601_v33  ;;  %v9553_v32 = vcombine.low %v3120_v10, %v3124_v59  ;;  %v2685_v10 = vld [vmem:[#allocation12 + $0xa8] sm:$0xff]  ;;  %v9123_v59 = vcombine.low %v2689_v3, %v2693_v4 }
 0x2c5   :  { %5890 = vmatprep.subr.bf16.mxu0 %v9434_v34  ;;  %5925 = vmatprep.subr.bf16.mxu1 %v9594_v36 }
 0x2c8   :  { %5891 = vmatpush2.bf16.msra.mxu0 %v9433_v41  ;;  %5926 = vmatpush2.bf16.msra.mxu1 %v9593_v42  ;;  %v9545_v41 = vcombine.low %v3112_v27, %v3116_v23  ;;  %v2785_v23 = vld [vmem:[#allocation12 + $0x3c8] sm:$0xff] }
 0x2c9   :  { %5892 = vmatprep.subr.bf16.mxu0 %v9426_v43  ;;  %5927 = vmatprep.subr.bf16.mxu1 %v9586_v45  ;;  %v9284_v43 = vcombine.high %v10954_v24, %v10956_v8 }
 0x2cc   :  { %5893 = vmatpush2.bf16.msra.mxu0 %v9425_v49  ;;  %5928 = vmatpush2.bf16.msra.mxu1 %v9585_v51  ;;  %v9155_v51 = vcombine.low %v10962_v53, %v10964_v54  ;;  %v9139_v53 = vcombine.low %v2705_v55, %v2709_v57 }
 0x2cd   :  { %5894 = vmatprep.subr.bf16.mxu0 %v9418_v52  ;;  %5929 = vmatprep.subr.bf16.mxu1 %v9578_v56  ;;  %v9148_v56 = vcombine.high %v2713_v46, %v2717_v47 }
 0x2d0   :  { %5895 = vmatpush2.bf16.msra.mxu0 %v9417_v62  ;;  %5930 = vmatpush2.bf16.msra.mxu1 %v9577_v63  ;;  %v9147_v62 = vcombine.low %v2713_v46, %v2717_v47  ;;  %v9140_v63 = vcombine.high %v2705_v55, %v2709_v57  ;;  %v1006_v47 = vsub.s32 7, %v10872_v18 }
 0x2d1   :  { %5950 = vmatprep.subr.bf16.mxu0 %v9156_v0  ;;  %5931 = vmatprep.subr.bf16.mxu1 %v9570_v1  ;;  %v2697_v0 = vld [vmem:[#allocation12 + $0x108] sm:$0xff] }
 0x2d2   :  { %v2701_v1 = vld [vmem:[#allocation12 + $0x128] sm:$0xff] }
 0x2d3   :  { %v2502_v7 = vpop.f32.mrf.mxu0  ;;  %v9132_v54 = vcombine.high %v2697_v0, %v2701_v1 }
 0x2d4   :  { %v2545_v13 = vpop.f32.mrf.mxu1  ;;  %5932 = vmatpush2.bf16.msra.mxu1 %v9569_v6  ;;  %v2503_v28 = vadd.f32 %v2502_v7, %v995_v11  ;;  %v9131_v6 = vcombine.low %v2697_v0, %v2701_v1  ;;  %v2673_v7 = vld [vmem:[#allocation12 + $0x48] sm:$0xff] }
 0x2d5   :  { %v2504_v16 = vpop.f32.mrf.mxu0  ;;  %5933 = vmatprep.subr.bf16.mxu1 %v9562_v58  ;;  %v9124_v58 = vcombine.high %v2689_v3, %v2693_v4  ;;  %v2737_v0 = vld [vmem:[#allocation12 + $0x248] sm:$0xff] }
 0x2d6   :  { %v2505_v25 = vadd.f32 %v2504_v16, %v999_v9  ;;  %v2547_v26 = vpop.f32.mrf.mxu1  ;;  %v2546_v37 = vadd.f32 %v2545_v13, %v2503_v28  ;;  %v2677_v13 = vld [vmem:[#allocation12 + $0x68] sm:$0xff] }
 0x2d7   :  { %v2506_v29 = vpop.f32.mrf.mxu0  ;;  %v9108_v16 = vcombine.high %v2673_v7, %v2677_v13  ;;  %v2789_v28 = vld [vmem:[#allocation12 + $0x3e8] sm:$0xff] }
 0x2d8   :  { %v2507_v61 = vadd.f32 %v2506_v29, %v995_v11  ;;  %v2549_v31 = vpop.f32.mrf.mxu1  ;;  %5934 = vmatpush2.bf16.msra.mxu1 %v9561_v15  ;;  %v2548_v34 = vadd.f32 %v2547_v26, %v2505_v25  ;;  %v2644_v48 = vmax.f32 %v2546_v37, 0.0  ;;  %v2669_v25 = vld [vmem:[#allocation12 + $0x28] sm:$0xff]  ;;  %v9107_v26 = vcombine.low %v2673_v7, %v2677_v13 }
 0x2d9   :  { %v2508_v33 = vpop.f32.mrf.mxu0  ;;  %5935 = vmatprep.subr.bf16.mxu1 %v9554_v60  ;;  %v2665_v60 = vld [vmem:[#allocation12 + $0x8] sm:$0xff] }
 0x2da   :  { %v2550_v35 = vadd.f32 %v2549_v31, %v2507_v61  ;;  %v2509_v36 = vadd.f32 %v2508_v33, %v999_v9  ;;  %v2551_v39 = vpop.f32.mrf.mxu1  ;;  %v2645_v44 = vmax.f32 %v2548_v34, 0.0  ;;  %v2681_v9 = vld [vmem:[#allocation12 + $0x88] sm:$0xff]  ;;  %v9100_v27 = vcombine.high %v2665_v60, %v2669_v25 }
 0x2db   :  { %v9116_v11 = vcombine.high %v2681_v9, %v2685_v10  ;;  %v9115_v15 = vcombine.low %v2681_v9, %v2685_v10  ;;  %v9099_v29 = vcombine.low %v2665_v60, %v2669_v25  ;;  %v9220_v61 = vcombine.high %v2785_v23, %v2789_v28  ;;  %v2777_v31 = vld [vmem:[#allocation12 + $0x388] sm:$0xff] }
 0x2dc   :  { %v2552_v40 = vadd.f32 %v2551_v39, %v2509_v36  ;;  %5936 = vmatpush2.bf16.msra.mxu1 %v9553_v32  ;;  %v2652_v42 = vmax.f32 %v2550_v35, 0.0  ;;  %v2781_v32 = vld [vmem:[#allocation12 + $0x3a8] sm:$0xff]  ;;  %v9219_v33 = vcombine.low %v2785_v23, %v2789_v28 }
 0x2dd   :  { %5937 = vmatprep.subr.bf16.mxu1 %v9546_v50  ;;  %v9212_v50 = vcombine.high %v2777_v31, %v2781_v32  ;;  %v2769_v34 = vld [vmem:[#allocation12 + $0x348] sm:$0xff]  ;;  %v9211_v36 = vcombine.low %v2777_v31, %v2781_v32 }
 0x2de   :  { %v2653_v45 = vmax.f32 %v2552_v40, 0.0  ;;  %v10982_v52 = vpack.c.bf16 %v2652_v42, %v2644_v48  ;;  %v2773_v35 = vld [vmem:[#allocation12 + $0x368] sm:$0xff] }
 0x2df   :  { %v9204_v37 = vcombine.high %v2769_v34, %v2773_v35  ;;  %v2761_v39 = vld [vmem:[#allocation12 + $0x308] sm:$0xff] }
 0x2e0   :  { %v10978_v49 = vpack.c.bf16 %v2653_v45, %v2645_v44  ;;  %5938 = vmatpush2.bf16.msra.mxu1 %v9545_v41  ;;  %v2765_v40 = vld [vmem:[#allocation12 + $0x328] sm:$0xff]  ;;  %v9203_v41 = vcombine.low %v2769_v34, %v2773_v35 }
 0x2e1   :  { %5993 = vmatprep.subr.bf16.mxu1 %v9284_v43  ;;  %v9196_v42 = vcombine.high %v2761_v39, %v2765_v40  ;;  %v2753_v43 = vld [vmem:[#allocation12 + $0x2c8] sm:$0xff]  ;;  %v9195_v45 = vcombine.low %v2761_v39, %v2765_v40 }
 0x2e2   :  { %5896 = vmatprep.mubr.bf16.mxu0 %v10978_v49  ;;  %v2757_v44 = vld [vmem:[#allocation12 + $0x2e8] sm:$0xff] }
 0x2e3   :  { %5897 = vmatmul.mubr.bf16.vlgmr.msra.gmra.mxu0 %v10982_v52  ;;  %v9188_v46 = vcombine.high %v2753_v43, %v2757_v44  ;;  %v2745_v48 = vld [vmem:[#allocation12 + $0x288] sm:$0xff]  ;;  %v9187_v55 = vcombine.low %v2753_v43, %v2757_v44 }
 0x2e4   :  { %5951 = vmatpush1.bf16.msra.mxu0 %v9155_v51  ;;  %5982 = vmatprep.mubr.bf16.mxu0 %v10926_v38  ;;  %v2749_v51 = vld [vmem:[#allocation12 + $0x2a8] sm:$0xff] }
 0x2e5   :  { %5952 = vmatprep.subr.bf16.mxu0 %v9148_v56  ;;  %v1002_v56 = vsub.s32 6, %v10872_v18  ;;  %v9180_v57 = vcombine.high %v2745_v48, %v2749_v51  ;;  %v2741_v1 = vld [vmem:[#allocation12 + $0x268] sm:$0xff]  ;;  %v9179_v4 = vcombine.low %v2745_v48, %v2749_v51 }
 0x2e6   :  { %v9171_v60 = vcombine.low %v2737_v0, %v2741_v1  ;;  %v2841_v39 = vld [vmem:[#allocation12 + $0x588] sm:$0xff] }
 0x2e7   :  { %v2973_v43 = vld [vmem:[#allocation12 + $0x9a8] sm:$0xff] }
 0x2e8   :  { %5953 = vmatpush1.bf16.msra.mxu0 %v9147_v62  ;;  %v10480_v62 = vld [vmem:[#allocation11] sm:$0xff]  ;;  %v2833_v48 = vld [vmem:[#allocation12 + $0x548] sm:$0xff] }
 0x2e9   :  { %5954 = vmatprep.subr.bf16.mxu0 %v9140_v63  ;;  %v1007_v63 = vrot.slane %v10480_v62, %v1006_v47 }
 0x2ec   :  { %5955 = vmatpush1.bf16.msra.mxu0 %v9139_v53  ;;  %v1003_v53 = vrot.slane %v10480_v62, %v1002_v56  ;;  %v2961_v62 = vld [vmem:[#allocation12 + $0x948] sm:$0xff] }
 0x2ed   :  { %5956 = vmatprep.subr.bf16.mxu0 %v9132_v54 }
 0x2f0   :  { %5957 = vmatpush1.bf16.msra.mxu0 %v9131_v6 }
 0x2f1   :  { %5958 = vmatprep.subr.bf16.mxu0 %v9124_v58  ;;  %v9172_v58 = vcombine.high %v2737_v0, %v2741_v1 }
 0x2f4   :  { %5959 = vmatpush1.bf16.msra.mxu0 %v9123_v59  ;;  %v2729_v59 = vld [vmem:[#allocation12 + $0x208] sm:$0xff] }
 0x2f5   :  { %5960 = vmatprep.subr.bf16.mxu0 %v9116_v11  ;;  %v2733_v11 = vld [vmem:[#allocation12 + $0x228] sm:$0xff] }
 0x2f8   :  { %5961 = vmatpush1.bf16.msra.mxu0 %v9115_v15 }
 0x2f9   :  { %5962 = vmatprep.subr.bf16.mxu0 %v9108_v16 }
 0x2fc   :  { %5963 = vmatpush1.bf16.msra.mxu0 %v9107_v26  ;;  %v9164_v26 = vcombine.high %v2729_v59, %v2733_v11 }
 0x2fd   :  { %5964 = vmatprep.subr.bf16.mxu0 %v9100_v27 }
 0x300   :  { %5965 = vmatpush1.bf16.msra.mxu0 %v9099_v29  ;;  %v2977_v29 = vld [vmem:[#allocation12 + $0x9c8] sm:$0xff] }
 0x301   :  { %5966 = vmatprep.subr.bf16.mxu0 %v9220_v61  ;;  %v2981_v61 = vld [vmem:[#allocation12 + $0x9e8] sm:$0xff] }
 0x302   :  { %v9412_v35 = vcombine.high %v2977_v29, %v2981_v61 }
 0x304   :  { %5967 = vmatpush2.bf16.msra.mxu0 %v9219_v33 }
 0x305   :  { %5968 = vmatprep.subr.bf16.mxu0 %v9212_v50  ;;  %v9163_v50 = vcombine.low %v2729_v59, %v2733_v11  ;;  %v2821_v59 = vld [vmem:[#allocation12 + $0x4e8] sm:$0xff] }
 0x306   :  { %v2945_v11 = vld [vmem:[#allocation12 + $0x8c8] sm:$0xff] }
 0x308   :  { %5969 = vmatpush2.bf16.msra.mxu0 %v9211_v36 }
 0x309   :  { %5970 = vmatprep.subr.bf16.mxu0 %v9204_v37 }
 0x30c   :  { %5971 = vmatpush2.bf16.msra.mxu0 %v9203_v41  ;;  %v2845_v41 = vld [vmem:[#allocation12 + $0x5a8] sm:$0xff] }
 0x30d   :  { %5972 = vmatprep.subr.bf16.mxu0 %v9196_v42  ;;  %v2969_v42 = vld [vmem:[#allocation12 + $0x988] sm:$0xff]  ;;  %v9276_v51 = vcombine.high %v2841_v39, %v2845_v41  ;;  %v9275_v0 = vcombine.low %v2841_v39, %v2845_v41 }
 0x30e   :  { %v9403_v1 = vcombine.low %v2969_v42, %v2973_v43  ;;  %v2797_v41 = vld [vmem:[#allocation12 + $0x428] sm:$0xff] }
 0x310   :  { %5973 = vmatpush2.bf16.msra.mxu0 %v9195_v45  ;;  %v9411_v45 = vcombine.low %v2977_v29, %v2981_v61 }
 0x311   :  { %5974 = vmatprep.subr.bf16.mxu0 %v9188_v46 }
 0x313   :  { %v2588_v54 = vpop.f32.mrf.mxu0 }
 0x314   :  { %v2631_v3 = vpop.f32.mrf.mxu1  ;;  %5975 = vmatpush2.bf16.msra.mxu0 %v9187_v55  ;;  %v2589_v7 = vadd.f32 %v2588_v54, %v1003_v53  ;;  %v9404_v55 = vcombine.high %v2969_v42, %v2973_v43  ;;  %v2921_v42 = vld [vmem:[#allocation12 + $0x808] sm:$0xff] }
 0x315   :  { %v2590_v6 = vpop.f32.mrf.mxu0  ;;  %5976 = vmatprep.subr.bf16.mxu0 %v9180_v57  ;;  %v2837_v57 = vld [vmem:[#allocation12 + $0x568] sm:$0xff] }
 0x316   :  { %v2591_v9 = vadd.f32 %v2590_v6, %v1007_v63  ;;  %v2633_v10 = vpop.f32.mrf.mxu1  ;;  %v2632_v31 = vadd.f32 %v2631_v3, %v2589_v7  ;;  %v2825_v3 = vld [vmem:[#allocation12 + $0x508] sm:$0xff] }
 0x317   :  { %v2592_v13 = vpop.f32.mrf.mxu0  ;;  %v2953_v6 = vld [vmem:[#allocation12 + $0x908] sm:$0xff] }
 0x318   :  { %v2593_v15 = vadd.f32 %v2592_v13, %v1003_v53  ;;  %v2635_v16 = vpop.f32.mrf.mxu1  ;;  %5977 = vmatpush2.bf16.msra.mxu0 %v9179_v4  ;;  %v2634_v27 = vadd.f32 %v2633_v10, %v2591_v9  ;;  %v2646_v40 = vmax.f32 %v2632_v31, 0.0  ;;  %v9268_v53 = vcombine.high %v2833_v48, %v2837_v57  ;;  %v2829_v4 = vld [vmem:[#allocation12 + $0x528] sm:$0xff] }
 0x319   :  { %v2594_v25 = vpop.f32.mrf.mxu0  ;;  %5978 = vmatprep.subr.bf16.mxu0 %v9172_v58  ;;  %v2957_v58 = vld [vmem:[#allocation12 + $0x928] sm:$0xff]  ;;  %v9267_v9 = vcombine.low %v2833_v48, %v2837_v57  ;;  %v9260_v8 = vcombine.high %v2825_v3, %v2829_v4  ;;  %v9259_v13 = vcombine.low %v2825_v3, %v2829_v4 }
 0x31a   :  { %v2636_v23 = vadd.f32 %v2635_v16, %v2593_v15  ;;  %v2595_v28 = vadd.f32 %v2594_v25, %v1007_v63  ;;  %v2637_v32 = vpop.f32.mrf.mxu1  ;;  %v2647_v36 = vmax.f32 %v2634_v27, 0.0  ;;  %v2965_v63 = vld [vmem:[#allocation12 + $0x968] sm:$0xff]  ;;  %v9387_v15 = vcombine.low %v2953_v6, %v2957_v58 }
 0x31b   :  { %v9396_v54 = vcombine.high %v2961_v62, %v2965_v63  ;;  %v9395_v24 = vcombine.low %v2961_v62, %v2965_v63  ;;  %v2817_v10 = vld [vmem:[#allocation12 + $0x4c8] sm:$0xff] }
 0x31c   :  { %v2638_v33 = vadd.f32 %v2637_v32, %v2595_v28  ;;  %5979 = vmatpush2.bf16.msra.mxu0 %v9171_v60  ;;  %v2654_v34 = vmax.f32 %v2636_v23, 0.0  ;;  %v2949_v7 = vld [vmem:[#allocation12 + $0x8e8] sm:$0xff]  ;;  %v9252_v16 = vcombine.high %v2817_v10, %v2821_v59  ;;  %v9251_v28 = vcombine.low %v2817_v10, %v2821_v59 }
 0x31d   :  { %5980 = vmatprep.subr.bf16.mxu0 %v9164_v26  ;;  %v9380_v60 = vcombine.high %v2945_v11, %v2949_v7  ;;  %v2809_v25 = vld [vmem:[#allocation12 + $0x488] sm:$0xff]  ;;  %v9379_v29 = vcombine.low %v2945_v11, %v2949_v7 }
 0x31e   :  { %v2655_v37 = vmax.f32 %v2638_v33, 0.0  ;;  %v10995_v46 = vpack.c.bf16 %v2654_v34, %v2646_v40  ;;  %v2813_v26 = vld [vmem:[#allocation12 + $0x4a8] sm:$0xff] }
 0x31f   :  { %v2937_v27 = vld [vmem:[#allocation12 + $0x888] sm:$0xff]  ;;  %v9244_v61 = vcombine.high %v2809_v25, %v2813_v26 }
 0x320   :  { %v10993_v44 = vpack.c.bf16 %v2655_v37, %v2647_v36  ;;  %5981 = vmatpush2.bf16.msra.mxu0 %v9163_v50  ;;  %v2941_v23 = vld [vmem:[#allocation12 + $0x8a8] sm:$0xff] }
 0x321   :  { %6036 = vmatprep.subr.bf16.mxu0 %v9412_v35  ;;  %v9372_v31 = vcombine.high %v2937_v27, %v2941_v23  ;;  %v2801_v32 = vld [vmem:[#allocation12 + $0x448] sm:$0xff]  ;;  %v9243_v35 = vcombine.low %v2809_v25, %v2813_v26  ;;  %v9371_v36 = vcombine.low %v2937_v27, %v2941_v23 }
 0x322   :  { %5939 = vmatprep.mubr.bf16.mxu1 %v10993_v44  ;;  %v2805_v33 = vld [vmem:[#allocation12 + $0x468] sm:$0xff] }
 0x323   :  { %5983 = vmatmul.mubr.bf16.vlgmr.msra.gmra.mxu0 %v10941_v30  ;;  %5940 = vmatmul.mubr.bf16.vlgmr.msra.gmra.mxu1 %v10995_v46  ;;  %v2929_v50 = vld [vmem:[#allocation12 + $0x848] sm:$0xff]  ;;  %v9236_v37 = vcombine.high %v2801_v32, %v2805_v33 }
 0x324   :  { %5994 = vmatpush1.bf16.msra.mxu1 %v9283_v17  ;;  %6037 = vmatpush1.bf16.msra.mxu0 %v9411_v45  ;;  %v9388_v17 = vcombine.high %v2953_v6, %v2957_v58  ;;  %v2933_v34 = vld [vmem:[#allocation12 + $0x868] sm:$0xff]  ;;  %v9235_v45 = vcombine.low %v2801_v32, %v2805_v33 }
 0x325   :  { %6068 = vmatprep.mubr.bf16.mxu0 %v10978_v49  ;;  %6025 = vmatprep.mubr.bf16.mxu1 %v10948_v12  ;;  %v9364_v39 = vcombine.high %v2929_v50, %v2933_v34  ;;  %v2793_v40 = vld [vmem:[#allocation12 + $0x408] sm:$0xff]  ;;  %v9363_v48 = vcombine.low %v2929_v50, %v2933_v34 }
 0x326   :  { %5995 = vmatprep.subr.bf16.mxu1 %v9276_v51  ;;  %6038 = vmatprep.subr.bf16.mxu0 %v9404_v55  ;;  %v2925_v43 = vld [vmem:[#allocation12 + $0x828] sm:$0xff]  ;;  %v9228_v51 = vcombine.high %v2793_v40, %v2797_v41 }
 0x327   :  { %v9356_v55 = vcombine.high %v2921_v42, %v2925_v43  ;;  %v2913_v57 = vld [vmem:[#allocation12 + $0x7c8] sm:$0xff] }
 0x328   :  { %5996 = vmatpush1.bf16.msra.mxu1 %v9275_v0  ;;  %6039 = vmatpush1.bf16.msra.mxu0 %v9403_v1  ;;  %v2917_v62 = vld [vmem:[#allocation12 + $0x7e8] sm:$0xff]  ;;  %v9227_v1 = vcombine.low %v2793_v40, %v2797_v41 }
 0x329   :  { %5997 = vmatprep.subr.bf16.mxu1 %v9268_v53  ;;  %6040 = vmatprep.subr.bf16.mxu0 %v9396_v54  ;;  %v3041_v63 = vld [vmem:[#allocation12 + $0xbc8] sm:$0xff]  ;;  %v9355_v53 = vcombine.low %v2921_v42, %v2925_v43  ;;  %v9348_v54 = vcombine.high %v2913_v57, %v2917_v62 }
 0x32a   :  { %v3045_v0 = vld [vmem:[#allocation12 + $0xbe8] sm:$0xff] }
 0x32b   :  { %v9476_v3 = vcombine.high %v3041_v63, %v3045_v0  ;;  %v2905_v4 = vld [vmem:[#allocation12 + $0x788] sm:$0xff] }
 0x32c   :  { %5998 = vmatpush1.bf16.msra.mxu1 %v9267_v9  ;;  %6041 = vmatpush1.bf16.msra.mxu0 %v9395_v24  ;;  %v2909_v6 = vld [vmem:[#allocation12 + $0x7a8] sm:$0xff]  ;;  %v9347_v24 = vcombine.low %v2913_v57, %v2917_v62 }
 0x32d   :  { %5999 = vmatprep.subr.bf16.mxu1 %v9260_v8  ;;  %6042 = vmatprep.subr.bf16.mxu0 %v9388_v17  ;;  %v3033_v58 = vld [vmem:[#allocation12 + $0xb88] sm:$0xff]  ;;  %v9475_v8 = vcombine.low %v3041_v63, %v3045_v0  ;;  %v9340_v17 = vcombine.high %v2905_v4, %v2909_v6 }
 0x32e   :  { %v3037_v9 = vld [vmem:[#allocation12 + $0xba8] sm:$0xff] }
 0x32f   :  { %v9468_v10 = vcombine.high %v3033_v58, %v3037_v9  ;;  %v2897_v59 = vld [vmem:[#allocation12 + $0x748] sm:$0xff] }
 0x330   :  { %6000 = vmatpush1.bf16.msra.mxu1 %v9259_v13  ;;  %6043 = vmatpush1.bf16.msra.mxu0 %v9387_v15  ;;  %v2901_v11 = vld [vmem:[#allocation12 + $0x768] sm:$0xff]  ;;  %v9339_v15 = vcombine.low %v2905_v4, %v2909_v6 }
 0x331   :  { %6001 = vmatprep.subr.bf16.mxu1 %v9252_v16  ;;  %6044 = vmatprep.subr.bf16.mxu0 %v9380_v60  ;;  %v3025_v7 = vld [vmem:[#allocation12 + $0xb48] sm:$0xff]  ;;  %v9467_v16 = vcombine.low %v3033_v58, %v3037_v9  ;;  %v9332_v60 = vcombine.high %v2897_v59, %v2901_v11 }
 0x332   :  { %v3029_v13 = vld [vmem:[#allocation12 + $0xb68] sm:$0xff] }
 0x333   :  { %v9460_v25 = vcombine.high %v3025_v7, %v3029_v13  ;;  %v2889_v26 = vld [vmem:[#allocation12 + $0x708] sm:$0xff] }
 0x334   :  { %6002 = vmatpush1.bf16.msra.mxu1 %v9251_v28  ;;  %6045 = vmatpush1.bf16.msra.mxu0 %v9379_v29  ;;  %v2893_v27 = vld [vmem:[#allocation12 + $0x728] sm:$0xff]  ;;  %v9331_v29 = vcombine.low %v2897_v59, %v2901_v11 }
 0x335   :  { %6003 = vmatprep.subr.bf16.mxu1 %v9244_v61  ;;  %6046 = vmatprep.subr.bf16.mxu0 %v9372_v31  ;;  %v3017_v23 = vld [vmem:[#allocation12 + $0xb08] sm:$0xff]  ;;  %v9459_v61 = vcombine.low %v3025_v7, %v3029_v13  ;;  %v9324_v31 = vcombine.high %v2889_v26, %v2893_v27  ;;  %v2722_v13 = vld [vmem:[#allocation12 + $0x1d0] sm:$0xff] }
 0x336   :  { %v3021_v28 = vld [vmem:[#allocation12 + $0xb28] sm:$0xff] }
 0x337   :  { %v9452_v32 = vcombine.high %v3017_v23, %v3021_v28  ;;  %v2881_v33 = vld [vmem:[#allocation12 + $0x6c8] sm:$0xff] }
 0x338   :  { %6004 = vmatpush1.bf16.msra.mxu1 %v9243_v35  ;;  %6047 = vmatpush1.bf16.msra.mxu0 %v9371_v36  ;;  %v2885_v50 = vld [vmem:[#allocation12 + $0x6e8] sm:$0xff]  ;;  %v9323_v36 = vcombine.low %v2889_v26, %v2893_v27 }
 0x339   :  { %6005 = vmatprep.subr.bf16.mxu1 %v9236_v37  ;;  %6048 = vmatprep.subr.bf16.mxu0 %v9364_v39  ;;  %v3009_v34 = vld [vmem:[#allocation12 + $0xac8] sm:$0xff]  ;;  %v9451_v37 = vcombine.low %v3017_v23, %v3021_v28  ;;  %v9316_v39 = vcombine.high %v2881_v33, %v2885_v50 }
 0x33a   :  { %v3013_v35 = vld [vmem:[#allocation12 + $0xae8] sm:$0xff] }
 0x33b   :  { %v9444_v40 = vcombine.high %v3009_v34, %v3013_v35  ;;  %v2873_v41 = vld [vmem:[#allocation12 + $0x688] sm:$0xff] }
 0x33c   :  { %6006 = vmatpush1.bf16.msra.mxu1 %v9235_v45  ;;  %6049 = vmatpush1.bf16.msra.mxu0 %v9363_v48  ;;  %v2877_v42 = vld [vmem:[#allocation12 + $0x6a8] sm:$0xff]  ;;  %v9315_v48 = vcombine.low %v2881_v33, %v2885_v50  ;;  %v2718_v33 = vld [vmem:[#allocation12 + $0x1b0] sm:$0xff] }
 0x33d   :  { %6007 = vmatprep.subr.bf16.mxu1 %v9228_v51  ;;  %6050 = vmatprep.subr.bf16.mxu0 %v9356_v55  ;;  %v3001_v43 = vld [vmem:[#allocation12 + $0xa88] sm:$0xff]  ;;  %v9443_v51 = vcombine.low %v3009_v34, %v3013_v35  ;;  %v9308_v55 = vcombine.high %v2873_v41, %v2877_v42 }
 0x33e   :  { %v3005_v45 = vld [vmem:[#allocation12 + $0xaa8] sm:$0xff] }
 0x33f   :  { %v9436_v57 = vcombine.high %v3001_v43, %v3005_v45  ;;  %v2865_v62 = vld [vmem:[#allocation12 + $0x648] sm:$0xff] }
 0x340   :  { %6008 = vmatpush1.bf16.msra.mxu1 %v9227_v1  ;;  %6051 = vmatpush1.bf16.msra.mxu0 %v9355_v53  ;;  %v2869_v63 = vld [vmem:[#allocation12 + $0x668] sm:$0xff]  ;;  %v9307_v53 = vcombine.low %v2873_v41, %v2877_v42 }
 0x341   :  { %6009 = vmatprep.subr.bf16.mxu1 %v9348_v54  ;;  %6052 = vmatprep.subr.bf16.mxu0 %v9476_v3  ;;  %v2993_v0 = vld [vmem:[#allocation12 + $0xa48] sm:$0xff]  ;;  %v9435_v54 = vcombine.low %v3001_v43, %v3005_v45  ;;  %v9300_v3 = vcombine.high %v2865_v62, %v2869_v63  ;;  %v2706_v43 = vld [vmem:[#allocation12 + $0x150] sm:$0xff] }
 0x342   :  { %v2997_v1 = vld [vmem:[#allocation12 + $0xa68] sm:$0xff]  ;;  %v2710_v45 = vld [vmem:[#allocation12 + $0x170] sm:$0xff] }
 0x343   :  { %v9428_v4 = vcombine.high %v2993_v0, %v2997_v1  ;;  %v2857_v6 = vld [vmem:[#allocation12 + $0x608] sm:$0xff] }
 0x344   :  { %6010 = vmatpush2.bf16.msra.mxu1 %v9347_v24  ;;  %6053 = vmatpush2.bf16.msra.mxu0 %v9475_v8  ;;  %v2861_v58 = vld [vmem:[#allocation12 + $0x628] sm:$0xff]  ;;  %v9299_v8 = vcombine.low %v2865_v62, %v2869_v63 }
 0x345   :  { %6011 = vmatprep.subr.bf16.mxu1 %v9340_v17  ;;  %6054 = vmatprep.subr.bf16.mxu0 %v9468_v10  ;;  %v2985_v9 = vld [vmem:[#allocation12 + $0xa08] sm:$0xff]  ;;  %v9427_v17 = vcombine.low %v2993_v0, %v2997_v1  ;;  %v9292_v10 = vcombine.high %v2857_v6, %v2861_v58  ;;  %v9142_v0 = vcombine.high %v2706_v43, %v2710_v45 }
 0x346   :  { %v2989_v24 = vld [vmem:[#allocation12 + $0xa28] sm:$0xff] }
 0x347   :  { %v9420_v59 = vcombine.high %v2985_v9, %v2989_v24  ;;  %v3105_v11 = vld [vmem:[#allocation12 + $0xdc8] sm:$0xff]  ;;  %v9419_v26 = vcombine.low %v2985_v9, %v2989_v24  ;;  %v9141_v9 = vcombine.low %v2706_v43, %v2710_v45  ;;  %v2670_v43 = vld [vmem:[#allocation12 + $0x30] sm:$0xff] }
 0x348   :  { %6012 = vmatpush2.bf16.msra.mxu1 %v9339_v15  ;;  %6055 = vmatpush2.bf16.msra.mxu0 %v9467_v16  ;;  %v3109_v7 = vld [vmem:[#allocation12 + $0xde8] sm:$0xff]  ;;  %v2726_v15 = vld [vmem:[#allocation12 + $0x1f0] sm:$0xff]  ;;  %v3176_v16 = vld [vmem:[#allocation14] sm:$0xff] }
 0x349   :  { %6013 = vmatprep.subr.bf16.mxu1 %v9332_v60  ;;  %6056 = vmatprep.subr.bf16.mxu0 %v9460_v25  ;;  %v9291_v25 = vcombine.low %v2857_v6, %v2861_v58  ;;  %v9540_v27 = vcombine.high %v3105_v11, %v3109_v7  ;;  %v9158_v23 = vcombine.high %v2722_v13, %v2726_v15  ;;  %v3081_v1 = vld [vmem:[#allocation12 + $0xd08] sm:$0xff] }
 0x34a   :  { %v3181_v28 = vrot.slane %v3176_v16, %v10881_v21  ;;  %v9539_v50 = vcombine.low %v3105_v11, %v3109_v7  ;;  %v9157_v34 = vcombine.low %v2722_v13, %v2726_v15  ;;  %v2694_v11 = vld [vmem:[#allocation12 + $0xf0] sm:$0xff] }
 0x34c   :  { %6014 = vmatpush2.bf16.msra.mxu1 %v9331_v29  ;;  %6057 = vmatpush2.bf16.msra.mxu0 %v9459_v61  ;;  %v3097_v29 = vld [vmem:[#allocation12 + $0xd88] sm:$0xff] }
 0x34d   :  { %6015 = vmatprep.subr.bf16.mxu1 %v9324_v31  ;;  %6058 = vmatprep.subr.bf16.mxu0 %v9452_v32  ;;  %v3101_v31 = vld [vmem:[#allocation12 + $0xda8] sm:$0xff]  ;;  %v2714_v32 = vld [vmem:[#allocation12 + $0x190] sm:$0xff] }
 0x350   :  { %6016 = vmatpush2.bf16.msra.mxu1 %v9323_v36  ;;  %6059 = vmatpush2.bf16.msra.mxu0 %v9451_v37  ;;  %v9532_v36 = vcombine.high %v3097_v29, %v3101_v31  ;;  %v9150_v37 = vcombine.high %v2714_v32, %v2718_v33 }
 0x351   :  { %6017 = vmatprep.subr.bf16.mxu1 %v9316_v39  ;;  %6060 = vmatprep.subr.bf16.mxu0 %v9444_v40  ;;  %v3089_v39 = vld [vmem:[#allocation12 + $0xd48] sm:$0xff] }
 0x352   :  { %v3093_v40 = vld [vmem:[#allocation12 + $0xd68] sm:$0xff] }
 0x353   :  { %v5812_v60 = vpop.f32.mrf.mxu0  ;;  %v9524_v62 = vcombine.high %v3089_v39, %v3093_v40  ;;  %v9523_v58 = vcombine.low %v3089_v39, %v3093_v40  ;;  %v3049_v40 = vld [vmem:[#allocation12 + $0xc08] sm:$0xff] }
 0x354   :  { %6018 = vmatpush2.bf16.msra.mxu1 %v9315_v48  ;;  %6061 = vmatpush2.bf16.msra.mxu0 %v9443_v51  ;;  %v5813_v35 = vadd.f32 %v5812_v60, %v3181_v28  ;;  %v9531_v51 = vcombine.low %v3097_v29, %v3101_v31  ;;  %v3065_v60 = vld [vmem:[#allocation12 + $0xc88] sm:$0xff] }
 0x355   :  { %6019 = vmatprep.subr.bf16.mxu1 %v9308_v55  ;;  %6062 = vmatprep.subr.bf16.mxu0 %v9436_v57  ;;  %v11006_v61 = vpop.f32.mrf.mxu0  ;;  %v9149_v57 = vcombine.low %v2714_v32, %v2718_v33  ;;  %v3057_v32 = vld [vmem:[#allocation12 + $0xc48] sm:$0xff] }
 0x356   :  { %v3061_v33 = vld [vmem:[#allocation12 + $0xc68] sm:$0xff] }
 0x357   :  { %v5816_v41 = vpop.f32.mrf.mxu0  ;;  %v9491_v45 = vcombine.low %v3057_v32, %v3061_v33 }
 0x358   :  { %6020 = vmatpush2.bf16.msra.mxu1 %v9307_v53  ;;  %6063 = vmatpush2.bf16.msra.mxu0 %v9435_v54  ;;  %v5817_v63 = vadd.f32 %v5816_v41, %v3181_v28  ;;  %v3085_v53 = vld [vmem:[#allocation12 + $0xd28] sm:$0xff] }
 0x359   :  { %6021 = vmatprep.subr.bf16.mxu1 %v9300_v3  ;;  %6064 = vmatprep.subr.bf16.mxu0 %v9428_v4  ;;  %v2698_v3 = vld [vmem:[#allocation12 + $0x110] sm:$0xff]  ;;  %v9516_v24 = vcombine.high %v3081_v1, %v3085_v53  ;;  %v9515_v7 = vcombine.low %v3081_v1, %v3085_v53  ;;  %v3053_v41 = vld [vmem:[#allocation12 + $0xc28] sm:$0xff] }
 0x35a   :  { %v2702_v4 = vld [vmem:[#allocation12 + $0x130] sm:$0xff] }
 0x35b   :  { %v9133_v13 = vcombine.low %v2698_v3, %v2702_v4  ;;  %v2786_v1 = vld [vmem:[#allocation12 + $0x3d0] sm:$0xff] }
 0x35c   :  { %6022 = vmatpush2.bf16.msra.mxu1 %v9299_v8  ;;  %6065 = vmatpush2.bf16.msra.mxu0 %v9427_v17  ;;  %v9134_v8 = vcombine.high %v2698_v3, %v2702_v4  ;;  %v3073_v17 = vld [vmem:[#allocation12 + $0xcc8] sm:$0xff]  ;;  %v2790_v53 = vld [vmem:[#allocation12 + $0x3f0] sm:$0xff] }
 0x35d   :  { %6023 = vmatprep.subr.bf16.mxu1 %v9292_v10  ;;  %6066 = vmatprep.subr.bf16.mxu0 %v9420_v59  ;;  %v3077_v10 = vld [vmem:[#allocation12 + $0xce8] sm:$0xff]  ;;  %v2690_v59 = vld [vmem:[#allocation12 + $0xd0] sm:$0xff] }
 0x35e   :  { %v9508_v15 = vcombine.high %v3073_v17, %v3077_v10  ;;  %v9126_v16 = vcombine.high %v2690_v59, %v2694_v11  ;;  %v9125_v28 = vcombine.low %v2690_v59, %v2694_v11  ;;  %v9221_v59 = vcombine.low %v2786_v1, %v2790_v53 }
 0x360   :  { %6024 = vmatpush2.bf16.msra.mxu1 %v9291_v25  ;;  %6067 = vmatpush2.bf16.msra.mxu0 %v9419_v26  ;;  %v3069_v25 = vld [vmem:[#allocation12 + $0xca8] sm:$0xff]  ;;  %v2682_v26 = vld [vmem:[#allocation12 + $0x90] sm:$0xff] }
 0x361   :  { %6079 = vmatprep.subr.bf16.mxu1 %v9540_v27  ;;  %6122 = vmatprep.subr.bf16.mxu0 %v9158_v23  ;;  %v2686_v27 = vld [vmem:[#allocation12 + $0xb0] sm:$0xff]  ;;  %v9507_v23 = vcombine.low %v3073_v17, %v3077_v10  ;;  %v9500_v29 = vcombine.high %v3065_v60, %v3069_v25 }
 0x362   :  { %v9118_v31 = vcombine.high %v2682_v26, %v2686_v27  ;;  %v2782_v17 = vld [vmem:[#allocation12 + $0x3b0] sm:$0xff] }
 0x363   :  { %6026 = vmatmul.mubr.bf16.vlgmr.msra.gmra.mxu1 %v10952_v14  ;;  %6069 = vmatmul.mubr.bf16.vlgmr.msra.gmra.mxu0 %v10982_v52  ;;  %v5855_v42 = vpop.f32.mrf.mxu1 }
 0x364   :  { %v11010_v48 = vadd.f32 %v5855_v42, %v5813_v35  ;;  %6080 = vmatpush1.bf16.msra.mxu1 %v9539_v50  ;;  %6111 = vmatprep.mubr.bf16.mxu1 %v10993_v44  ;;  %v2674_v50 = vld [vmem:[#allocation12 + $0x50] sm:$0xff]  ;;  %v9499_v35 = vcombine.low %v3065_v60, %v3069_v25 }
 0x365   :  { %6123 = vmatpush1.bf16.msra.mxu0 %v9157_v34  ;;  %6154 = vmatprep.mubr.bf16.mxu0 %v10926_v38  ;;  %v11014_v55 = vpop.f32.mrf.mxu1  ;;  %v2678_v34 = vld [vmem:[#allocation12 + $0x70] sm:$0xff] }
 0x366   :  { %6081 = vmatprep.subr.bf16.mxu1 %v9532_v36  ;;  %6124 = vmatprep.subr.bf16.mxu0 %v9150_v37  ;;  %v9117_v36 = vcombine.low %v2682_v26, %v2686_v27  ;;  %v9492_v37 = vcombine.high %v3057_v32, %v3061_v33  ;;  %v9110_v39 = vcombine.high %v2674_v50, %v2678_v34  ;;  %v2666_v42 = vld [vmem:[#allocation12 + $0x10] sm:$0xff] }
 0x367   :  { %v5859_v54 = vpop.f32.mrf.mxu1  ;;  %v9101_v3 = vcombine.low %v2666_v42, %v2670_v43  ;;  %v2774_v60 = vld [vmem:[#allocation12 + $0x370] sm:$0xff] }
 0x368   :  { %v11016_v6 = vadd.f32 %v5859_v54, %v5817_v63  ;;  %6082 = vmatpush1.bf16.msra.mxu1 %v9531_v51  ;;  %v9109_v51 = vcombine.low %v2674_v50, %v2678_v34  ;;  %v3169_v63 = vld [vmem:[#allocation12 + $0xfc8] sm:$0xff]  ;;  %v9483_v54 = vcombine.low %v3049_v40, %v3053_v41  ;;  %v2766_v32 = vld [vmem:[#allocation12 + $0x330] sm:$0xff] }
 0x369   :  { %6125 = vmatpush1.bf16.msra.mxu0 %v9149_v57  ;;  %6083 = vmatprep.subr.bf16.mxu1 %v9524_v62  ;;  %v9484_v57 = vcombine.high %v3049_v40, %v3053_v41  ;;  %v9102_v62 = vcombine.high %v2666_v42, %v2670_v43  ;;  %v2758_v40 = vld [vmem:[#allocation12 + $0x2f0] sm:$0xff] }
 0x36a   :  { %6126 = vmatprep.subr.bf16.mxu0 %v9142_v0  ;;  %v3173_v0 = vld [vmem:[#allocation12 + $0xfe8] sm:$0xff] }
 0x36b   :  { %v9604_v4 = vcombine.high %v3169_v63, %v3173_v0  ;;  %v9603_v10 = vcombine.low %v3169_v63, %v3173_v0  ;;  %v2750_v63 = vld [vmem:[#allocation12 + $0x2b0] sm:$0xff] }
 0x36c   :  { %6084 = vmatpush1.bf16.msra.mxu1 %v9523_v58  ;;  %v9222_v58 = vcombine.high %v2786_v1, %v2790_v53 }
 0x36d   :  { %6127 = vmatpush1.bf16.msra.mxu0 %v9141_v9  ;;  %6085 = vmatprep.subr.bf16.mxu1 %v9516_v24  ;;  %v3161_v9 = vld [vmem:[#allocation12 + $0xf88] sm:$0xff] }
 0x36e   :  { %6128 = vmatprep.subr.bf16.mxu0 %v9134_v8  ;;  %v3165_v24 = vld [vmem:[#allocation12 + $0xfa8] sm:$0xff]  ;;  %v2778_v8 = vld [vmem:[#allocation12 + $0x390] sm:$0xff] }
 0x36f   :  { %v9596_v11 = vcombine.high %v3161_v9, %v3165_v24  ;;  %v9595_v25 = vcombine.low %v3161_v9, %v3165_v24  ;;  %v9213_v26 = vcombine.low %v2778_v8, %v2782_v17  ;;  %v2742_v9 = vld [vmem:[#allocation12 + $0x270] sm:$0xff] }
 0x370   :  { %6086 = vmatpush1.bf16.msra.mxu1 %v9515_v7  ;;  %v9214_v7 = vcombine.high %v2778_v8, %v2782_v17 }
 0x371   :  { %6129 = vmatpush1.bf16.msra.mxu0 %v9133_v13  ;;  %6087 = vmatprep.subr.bf16.mxu1 %v9508_v15  ;;  %v3153_v13 = vld [vmem:[#allocation12 + $0xf48] sm:$0xff] }
 0x372   :  { %6130 = vmatprep.subr.bf16.mxu0 %v9126_v16  ;;  %v3157_v15 = vld [vmem:[#allocation12 + $0xf68] sm:$0xff]  ;;  %v2770_v16 = vld [vmem:[#allocation12 + $0x350] sm:$0xff] }
 0x373   :  { %v9588_v27 = vcombine.high %v3153_v13, %v3157_v15  ;;  %v9587_v33 = vcombine.low %v3153_v13, %v3157_v15  ;;  %v9205_v50 = vcombine.low %v2770_v16, %v2774_v60  ;;  %v2734_v13 = vld [vmem:[#allocation12 + $0x230] sm:$0xff] }
 0x374   :  { %6088 = vmatpush1.bf16.msra.mxu1 %v9507_v23  ;;  %v9206_v23 = vcombine.high %v2770_v16, %v2774_v60 }
 0x375   :  { %6131 = vmatpush1.bf16.msra.mxu0 %v9125_v28  ;;  %6089 = vmatprep.subr.bf16.mxu1 %v9500_v29  ;;  %v3145_v28 = vld [vmem:[#allocation12 + $0xf08] sm:$0xff] }
 0x376   :  { %6132 = vmatprep.subr.bf16.mxu0 %v9118_v31  ;;  %v3149_v29 = vld [vmem:[#allocation12 + $0xf28] sm:$0xff]  ;;  %v2762_v31 = vld [vmem:[#allocation12 + $0x310] sm:$0xff] }
 0x377   :  { %v9580_v34 = vcombine.high %v3145_v28, %v3149_v29  ;;  %v9579_v41 = vcombine.low %v3145_v28, %v3149_v29  ;;  %v9197_v42 = vcombine.low %v2762_v31, %v2766_v32  ;;  %v2982_v28 = vld [vmem:[#allocation12 + $0x9f0] sm:$0xff] }
 0x378   :  { %6090 = vmatpush1.bf16.msra.mxu1 %v9499_v35  ;;  %v9198_v35 = vcombine.high %v2762_v31, %v2766_v32 }
 0x379   :  { %6133 = vmatpush1.bf16.msra.mxu0 %v9117_v36  ;;  %6091 = vmatprep.subr.bf16.mxu1 %v9492_v37  ;;  %v3137_v36 = vld [vmem:[#allocation12 + $0xec8] sm:$0xff] }
 0x37a   :  { %6134 = vmatprep.subr.bf16.mxu0 %v9110_v39  ;;  %v3141_v37 = vld [vmem:[#allocation12 + $0xee8] sm:$0xff]  ;;  %v2754_v39 = vld [vmem:[#allocation12 + $0x2d0] sm:$0xff] }
 0x37b   :  { %v9572_v43 = vcombine.high %v3137_v36, %v3141_v37  ;;  %v9571_v0 = vcombine.low %v3137_v36, %v3141_v37  ;;  %v9189_v1 = vcombine.low %v2754_v39, %v2758_v40  ;;  %v2970_v36 = vld [vmem:[#allocation12 + $0x990] sm:$0xff] }
 0x37c   :  { %6092 = vmatpush1.bf16.msra.mxu1 %v9491_v45  ;;  %v9190_v45 = vcombine.high %v2754_v39, %v2758_v40  ;;  %v2974_v37 = vld [vmem:[#allocation12 + $0x9b0] sm:$0xff]  ;;  %v11018_v39 = vpop.f32.mrf.mxu0 }
 0x37d   :  { %6135 = vmatpush1.bf16.msra.mxu0 %v9109_v51  ;;  %6093 = vmatprep.subr.bf16.mxu1 %v9484_v57  ;;  %v3129_v51 = vld [vmem:[#allocation12 + $0xe88] sm:$0xff] }
 0x37e   :  { %6136 = vmatprep.subr.bf16.mxu0 %v9102_v62  ;;  %v3133_v57 = vld [vmem:[#allocation12 + $0xea8] sm:$0xff]  ;;  %v2746_v62 = vld [vmem:[#allocation12 + $0x290] sm:$0xff] }
 0x37f   :  { %v9564_v53 = vcombine.high %v3129_v51, %v3133_v57  ;;  %v9563_v24 = vcombine.low %v3129_v51, %v3133_v57  ;;  %v9181_v8 = vcombine.low %v2746_v62, %v2750_v63  ;;  %v9406_v51 = vcombine.high %v2970_v36, %v2974_v37  ;;  %v2962_v57 = vld [vmem:[#allocation12 + $0x950] sm:$0xff] }
 0x380   :  { %6094 = vmatpush1.bf16.msra.mxu1 %v9483_v54  ;;  %v9182_v54 = vcombine.high %v2746_v62, %v2750_v63  ;;  %v2966_v62 = vld [vmem:[#allocation12 + $0x970] sm:$0xff] }
 0x381   :  { %6137 = vmatpush1.bf16.msra.mxu0 %v9101_v3  ;;  %6095 = vmatprep.subr.bf16.mxu1 %v9604_v4  ;;  %v3121_v3 = vld [vmem:[#allocation12 + $0xe48] sm:$0xff] }
 0x382   :  { %6138 = vmatprep.subr.bf16.mxu0 %v9222_v58  ;;  %v3125_v4 = vld [vmem:[#allocation12 + $0xe68] sm:$0xff]  ;;  %v2738_v58 = vld [vmem:[#allocation12 + $0x250] sm:$0xff] }
 0x383   :  { %v9556_v17 = vcombine.high %v3121_v3, %v3125_v4  ;;  %v9555_v15 = vcombine.low %v3121_v3, %v3125_v4  ;;  %v9173_v16 = vcombine.low %v2738_v58, %v2742_v9  ;;  %v9398_v3 = vcombine.high %v2962_v57, %v2966_v62  ;;  %v2826_v4 = vld [vmem:[#allocation12 + $0x510] sm:$0xff] }
 0x384   :  { %6096 = vmatpush2.bf16.msra.mxu1 %v9603_v10  ;;  %v9174_v10 = vcombine.high %v2738_v58, %v2742_v9  ;;  %v2830_v58 = vld [vmem:[#allocation12 + $0x530] sm:$0xff] }
 0x385   :  { %6139 = vmatpush2.bf16.msra.mxu0 %v9221_v59  ;;  %6097 = vmatprep.subr.bf16.mxu1 %v9596_v11  ;;  %v3113_v59 = vld [vmem:[#allocation12 + $0xe08] sm:$0xff] }
 0x386   :  { %6140 = vmatprep.subr.bf16.mxu0 %v9214_v7  ;;  %v3117_v11 = vld [vmem:[#allocation12 + $0xe28] sm:$0xff]  ;;  %v2730_v7 = vld [vmem:[#allocation12 + $0x210] sm:$0xff] }
 0x387   :  { %v9548_v60 = vcombine.high %v3113_v59, %v3117_v11  ;;  %v9547_v29 = vcombine.low %v3113_v59, %v3117_v11  ;;  %v9165_v31 = vcombine.low %v2730_v7, %v2734_v13  ;;  %v9262_v59 = vcombine.high %v2826_v4, %v2830_v58 }
 0x388   :  { %6098 = vmatpush2.bf16.msra.mxu1 %v9595_v25  ;;  %v9166_v25 = vcombine.high %v2730_v7, %v2734_v13  ;;  %v2818_v7 = vld [vmem:[#allocation12 + $0x4d0] sm:$0xff] }
 0x389   :  { %6141 = vmatpush2.bf16.msra.mxu0 %v9213_v26  ;;  %6099 = vmatprep.subr.bf16.mxu1 %v9588_v27  ;;  %v2850_v26 = vld [vmem:[#allocation12 + $0x5d0] sm:$0xff] }
 0x38a   :  { %6142 = vmatprep.subr.bf16.mxu0 %v9206_v23  ;;  %v2854_v27 = vld [vmem:[#allocation12 + $0x5f0] sm:$0xff] }
 0x38b   :  { %v2978_v23 = vld [vmem:[#allocation12 + $0x9d0] sm:$0xff]  ;;  %v9286_v32 = vcombine.high %v2850_v26, %v2854_v27 }
 0x38c   :  { %6100 = vmatpush2.bf16.msra.mxu1 %v9587_v33  ;;  %v9414_v33 = vcombine.high %v2978_v23, %v2982_v28  ;;  %v9413_v40 = vcombine.low %v2978_v23, %v2982_v28  ;;  %v2822_v13 = vld [vmem:[#allocation12 + $0x4f0] sm:$0xff] }
 0x38d   :  { %6143 = vmatpush2.bf16.msra.mxu0 %v9205_v50  ;;  %6101 = vmatprep.subr.bf16.mxu1 %v9580_v34  ;;  %v2842_v50 = vld [vmem:[#allocation12 + $0x590] sm:$0xff] }
 0x38e   :  { %6144 = vmatprep.subr.bf16.mxu0 %v9198_v35  ;;  %v2846_v34 = vld [vmem:[#allocation12 + $0x5b0] sm:$0xff]  ;;  %v9285_v35 = vcombine.low %v2850_v26, %v2854_v27  ;;  %v9254_v26 = vcombine.high %v2818_v7, %v2822_v13 }
 0x38f   :  { %v2810_v27 = vld [vmem:[#allocation12 + $0x490] sm:$0xff] }
 0x390   :  { %6102 = vmatpush2.bf16.msra.mxu1 %v9579_v41  ;;  %v9278_v41 = vcombine.high %v2842_v50, %v2846_v34  ;;  %v2814_v23 = vld [vmem:[#allocation12 + $0x4b0] sm:$0xff] }
 0x391   :  { %6145 = vmatpush2.bf16.msra.mxu0 %v9197_v42  ;;  %6103 = vmatprep.subr.bf16.mxu1 %v9572_v43  ;;  %v2834_v42 = vld [vmem:[#allocation12 + $0x550] sm:$0xff] }
 0x392   :  { %6146 = vmatprep.subr.bf16.mxu0 %v9190_v45  ;;  %v2838_v43 = vld [vmem:[#allocation12 + $0x570] sm:$0xff] }
 0x393   :  { %v2938_v28 = vld [vmem:[#allocation12 + $0x890] sm:$0xff] }
 0x394   :  { %6104 = vmatpush2.bf16.msra.mxu1 %v9571_v0  ;;  %v9277_v0 = vcombine.low %v2842_v50, %v2846_v34  ;;  %v2802_v34 = vld [vmem:[#allocation12 + $0x450] sm:$0xff] }
 0x395   :  { %6147 = vmatpush2.bf16.msra.mxu0 %v9189_v1  ;;  %6105 = vmatprep.subr.bf16.mxu1 %v9564_v53  ;;  %v9405_v53 = vcombine.low %v2970_v36, %v2974_v37  ;;  %v2930_v36 = vld [vmem:[#allocation12 + $0x850] sm:$0xff] }
 0x396   :  { %6148 = vmatprep.subr.bf16.mxu0 %v9182_v54  ;;  %v9270_v54 = vcombine.high %v2834_v42, %v2838_v43  ;;  %v2934_v37 = vld [vmem:[#allocation12 + $0x870] sm:$0xff] }
 0x398   :  { %6106 = vmatpush2.bf16.msra.mxu1 %v9563_v24  ;;  %v2954_v24 = vld [vmem:[#allocation12 + $0x910] sm:$0xff] }
 0x399   :  { %6149 = vmatpush2.bf16.msra.mxu0 %v9181_v8  ;;  %6107 = vmatprep.subr.bf16.mxu1 %v9556_v17  ;;  %v9269_v17 = vcombine.low %v2834_v42, %v2838_v43  ;;  %v9366_v43 = vcombine.high %v2930_v36, %v2934_v37 }
 0x39a   :  { %6150 = vmatprep.subr.bf16.mxu0 %v9174_v10  ;;  %v9397_v10 = vcombine.low %v2962_v57, %v2966_v62  ;;  %v2922_v57 = vld [vmem:[#allocation12 + $0x810] sm:$0xff] }
 0x39b   :  { %v2926_v62 = vld [vmem:[#allocation12 + $0x830] sm:$0xff] }
 0x39c   :  { %6108 = vmatpush2.bf16.msra.mxu1 %v9555_v15  ;;  %v2946_v15 = vld [vmem:[#allocation12 + $0x8d0] sm:$0xff] }
 0x39d   :  { %6151 = vmatpush2.bf16.msra.mxu0 %v9173_v16  ;;  %6109 = vmatprep.subr.bf16.mxu1 %v9548_v60  ;;  %v2950_v16 = vld [vmem:[#allocation12 + $0x8f0] sm:$0xff]  ;;  %v9261_v60 = vcombine.low %v2826_v4, %v2830_v58 }
 0x39e   :  { %6152 = vmatprep.subr.bf16.mxu0 %v9166_v25  ;;  %v2914_v4 = vld [vmem:[#allocation12 + $0x7d0] sm:$0xff] }
 0x39f   :  { %v2918_v58 = vld [vmem:[#allocation12 + $0x7f0] sm:$0xff] }
 0x3a0   :  { %6110 = vmatpush2.bf16.msra.mxu1 %v9547_v29  ;;  %v2942_v29 = vld [vmem:[#allocation12 + $0x8b0] sm:$0xff] }
 0x3a1   :  { %6153 = vmatpush2.bf16.msra.mxu0 %v9165_v31  ;;  %6165 = vmatprep.subr.bf16.mxu1 %v9286_v32  ;;  %v9253_v31 = vcombine.low %v2818_v7, %v2822_v13  ;;  %v9381_v32 = vcombine.low %v2946_v15, %v2950_v16  ;;  %v9374_v50 = vcombine.high %v2938_v28, %v2942_v29  ;;  %v2910_v7 = vld [vmem:[#allocation12 + $0x7b0] sm:$0xff] }
 0x3a2   :  { %6208 = vmatprep.subr.bf16.mxu0 %v9414_v33  ;;  %v9246_v33 = vcombine.high %v2810_v27, %v2814_v23  ;;  %v3034_v13 = vld [vmem:[#allocation12 + $0xb90] sm:$0xff] }
 0x3a3   :  { %6112 = vmatmul.mubr.bf16.vlgmr.msra.gmra.mxu1 %v10995_v46  ;;  %v5898_v45 = vpop.f32.mrf.mxu0 }
 0x3a4   :  { %6155 = vmatmul.mubr.bf16.vlgmr.msra.gmra.mxu0 %v10941_v30  ;;  %v11023_v63 = vadd.f32 %v5898_v45, %v11010_v48  ;;  %6166 = vmatpush1.bf16.msra.mxu1 %v9285_v35  ;;  %v2958_v48 = vld [vmem:[#allocation12 + $0x930] sm:$0xff] }
 0x3a5   :  { %6197 = vmatprep.mubr.bf16.mxu1 %v10948_v12  ;;  %6209 = vmatpush1.bf16.msra.mxu0 %v9413_v40  ;;  %v11026_v1 = vpop.f32.mrf.mxu0  ;;  %v9390_v11 = vcombine.high %v2954_v24, %v2958_v48  ;;  %v9389_v25 = vcombine.low %v2954_v24, %v2958_v48  ;;  %v2806_v35 = vld [vmem:[#allocation12 + $0x470] sm:$0xff]  ;;  %v9245_v40 = vcombine.low %v2810_v27, %v2814_v23 }
 0x3a6   :  { %6240 = vmatprep.mubr.bf16.mxu0 %v10978_v49  ;;  %6167 = vmatprep.subr.bf16.mxu1 %v9278_v41  ;;  %v9373_v41 = vcombine.low %v2938_v28, %v2942_v29  ;;  %v9238_v42 = vcombine.high %v2802_v34, %v2806_v35  ;;  %v2794_v45 = vld [vmem:[#allocation12 + $0x410] sm:$0xff] }
 0x3a7   :  { %6210 = vmatprep.subr.bf16.mxu0 %v9406_v51  ;;  %v5902_v9 = vpop.f32.mrf.mxu0  ;;  %v2798_v51 = vld [vmem:[#allocation12 + $0x430] sm:$0xff] }
 0x3a8   :  { %v11030_v8 = vadd.f32 %v5902_v9, %v11016_v6  ;;  %6168 = vmatpush1.bf16.msra.mxu1 %v9277_v0  ;;  %v9382_v6 = vcombine.high %v2946_v15, %v2950_v16  ;;  %v9237_v0 = vcombine.low %v2802_v34, %v2806_v35  ;;  %v3042_v9 = vld [vmem:[#allocation12 + $0xbd0] sm:$0xff]  ;;  %v9229_v48 = vcombine.low %v2794_v45, %v2798_v51 }
 0x3a9   :  { %6211 = vmatpush1.bf16.msra.mxu0 %v9405_v53  ;;  %6169 = vmatprep.subr.bf16.mxu1 %v9270_v54  ;;  %v9365_v53 = vcombine.low %v2930_v36, %v2934_v37  ;;  %v9230_v54 = vcombine.high %v2794_v45, %v2798_v51  ;;  %v3046_v24 = vld [vmem:[#allocation12 + $0xbf0] sm:$0xff]  ;;  %v9349_v16 = vcombine.low %v2914_v4, %v2918_v58 }
 0x3aa   :  { %6212 = vmatprep.subr.bf16.mxu0 %v9398_v3  ;;  %v9358_v3 = vcombine.high %v2922_v57, %v2926_v62  ;;  %v3038_v15 = vld [vmem:[#allocation12 + $0xbb0] sm:$0xff] }
 0x3ab   :  { %v2902_v27 = vld [vmem:[#allocation12 + $0x770] sm:$0xff] }
 0x3ac   :  { %6170 = vmatpush1.bf16.msra.mxu1 %v9269_v17  ;;  %v9357_v17 = vcombine.low %v2922_v57, %v2926_v62  ;;  %v3026_v23 = vld [vmem:[#allocation12 + $0xb50] sm:$0xff] }
 0x3ad   :  { %6213 = vmatpush1.bf16.msra.mxu0 %v9397_v10  ;;  %6171 = vmatprep.subr.bf16.mxu1 %v9262_v59  ;;  %v9350_v10 = vcombine.high %v2914_v4, %v2918_v58  ;;  %v9478_v59 = vcombine.high %v3042_v9, %v3046_v24  ;;  %v3030_v28 = vld [vmem:[#allocation12 + $0xb70] sm:$0xff] }
 0x3ae   :  { %6214 = vmatprep.subr.bf16.mxu0 %v9390_v11  ;;  %v2906_v11 = vld [vmem:[#allocation12 + $0x790] sm:$0xff] }
 0x3af   :  { %v9341_v29 = vcombine.low %v2906_v11, %v2910_v7  ;;  %v2894_v34 = vld [vmem:[#allocation12 + $0x730] sm:$0xff] }
 0x3b0   :  { %6172 = vmatpush1.bf16.msra.mxu1 %v9261_v60  ;;  %v9477_v60 = vcombine.low %v3042_v9, %v3046_v24  ;;  %v3018_v35 = vld [vmem:[#allocation12 + $0xb10] sm:$0xff] }
 0x3b1   :  { %6215 = vmatpush1.bf16.msra.mxu0 %v9389_v25  ;;  %6173 = vmatprep.subr.bf16.mxu1 %v9254_v26  ;;  %v9342_v25 = vcombine.high %v2906_v11, %v2910_v7  ;;  %v9470_v26 = vcombine.high %v3034_v13, %v3038_v15  ;;  %v3022_v36 = vld [vmem:[#allocation12 + $0xb30] sm:$0xff] }
 0x3b2   :  { %6216 = vmatprep.subr.bf16.mxu0 %v9382_v6  ;;  %v2898_v6 = vld [vmem:[#allocation12 + $0x750] sm:$0xff] }
 0x3b3   :  { %v9333_v37 = vcombine.low %v2898_v6, %v2902_v27  ;;  %v2886_v45 = vld [vmem:[#allocation12 + $0x6f0] sm:$0xff] }
 0x3b4   :  { %6174 = vmatpush1.bf16.msra.mxu1 %v9253_v31  ;;  %v9469_v31 = vcombine.low %v3034_v13, %v3038_v15  ;;  %v3010_v51 = vld [vmem:[#allocation12 + $0xad0] sm:$0xff] }
 0x3b5   :  { %6217 = vmatpush1.bf16.msra.mxu0 %v9381_v32  ;;  %6175 = vmatprep.subr.bf16.mxu1 %v9246_v33  ;;  %v9334_v32 = vcombine.high %v2898_v6, %v2902_v27  ;;  %v9462_v33 = vcombine.high %v3026_v23, %v3030_v28  ;;  %v3014_v57 = vld [vmem:[#allocation12 + $0xaf0] sm:$0xff] }
 0x3b6   :  { %6218 = vmatprep.subr.bf16.mxu0 %v9374_v50  ;;  %v2890_v50 = vld [vmem:[#allocation12 + $0x710] sm:$0xff] }
 0x3b7   :  { %v9325_v62 = vcombine.low %v2890_v50, %v2894_v34  ;;  %v2878_v4 = vld [vmem:[#allocation12 + $0x6b0] sm:$0xff] }
 0x3b8   :  { %6176 = vmatpush1.bf16.msra.mxu1 %v9245_v40  ;;  %v9461_v40 = vcombine.low %v3026_v23, %v3030_v28  ;;  %v3002_v58 = vld [vmem:[#allocation12 + $0xa90] sm:$0xff] }
 0x3b9   :  { %6219 = vmatpush1.bf16.msra.mxu0 %v9373_v41  ;;  %6177 = vmatprep.subr.bf16.mxu1 %v9238_v42  ;;  %v9326_v41 = vcombine.high %v2890_v50, %v2894_v34  ;;  %v9454_v42 = vcombine.high %v3018_v35, %v3022_v36  ;;  %v3006_v9 = vld [vmem:[#allocation12 + $0xab0] sm:$0xff]  ;;  %v2723_v34 = vld [vmem:[#allocation12 + $0x1d8] sm:$0xff] }
 0x3ba   :  { %6220 = vmatprep.subr.bf16.mxu0 %v9366_v43  ;;  %v2882_v43 = vld [vmem:[#allocation12 + $0x6d0] sm:$0xff] }
 0x3bb   :  { %v9317_v24 = vcombine.low %v2882_v43, %v2886_v45  ;;  %v2870_v11 = vld [vmem:[#allocation12 + $0x670] sm:$0xff] }
 0x3bc   :  { %6178 = vmatpush1.bf16.msra.mxu1 %v9237_v0  ;;  %v9453_v0 = vcombine.low %v3018_v35, %v3022_v36  ;;  %v2994_v7 = vld [vmem:[#allocation12 + $0xa50] sm:$0xff]  ;;  %v2727_v35 = vld [vmem:[#allocation12 + $0x1f8] sm:$0xff] }
 0x3bd   :  { %6221 = vmatpush1.bf16.msra.mxu0 %v9365_v53  ;;  %6179 = vmatprep.subr.bf16.mxu1 %v9230_v54  ;;  %v9318_v53 = vcombine.high %v2882_v43, %v2886_v45  ;;  %v9446_v54 = vcombine.high %v3010_v51, %v3014_v57  ;;  %v2998_v13 = vld [vmem:[#allocation12 + $0xa70] sm:$0xff] }
 0x3be   :  { %6222 = vmatprep.subr.bf16.mxu0 %v9358_v3  ;;  %v2874_v3 = vld [vmem:[#allocation12 + $0x690] sm:$0xff] }
 0x3bf   :  { %v9309_v15 = vcombine.low %v2874_v3, %v2878_v4  ;;  %v2862_v6 = vld [vmem:[#allocation12 + $0x630] sm:$0xff] }
 0x3c0   :  { %6180 = vmatpush1.bf16.msra.mxu1 %v9229_v48  ;;  %v9445_v48 = vcombine.low %v3010_v51, %v3014_v57  ;;  %v2986_v27 = vld [vmem:[#allocation12 + $0xa10] sm:$0xff]  ;;  %v2715_v51 = vld [vmem:[#allocation12 + $0x198] sm:$0xff] }
 0x3c1   :  { %6223 = vmatpush1.bf16.msra.mxu0 %v9357_v17  ;;  %6181 = vmatprep.subr.bf16.mxu1 %v9350_v10  ;;  %v9310_v17 = vcombine.high %v2874_v3, %v2878_v4  ;;  %v9438_v10 = vcombine.high %v3002_v58, %v3006_v9  ;;  %v2990_v23 = vld [vmem:[#allocation12 + $0xa30] sm:$0xff]  ;;  %v2719_v57 = vld [vmem:[#allocation12 + $0x1b8] sm:$0xff] }
 0x3c2   :  { %6224 = vmatprep.subr.bf16.mxu0 %v9478_v59  ;;  %v2866_v59 = vld [vmem:[#allocation12 + $0x650] sm:$0xff] }
 0x3c3   :  { %v9301_v28 = vcombine.low %v2866_v59, %v2870_v11  ;;  %v3110_v50 = vld [vmem:[#allocation12 + $0xdf0] sm:$0xff] }
 0x3c4   :  { %6182 = vmatpush2.bf16.msra.mxu1 %v9349_v16  ;;  %v9437_v16 = vcombine.low %v3002_v58, %v3006_v9  ;;  %v3102_v43 = vld [vmem:[#allocation12 + $0xdb0] sm:$0xff]  ;;  %v9152_v58 = vcombine.high %v2715_v51, %v2719_v57  ;;  %v2707_v9 = vld [vmem:[#allocation12 + $0x158] sm:$0xff] }
 0x3c5   :  { %6225 = vmatpush2.bf16.msra.mxu0 %v9477_v60  ;;  %6183 = vmatprep.subr.bf16.mxu1 %v9342_v25  ;;  %v9302_v60 = vcombine.high %v2866_v59, %v2870_v11  ;;  %v9430_v25 = vcombine.high %v2994_v7, %v2998_v13  ;;  %v3094_v3 = vld [vmem:[#allocation12 + $0xd70] sm:$0xff]  ;;  %v9151_v59 = vcombine.low %v2715_v51, %v2719_v57 }
 0x3c6   :  { %6226 = vmatprep.subr.bf16.mxu0 %v9470_v26  ;;  %v2858_v26 = vld [vmem:[#allocation12 + $0x610] sm:$0xff] }
 0x3c7   :  { %v9293_v36 = vcombine.low %v2858_v26, %v2862_v6 }
 0x3c8   :  { %6184 = vmatpush2.bf16.msra.mxu1 %v9341_v29  ;;  %v9429_v29 = vcombine.low %v2994_v7, %v2998_v13  ;;  %v3082_v13 = vld [vmem:[#allocation12 + $0xd10] sm:$0xff] }
 0x3c9   :  { %6227 = vmatpush2.bf16.msra.mxu0 %v9469_v31  ;;  %6185 = vmatprep.subr.bf16.mxu1 %v9334_v32  ;;  %v9294_v31 = vcombine.high %v2858_v26, %v2862_v6  ;;  %v9422_v32 = vcombine.high %v2986_v27, %v2990_v23 }
 0x3ca   :  { %6228 = vmatprep.subr.bf16.mxu0 %v9462_v33  ;;  %v3106_v33 = vld [vmem:[#allocation12 + $0xdd0] sm:$0xff] }
 0x3cb   :  { %v9541_v45 = vcombine.low %v3106_v33, %v3110_v50 }
 0x3cc   :  { %6186 = vmatpush2.bf16.msra.mxu1 %v9333_v37  ;;  %v9421_v37 = vcombine.low %v2986_v27, %v2990_v23 }
 0x3cd   :  { %6229 = vmatpush2.bf16.msra.mxu0 %v9461_v40  ;;  %6187 = vmatprep.subr.bf16.mxu1 %v9326_v41  ;;  %v9542_v40 = vcombine.high %v3106_v33, %v3110_v50  ;;  %v9160_v41 = vcombine.high %v2723_v34, %v2727_v35  ;;  %v2695_v33 = vld [vmem:[#allocation12 + $0xf8] sm:$0xff] }
 0x3ce   :  { %6230 = vmatprep.subr.bf16.mxu0 %v9454_v42  ;;  %v3098_v42 = vld [vmem:[#allocation12 + $0xd90] sm:$0xff] }
 0x3d0   :  { %6188 = vmatpush2.bf16.msra.mxu1 %v9325_v62  ;;  %v11032_v62 = vpop.f32.mrf.mxu1 }
 0x3d1   :  { %6231 = vmatpush2.bf16.msra.mxu0 %v9453_v0  ;;  %6189 = vmatprep.subr.bf16.mxu1 %v9318_v53  ;;  %v9159_v0 = vcombine.low %v2723_v34, %v2727_v35  ;;  %v9534_v53 = vcombine.high %v3098_v42, %v3102_v43 }
 0x3d2   :  { %6232 = vmatprep.subr.bf16.mxu0 %v9446_v54  ;;  %v3090_v54 = vld [vmem:[#allocation12 + $0xd50] sm:$0xff] }
 0x3d3   :  { %v9526_v11 = vcombine.high %v3090_v54, %v3094_v3  ;;  %v9525_v26 = vcombine.low %v3090_v54, %v3094_v3  ;;  %v2675_v54 = vld [vmem:[#allocation12 + $0x58] sm:$0xff] }
 0x3d4   :  { %6190 = vmatpush2.bf16.msra.mxu1 %v9317_v24  ;;  %v2711_v24 = vld [vmem:[#allocation12 + $0x178] sm:$0xff] }
 0x3d5   :  { %6233 = vmatpush2.bf16.msra.mxu0 %v9445_v48  ;;  %6191 = vmatprep.subr.bf16.mxu1 %v9310_v17  ;;  %v9533_v17 = vcombine.low %v3098_v42, %v3102_v43  ;;  %v9144_v7 = vcombine.high %v2707_v9, %v2711_v24  ;;  %v9143_v6 = vcombine.low %v2707_v9, %v2711_v24  ;;  %v2687_v42 = vld [vmem:[#allocation12 + $0xb8] sm:$0xff] }
 0x3d6   :  { %6234 = vmatprep.subr.bf16.mxu0 %v9438_v10  ;;  %v2679_v3 = vld [vmem:[#allocation12 + $0x78] sm:$0xff] }
 0x3d7   :  { %v9112_v24 = vcombine.high %v2675_v54, %v2679_v3 }
 0x3d8   :  { %6192 = vmatpush2.bf16.msra.mxu1 %v9309_v15  ;;  %v3086_v15 = vld [vmem:[#allocation12 + $0xd30] sm:$0xff] }
 0x3d9   :  { %6235 = vmatpush2.bf16.msra.mxu0 %v9437_v16  ;;  %6193 = vmatprep.subr.bf16.mxu1 %v9302_v60  ;;  %v2699_v60 = vld [vmem:[#allocation12 + $0x118] sm:$0xff]  ;;  %v9518_v27 = vcombine.high %v3082_v13, %v3086_v15  ;;  %v9517_v34 = vcombine.low %v3082_v13, %v3086_v15  ;;  %v9111_v13 = vcombine.low %v2675_v54, %v2679_v3 }
 0x3da   :  { %6236 = vmatprep.subr.bf16.mxu0 %v9430_v25  ;;  %v2703_v25 = vld [vmem:[#allocation12 + $0x138] sm:$0xff] }
 0x3db   :  { %v2767_v54 = vld [vmem:[#allocation12 + $0x338] sm:$0xff] }
 0x3dc   :  { %6194 = vmatpush2.bf16.msra.mxu1 %v9301_v28 }
 0x3dd   :  { %6237 = vmatpush2.bf16.msra.mxu0 %v9429_v29  ;;  %6195 = vmatprep.subr.bf16.mxu1 %v9294_v31  ;;  %v3074_v29 = vld [vmem:[#allocation12 + $0xcd0] sm:$0xff] }
 0x3de   :  { %6238 = vmatprep.subr.bf16.mxu0 %v9422_v32  ;;  %v3078_v31 = vld [vmem:[#allocation12 + $0xcf0] sm:$0xff]  ;;  %v2691_v32 = vld [vmem:[#allocation12 + $0xd8] sm:$0xff] }
 0x3df   :  { %v9510_v35 = vcombine.high %v3074_v29, %v3078_v31  ;;  %v9509_v43 = vcombine.low %v3074_v29, %v3078_v31  ;;  %v3166_v29 = vld [vmem:[#allocation12 + $0xfb0] sm:$0xff]  ;;  %v2779_v31 = vld [vmem:[#allocation12 + $0x398] sm:$0xff] }
 0x3e0   :  { %6196 = vmatpush2.bf16.msra.mxu1 %v9293_v36  ;;  %v9128_v36 = vcombine.high %v2691_v32, %v2695_v33 }
 0x3e1   :  { %6239 = vmatpush2.bf16.msra.mxu0 %v9421_v37  ;;  %6251 = vmatprep.subr.bf16.mxu1 %v9542_v40  ;;  %v3066_v37 = vld [vmem:[#allocation12 + $0xc90] sm:$0xff] }
 0x3e2   :  { %6294 = vmatprep.subr.bf16.mxu0 %v9160_v41  ;;  %v3070_v40 = vld [vmem:[#allocation12 + $0xcb0] sm:$0xff]  ;;  %v2683_v41 = vld [vmem:[#allocation12 + $0x98] sm:$0xff] }
 0x3e3   :  { %6198 = vmatmul.mubr.bf16.vlgmr.msra.gmra.mxu1 %v10952_v14  ;;  %v5941_v4 = vpop.f32.mrf.mxu1  ;;  %v9502_v51 = vcombine.high %v3066_v37, %v3070_v40  ;;  %v9120_v57 = vcombine.high %v2683_v41, %v2687_v42 }
 0x3e4   :  { %6241 = vmatmul.mubr.bf16.vlgmr.msra.gmra.mxu0 %v10982_v52  ;;  %v5942_v48 = vadd.f32 %v5941_v4, %v11023_v63  ;;  %6252 = vmatpush1.bf16.msra.mxu1 %v9541_v45  ;;  %v9127_v45 = vcombine.low %v2691_v32, %v2695_v33  ;;  %v9501_v4 = vcombine.low %v3066_v37, %v3070_v40  ;;  %v2783_v32 = vld [vmem:[#allocation12 + $0x3b8] sm:$0xff]  ;;  %v3158_v37 = vld [vmem:[#allocation12 + $0xf70] sm:$0xff] }
 0x3e5   :  { %6283 = vmatprep.mubr.bf16.mxu1 %v10993_v44  ;;  %6295 = vmatpush1.bf16.msra.mxu0 %v9159_v0  ;;  %v11038_v10 = vpop.f32.mrf.mxu1  ;;  %v3058_v0 = vld [vmem:[#allocation12 + $0xc50] sm:$0xff]  ;;  %v2771_v40 = vld [vmem:[#allocation12 + $0x358] sm:$0xff] }
 0x3e6   :  { %6326 = vmatprep.mubr.bf16.mxu0 %v10926_v38  ;;  %6253 = vmatprep.subr.bf16.mxu1 %v9534_v53  ;;  %v6466_v23 = vmax.f32 %v5942_v48, 0.0  ;;  %v9136_v38 = vcombine.high %v2699_v60, %v2703_v25  ;;  %v3062_v53 = vld [vmem:[#allocation12 + $0xc70] sm:$0xff] }
 0x3e7   :  { %6296 = vmatprep.subr.bf16.mxu0 %v9152_v58  ;;  %v5945_v16 = vpop.f32.mrf.mxu1  ;;  %v9119_v58 = vcombine.low %v2683_v41, %v2687_v42  ;;  %v9494_v9 = vcombine.high %v3058_v0, %v3062_v53  ;;  %v3050_v48 = vld [vmem:[#allocation12 + $0xc10] sm:$0xff]  ;;  %v2775_v41 = vld [vmem:[#allocation12 + $0x378] sm:$0xff] }
 0x3e8   :  { %v5946_v63 = vadd.f32 %v5945_v16, %v11030_v8  ;;  %6254 = vmatpush1.bf16.msra.mxu1 %v9533_v17  ;;  %v9135_v8 = vcombine.low %v2699_v60, %v2703_v25  ;;  %v3054_v17 = vld [vmem:[#allocation12 + $0xc30] sm:$0xff] }
 0x3e9   :  { %6297 = vmatpush1.bf16.msra.mxu0 %v9151_v59  ;;  %6255 = vmatprep.subr.bf16.mxu1 %v9526_v11  ;;  %v2667_v59 = vld [vmem:[#allocation12 + $0x18] sm:$0xff]  ;;  %v9486_v15 = vcombine.high %v3050_v48, %v3054_v17  ;;  %v3170_v60 = vld [vmem:[#allocation12 + $0xfd0] sm:$0xff] }
 0x3ea   :  { %v6474_v28 = vmax.f32 %v5946_v63, 0.0  ;;  %6298 = vmatprep.subr.bf16.mxu0 %v9144_v7  ;;  %v2671_v11 = vld [vmem:[#allocation12 + $0x38] sm:$0xff]  ;;  %v9493_v7 = vcombine.low %v3058_v0, %v3062_v53  ;;  %v3174_v25 = vld [vmem:[#allocation12 + $0xff0] sm:$0xff] }
 0x3eb   :  { %v9104_v16 = vcombine.high %v2667_v59, %v2671_v11  ;;  %v2787_v63 = vld [vmem:[#allocation12 + $0x3d8] sm:$0xff]  ;;  %v9605_v33 = vcombine.low %v3170_v60, %v3174_v25  ;;  %v3150_v0 = vld [vmem:[#allocation12 + $0xf30] sm:$0xff] }
 0x3ec   :  { %v11042_v50 = vpack.c.bf16 %v6474_v28, %v6466_v23  ;;  %6256 = vmatpush1.bf16.msra.mxu1 %v9525_v26  ;;  %v2791_v26 = vld [vmem:[#allocation12 + $0x3f8] sm:$0xff]  ;;  %v9606_v23 = vcombine.high %v3170_v60, %v3174_v25  ;;  %v3134_v60 = vld [vmem:[#allocation12 + $0xeb0] sm:$0xff] }
 0x3ed   :  { %6299 = vmatpush1.bf16.msra.mxu0 %v9143_v6  ;;  %6257 = vmatprep.subr.bf16.mxu1 %v9518_v27  ;;  %v9485_v6 = vcombine.low %v3050_v48, %v3054_v17  ;;  %v9103_v27 = vcombine.low %v2667_v59, %v2671_v11  ;;  %v9224_v28 = vcombine.high %v2787_v63, %v2791_v26  ;;  %v2763_v53 = vld [vmem:[#allocation12 + $0x318] sm:$0xff]  ;;  %v3142_v48 = vld [vmem:[#allocation12 + $0xef0] sm:$0xff] }
 0x3ee   :  { %6300 = vmatprep.subr.bf16.mxu0 %v9136_v38  ;;  %v3162_v38 = vld [vmem:[#allocation12 + $0xf90] sm:$0xff]  ;;  %v2755_v17 = vld [vmem:[#allocation12 + $0x2d8] sm:$0xff] }
 0x3ef   :  { %v9597_v42 = vcombine.low %v3162_v38, %v3166_v29  ;;  %v2759_v59 = vld [vmem:[#allocation12 + $0x2f8] sm:$0xff] }
 0x3f0   :  { %6258 = vmatpush1.bf16.msra.mxu1 %v9517_v34  ;;  %v9223_v34 = vcombine.low %v2787_v63, %v2791_v26  ;;  %v2747_v25 = vld [vmem:[#allocation12 + $0x298] sm:$0xff] }
 0x3f1   :  { %6301 = vmatpush1.bf16.msra.mxu0 %v9135_v8  ;;  %6259 = vmatprep.subr.bf16.mxu1 %v9510_v35  ;;  %v9598_v8 = vcombine.high %v3162_v38, %v3166_v29  ;;  %v9216_v35 = vcombine.high %v2779_v31, %v2783_v32  ;;  %v2751_v63 = vld [vmem:[#allocation12 + $0x2b8] sm:$0xff]  ;;  %v3126_v38 = vld [vmem:[#allocation12 + $0xe70] sm:$0xff]  ;;  %v11044_v29 = vpop.f32.mrf.mxu0 }
 0x3f2   :  { %6302 = vmatprep.subr.bf16.mxu0 %v9128_v36  ;;  %v3154_v36 = vld [vmem:[#allocation12 + $0xf50] sm:$0xff] }
 0x3f3   :  { %v9589_v3 = vcombine.low %v3154_v36, %v3158_v37 }
 0x3f4   :  { %6260 = vmatpush1.bf16.msra.mxu1 %v9509_v43  ;;  %v9215_v43 = vcombine.low %v2779_v31, %v2783_v32  ;;  %v2739_v31 = vld [vmem:[#allocation12 + $0x258] sm:$0xff] }
 0x3f5   :  { %6303 = vmatpush1.bf16.msra.mxu0 %v9127_v45  ;;  %6261 = vmatprep.subr.bf16.mxu1 %v9502_v51  ;;  %v9590_v45 = vcombine.high %v3154_v36, %v3158_v37  ;;  %v9208_v51 = vcombine.high %v2771_v40, %v2775_v41  ;;  %v2743_v32 = vld [vmem:[#allocation12 + $0x278] sm:$0xff]  ;;  %v3114_v37 = vld [vmem:[#allocation12 + $0xe10] sm:$0xff] }
 0x3f6   :  { %6304 = vmatprep.subr.bf16.mxu0 %v9120_v57  ;;  %v3146_v57 = vld [vmem:[#allocation12 + $0xf10] sm:$0xff]  ;;  %v9176_v36 = vcombine.high %v2739_v31, %v2743_v32 }
 0x3f7   :  { %v9581_v11 = vcombine.low %v3146_v57, %v3150_v0 }
 0x3f8   :  { %6262 = vmatpush1.bf16.msra.mxu1 %v9501_v4  ;;  %v9207_v4 = vcombine.low %v2771_v40, %v2775_v41  ;;  %v3118_v40 = vld [vmem:[#allocation12 + $0xe30] sm:$0xff]  ;;  %v2731_v41 = vld [vmem:[#allocation12 + $0x218] sm:$0xff] }
 0x3f9   :  { %6305 = vmatpush1.bf16.msra.mxu0 %v9119_v58  ;;  %6263 = vmatprep.subr.bf16.mxu1 %v9494_v9  ;;  %v9582_v58 = vcombine.high %v3146_v57, %v3150_v0  ;;  %v9200_v9 = vcombine.high %v2763_v53, %v2767_v54  ;;  %v9550_v57 = vcombine.high %v3114_v37, %v3118_v40 }
 0x3fa   :  { %6306 = vmatprep.subr.bf16.mxu0 %v9112_v24  ;;  %v3138_v24 = vld [vmem:[#allocation12 + $0xed0] sm:$0xff] }
 0x3fb   :  { %v9573_v26 = vcombine.low %v3138_v24, %v3142_v48 }
 0x3fc   :  { %6264 = vmatpush1.bf16.msra.mxu1 %v9493_v7  ;;  %v9199_v7 = vcombine.low %v2763_v53, %v2767_v54  ;;  %v2851_v53 = vld [vmem:[#allocation12 + $0x5d8] sm:$0xff] }
 0x3fd   :  { %6307 = vmatpush1.bf16.msra.mxu0 %v9111_v13  ;;  %6265 = vmatprep.subr.bf16.mxu1 %v9486_v15  ;;  %v9574_v13 = vcombine.high %v3138_v24, %v3142_v48  ;;  %v9192_v15 = vcombine.high %v2755_v17, %v2759_v59  ;;  %v2855_v54 = vld [vmem:[#allocation12 + $0x5f8] sm:$0xff] }
 0x3fe   :  { %6308 = vmatprep.subr.bf16.mxu0 %v9104_v16  ;;  %v3130_v16 = vld [vmem:[#allocation12 + $0xe90] sm:$0xff]  ;;  %v9288_v48 = vcombine.high %v2851_v53, %v2855_v54 }
 0x400   :  { %6266 = vmatpush1.bf16.msra.mxu1 %v9485_v6  ;;  %v9191_v6 = vcombine.low %v2755_v17, %v2759_v59  ;;  %v11048_v17 = vld [vmem:[#allocation14] sm:$0xff] }
 0x401   :  { %6309 = vmatpush1.bf16.msra.mxu0 %v9103_v27  ;;  %6267 = vmatprep.subr.bf16.mxu1 %v9606_v23  ;;  %v9566_v27 = vcombine.high %v3130_v16, %v3134_v60  ;;  %v9184_v23 = vcombine.high %v2747_v25, %v2751_v63  ;;  %v3189_v59 = vrot.slane %v11048_v17, %v10884_v22 }
 0x402   :  { %6310 = vmatprep.subr.bf16.mxu0 %v9224_v28  ;;  %v3122_v28 = vld [vmem:[#allocation12 + $0xe50] sm:$0xff] }
 0x404   :  { %6268 = vmatpush2.bf16.msra.mxu1 %v9605_v33  ;;  %v9565_v33 = vcombine.low %v3130_v16, %v3134_v60  ;;  %v2971_v16 = vld [vmem:[#allocation12 + $0x998] sm:$0xff] }
 0x405   :  { %6311 = vmatpush2.bf16.msra.mxu0 %v9223_v34  ;;  %6269 = vmatprep.subr.bf16.mxu1 %v9598_v8  ;;  %v5984_v34 = vpop.f32.mrf.mxu0  ;;  %v9183_v8 = vcombine.low %v2747_v25, %v2751_v63  ;;  %v2975_v60 = vld [vmem:[#allocation12 + $0x9b8] sm:$0xff]  ;;  %v11054_v63 = vpop.f32.mrf.mxu1 }
 0x406   :  { %6312 = vmatprep.subr.bf16.mxu0 %v9216_v35  ;;  %v9558_v35 = vcombine.high %v3122_v28, %v3126_v38 }
 0x408   :  { %6270 = vmatpush2.bf16.msra.mxu1 %v9597_v42  ;;  %v2735_v42 = vld [vmem:[#allocation12 + $0x238] sm:$0xff] }
 0x409   :  { %6313 = vmatpush2.bf16.msra.mxu0 %v9215_v43  ;;  %6271 = vmatprep.subr.bf16.mxu1 %v9590_v45  ;;  %v9557_v43 = vcombine.low %v3122_v28, %v3126_v38  ;;  %v11046_v45 = vpop.f32.mrf.mxu0  ;;  %v9168_v0 = vcombine.high %v2731_v41, %v2735_v42  ;;  %v9167_v24 = vcombine.low %v2731_v41, %v2735_v42  ;;  %v2839_v28 = vld [vmem:[#allocation12 + $0x578] sm:$0xff] }
 0x40a   :  { %6314 = vmatprep.subr.bf16.mxu0 %v9208_v51  ;;  %v9175_v51 = vcombine.low %v2739_v31, %v2743_v32  ;;  %v9408_v32 = vcombine.high %v2971_v16, %v2975_v60 }
 0x40c   :  { %6272 = vmatpush2.bf16.msra.mxu1 %v9589_v3  ;;  %v2979_v3 = vld [vmem:[#allocation12 + $0x9d8] sm:$0xff] }
 0x40d   :  { %6315 = vmatpush2.bf16.msra.mxu0 %v9207_v4  ;;  %6273 = vmatprep.subr.bf16.mxu1 %v9582_v58  ;;  %v2983_v4 = vld [vmem:[#allocation12 + $0x9f8] sm:$0xff]  ;;  %v9549_v58 = vcombine.low %v3114_v37, %v3118_v40  ;;  %v9407_v40 = vcombine.low %v2971_v16, %v2975_v60 }
 0x40e   :  { %6316 = vmatprep.subr.bf16.mxu0 %v9200_v9  ;;  %v5988_v9 = vpop.f32.mrf.mxu0 }
 0x40f   :  { %v5989_v42 = vadd.f32 %v5988_v9, %v3189_v59 }
 0x410   :  { %6274 = vmatpush2.bf16.msra.mxu1 %v9581_v11  ;;  %v9416_v11 = vcombine.high %v2979_v3, %v2983_v4  ;;  %v11052_v25 = vpop.f32.mrf.mxu0 }
 0x411   :  { %6317 = vmatpush2.bf16.msra.mxu0 %v9199_v7  ;;  %6275 = vmatprep.subr.bf16.mxu1 %v9574_v13  ;;  %v2843_v7 = vld [vmem:[#allocation12 + $0x598] sm:$0xff] }
 0x412   :  { %6318 = vmatprep.subr.bf16.mxu0 %v9192_v15  ;;  %v2847_v13 = vld [vmem:[#allocation12 + $0x5b8] sm:$0xff]  ;;  %v9287_v15 = vcombine.low %v2851_v53, %v2855_v54 }
 0x413   :  { %v2955_v53 = vld [vmem:[#allocation12 + $0x918] sm:$0xff] }
 0x414   :  { %6276 = vmatpush2.bf16.msra.mxu1 %v9573_v26  ;;  %v9415_v26 = vcombine.low %v2979_v3, %v2983_v4 }
 0x415   :  { %6319 = vmatpush2.bf16.msra.mxu0 %v9191_v6  ;;  %6277 = vmatprep.subr.bf16.mxu1 %v9566_v27  ;;  %v5985_v6 = vadd.f32 %v5984_v34, %v3189_v59  ;;  %v9280_v27 = vcombine.high %v2843_v7, %v2847_v13  ;;  %v2823_v59 = vld [vmem:[#allocation12 + $0x4f8] sm:$0xff] }
 0x416   :  { %6320 = vmatprep.subr.bf16.mxu0 %v9184_v23  ;;  %v2835_v23 = vld [vmem:[#allocation12 + $0x558] sm:$0xff] }
 0x417   :  { %v9272_v41 = vcombine.high %v2835_v23, %v2839_v28  ;;  %v9271_v3 = vcombine.low %v2835_v23, %v2839_v28  ;;  %v2943_v23 = vld [vmem:[#allocation12 + $0x8b8] sm:$0xff] }
 0x418   :  { %6278 = vmatpush2.bf16.msra.mxu1 %v9565_v33  ;;  %v2963_v33 = vld [vmem:[#allocation12 + $0x958] sm:$0xff] }
 0x419   :  { %6321 = vmatpush2.bf16.msra.mxu0 %v9183_v8  ;;  %6279 = vmatprep.subr.bf16.mxu1 %v9558_v35  ;;  %v2967_v8 = vld [vmem:[#allocation12 + $0x978] sm:$0xff] }
 0x41a   :  { %6322 = vmatprep.subr.bf16.mxu0 %v9176_v36  ;;  %v9279_v36 = vcombine.low %v2843_v7, %v2847_v13  ;;  %v2951_v7 = vld [vmem:[#allocation12 + $0x8f8] sm:$0xff] }
 0x41c   :  { %6280 = vmatpush2.bf16.msra.mxu1 %v9557_v43 }
 0x41d   :  { %6323 = vmatpush2.bf16.msra.mxu0 %v9175_v51  ;;  %6281 = vmatprep.subr.bf16.mxu1 %v9550_v57  ;;  %v9400_v51 = vcombine.high %v2963_v33, %v2967_v8  ;;  %v2827_v57 = vld [vmem:[#allocation12 + $0x518] sm:$0xff] }
 0x41e   :  { %6324 = vmatprep.subr.bf16.mxu0 %v9168_v0 }
 0x420   :  { %6282 = vmatpush2.bf16.msra.mxu1 %v9549_v58  ;;  %v9399_v58 = vcombine.low %v2963_v33, %v2967_v8  ;;  %v2803_v33 = vld [vmem:[#allocation12 + $0x458] sm:$0xff] }
 0x421   :  { %6325 = vmatpush2.bf16.msra.mxu0 %v9167_v24  ;;  %6337 = vmatprep.subr.bf16.mxu1 %v9288_v48  ;;  %v2819_v48 = vld [vmem:[#allocation12 + $0x4d8] sm:$0xff] }
 0x422   :  { %6380 = vmatprep.subr.bf16.mxu0 %v9416_v11  ;;  %v2947_v11 = vld [vmem:[#allocation12 + $0x8d8] sm:$0xff]  ;;  %v9256_v16 = vcombine.high %v2819_v48, %v2823_v59  ;;  %v9255_v28 = vcombine.low %v2819_v48, %v2823_v59 }
 0x423   :  { %v6027_v38 = vpop.f32.mrf.mxu1  ;;  %v6070_v31 = vpop.f32.mrf.mxu0  ;;  %6284 = vmatmul.mubr.bf16.vlgmr.msra.gmra.mxu1 %v10995_v46  ;;  %v9384_v60 = vcombine.high %v2947_v11, %v2951_v7  ;;  %v2807_v8 = vld [vmem:[#allocation12 + $0x478] sm:$0xff] }
 0x424   :  { %v6028_v35 = vadd.f32 %v6027_v38, %v5985_v6  ;;  %6327 = vmatmul.mubr.bf16.vlgmr.msra.gmra.mxu0 %v10941_v30  ;;  %6338 = vmatpush1.bf16.msra.mxu1 %v9287_v15  ;;  %v2831_v30 = vld [vmem:[#allocation12 + $0x538] sm:$0xff]  ;;  %v9383_v38 = vcombine.low %v2947_v11, %v2951_v7 }
 0x425   :  { %6369 = vmatprep.mubr.bf16.mxu1 %v10948_v12  ;;  %6381 = vmatpush1.bf16.msra.mxu0 %v9415_v26  ;;  %v11059_v34 = vpop.f32.mrf.mxu1  ;;  %v11061_v37 = vpop.f32.mrf.mxu0  ;;  %v2959_v12 = vld [vmem:[#allocation12 + $0x938] sm:$0xff]  ;;  %v9264_v9 = vcombine.high %v2827_v57, %v2831_v30  ;;  %v9263_v13 = vcombine.low %v2827_v57, %v2831_v30 }
 0x426   :  { %v11063_v43 = vadd.f32 %v6070_v31, %v6028_v35  ;;  %6412 = vmatprep.mubr.bf16.mxu0 %v10978_v49  ;;  %6339 = vmatprep.subr.bf16.mxu1 %v9280_v27  ;;  %v9392_v49 = vcombine.high %v2955_v53, %v2959_v12  ;;  %v9391_v15 = vcombine.low %v2955_v53, %v2959_v12  ;;  %v2811_v26 = vld [vmem:[#allocation12 + $0x498] sm:$0xff] }
 0x427   :  { %v6031_v0 = vpop.f32.mrf.mxu1  ;;  %6382 = vmatprep.subr.bf16.mxu0 %v9408_v32  ;;  %v6074_v4 = vpop.f32.mrf.mxu0  ;;  %v2815_v6 = vld [vmem:[#allocation12 + $0x4b8] sm:$0xff]  ;;  %v9239_v12 = vcombine.low %v2803_v33, %v2807_v8 }
 0x428   :  { %v6032_v54 = vadd.f32 %v6031_v0, %v5989_v42  ;;  %6340 = vmatpush1.bf16.msra.mxu1 %v9279_v36  ;;  %v2939_v27 = vld [vmem:[#allocation12 + $0x898] sm:$0xff]  ;;  %v9248_v31 = vcombine.high %v2811_v26, %v2815_v6  ;;  %v9240_v42 = vcombine.high %v2803_v33, %v2807_v8 }
 0x429   :  { %6383 = vmatpush1.bf16.msra.mxu0 %v9407_v40  ;;  %6341 = vmatprep.subr.bf16.mxu1 %v9272_v41  ;;  %v9376_v32 = vcombine.high %v2939_v27, %v2943_v23  ;;  %v2931_v35 = vld [vmem:[#allocation12 + $0x858] sm:$0xff]  ;;  %v9247_v40 = vcombine.low %v2811_v26, %v2815_v6  ;;  %v9375_v41 = vcombine.low %v2939_v27, %v2943_v23 }
 0x42a   :  { %v11066_v24 = vadd.f32 %v6074_v4, %v6032_v54  ;;  %6384 = vmatprep.subr.bf16.mxu0 %v9400_v51  ;;  %v2935_v36 = vld [vmem:[#allocation12 + $0x878] sm:$0xff] }
 0x42b   :  { %v9368_v51 = vcombine.high %v2931_v35, %v2935_v36  ;;  %v2795_v57 = vld [vmem:[#allocation12 + $0x418] sm:$0xff]  ;;  %v9367_v54 = vcombine.low %v2931_v35, %v2935_v36 }
 0x42c   :  { %6342 = vmatpush1.bf16.msra.mxu1 %v9271_v3  ;;  %v2799_v30 = vld [vmem:[#allocation12 + $0x438] sm:$0xff] }
 0x42d   :  { %6385 = vmatpush1.bf16.msra.mxu0 %v9399_v58  ;;  %6343 = vmatprep.subr.bf16.mxu1 %v9264_v9  ;;  %v2923_v0 = vld [vmem:[#allocation12 + $0x818] sm:$0xff]  ;;  %v9232_v3 = vcombine.high %v2795_v57, %v2799_v30  ;;  %v9231_v59 = vcombine.low %v2795_v57, %v2799_v30 }
 0x42e   :  { %6386 = vmatprep.subr.bf16.mxu0 %v9392_v49  ;;  %v2927_v53 = vld [vmem:[#allocation12 + $0x838] sm:$0xff] }
 0x42f   :  { %v9360_v4 = vcombine.high %v2923_v0, %v2927_v53  ;;  %v2915_v58 = vld [vmem:[#allocation12 + $0x7d8] sm:$0xff]  ;;  %v9359_v11 = vcombine.low %v2923_v0, %v2927_v53 }
 0x430   :  { %6344 = vmatpush1.bf16.msra.mxu1 %v9263_v13  ;;  %v2919_v9 = vld [vmem:[#allocation12 + $0x7f8] sm:$0xff] }
 0x431   :  { %6387 = vmatpush1.bf16.msra.mxu0 %v9391_v15  ;;  %6345 = vmatprep.subr.bf16.mxu1 %v9256_v16  ;;  %v3043_v49 = vld [vmem:[#allocation12 + $0xbd8] sm:$0xff]  ;;  %v9352_v7 = vcombine.high %v2915_v58, %v2919_v9  ;;  %v9351_v6 = vcombine.low %v2915_v58, %v2919_v9 }
 0x432   :  { %6388 = vmatprep.subr.bf16.mxu0 %v9384_v60  ;;  %v3047_v48 = vld [vmem:[#allocation12 + $0xbf8] sm:$0xff] }
 0x433   :  { %v9480_v13 = vcombine.high %v3043_v49, %v3047_v48  ;;  %v2907_v15 = vld [vmem:[#allocation12 + $0x798] sm:$0xff]  ;;  %v9479_v27 = vcombine.low %v3043_v49, %v3047_v48 }
 0x434   :  { %6346 = vmatpush1.bf16.msra.mxu1 %v9255_v28  ;;  %v2911_v16 = vld [vmem:[#allocation12 + $0x7b8] sm:$0xff] }
 0x435   :  { %6389 = vmatpush1.bf16.msra.mxu0 %v9383_v38  ;;  %6347 = vmatprep.subr.bf16.mxu1 %v9248_v31  ;;  %v3035_v60 = vld [vmem:[#allocation12 + $0xb98] sm:$0xff]  ;;  %v9344_v23 = vcombine.high %v2907_v15, %v2911_v16  ;;  %v9343_v8 = vcombine.low %v2907_v15, %v2911_v16 }
 0x436   :  { %6390 = vmatprep.subr.bf16.mxu0 %v9376_v32  ;;  %v3039_v26 = vld [vmem:[#allocation12 + $0xbb8] sm:$0xff] }
 0x437   :  { %v9472_v28 = vcombine.high %v3035_v60, %v3039_v26  ;;  %v2899_v38 = vld [vmem:[#allocation12 + $0x758] sm:$0xff]  ;;  %v9471_v35 = vcombine.low %v3035_v60, %v3039_v26 }
 0x438   :  { %6348 = vmatpush1.bf16.msra.mxu1 %v9247_v40  ;;  %v2903_v31 = vld [vmem:[#allocation12 + $0x778] sm:$0xff] }
 0x439   :  { %6391 = vmatpush1.bf16.msra.mxu0 %v9375_v41  ;;  %6349 = vmatprep.subr.bf16.mxu1 %v9240_v42  ;;  %v3027_v32 = vld [vmem:[#allocation12 + $0xb58] sm:$0xff]  ;;  %v9336_v36 = vcombine.high %v2899_v38, %v2903_v31  ;;  %v9335_v30 = vcombine.low %v2899_v38, %v2903_v31  ;;  %v3185_v31 = vrot.slane %v11048_v17, %v10875_v19 }
 0x43a   :  { %6392 = vmatprep.subr.bf16.mxu0 %v9368_v51  ;;  %v3031_v33 = vld [vmem:[#allocation12 + $0xb78] sm:$0xff] }
 0x43b   :  { %v9464_v40 = vcombine.high %v3027_v32, %v3031_v33  ;;  %v2891_v41 = vld [vmem:[#allocation12 + $0x718] sm:$0xff]  ;;  %v9463_v0 = vcombine.low %v3027_v32, %v3031_v33 }
 0x43c   :  { %6350 = vmatpush1.bf16.msra.mxu1 %v9239_v12  ;;  %v2895_v42 = vld [vmem:[#allocation12 + $0x738] sm:$0xff] }
 0x43d   :  { %6393 = vmatpush1.bf16.msra.mxu0 %v9367_v54  ;;  %6351 = vmatprep.subr.bf16.mxu1 %v9232_v3  ;;  %v3019_v51 = vld [vmem:[#allocation12 + $0xb18] sm:$0xff]  ;;  %v9328_v53 = vcombine.high %v2891_v41, %v2895_v42  ;;  %v9327_v9 = vcombine.low %v2891_v41, %v2895_v42 }
 0x43e   :  { %6394 = vmatprep.subr.bf16.mxu0 %v9360_v4  ;;  %v3023_v57 = vld [vmem:[#allocation12 + $0xb38] sm:$0xff] }
 0x43f   :  { %v9456_v12 = vcombine.high %v3019_v51, %v3023_v57  ;;  %v2883_v54 = vld [vmem:[#allocation12 + $0x6d8] sm:$0xff]  ;;  %v9455_v49 = vcombine.low %v3019_v51, %v3023_v57  ;;  %v5815_v57 = vadd.f32 %v11006_v61, %v3185_v31 }
 0x440   :  { %6352 = vmatpush1.bf16.msra.mxu1 %v9231_v59  ;;  %v2887_v3 = vld [vmem:[#allocation12 + $0x6f8] sm:$0xff] }
 0x441   :  { %6395 = vmatpush1.bf16.msra.mxu0 %v9359_v11  ;;  %6353 = vmatprep.subr.bf16.mxu1 %v9352_v7  ;;  %v3011_v4 = vld [vmem:[#allocation12 + $0xad8] sm:$0xff]  ;;  %v9320_v48 = vcombine.high %v2883_v54, %v2887_v3  ;;  %v9319_v16 = vcombine.low %v2883_v54, %v2887_v3  ;;  %v5858_v54 = vadd.f32 %v11014_v55, %v5815_v57 }
 0x442   :  { %6396 = vmatprep.subr.bf16.mxu0 %v9480_v13  ;;  %v3015_v58 = vld [vmem:[#allocation12 + $0xaf8] sm:$0xff] }
 0x443   :  { %v9448_v59 = vcombine.high %v3011_v4, %v3015_v58  ;;  %v2875_v11 = vld [vmem:[#allocation12 + $0x698] sm:$0xff]  ;;  %v9447_v60 = vcombine.low %v3011_v4, %v3015_v58 }
 0x444   :  { %6354 = vmatpush2.bf16.msra.mxu1 %v9351_v6  ;;  %v2879_v7 = vld [vmem:[#allocation12 + $0x6b8] sm:$0xff] }
 0x445   :  { %6397 = vmatpush2.bf16.msra.mxu0 %v9479_v27  ;;  %6355 = vmatprep.subr.bf16.mxu1 %v9344_v23  ;;  %v3003_v13 = vld [vmem:[#allocation12 + $0xa98] sm:$0xff]  ;;  %v9312_v26 = vcombine.high %v2875_v11, %v2879_v7  ;;  %v9311_v32 = vcombine.low %v2875_v11, %v2879_v7 }
 0x446   :  { %6398 = vmatprep.subr.bf16.mxu0 %v9472_v28  ;;  %v3007_v15 = vld [vmem:[#allocation12 + $0xab8] sm:$0xff] }
 0x447   :  { %v9440_v6 = vcombine.high %v3003_v13, %v3007_v15  ;;  %v2867_v27 = vld [vmem:[#allocation12 + $0x658] sm:$0xff]  ;;  %v9439_v33 = vcombine.low %v3003_v13, %v3007_v15  ;;  %v11078_v15 = vpop.f32.mrf.mxu1 }
 0x448   :  { %6356 = vmatpush2.bf16.msra.mxu1 %v9343_v8  ;;  %v2871_v23 = vld [vmem:[#allocation12 + $0x678] sm:$0xff] }
 0x449   :  { %6399 = vmatpush2.bf16.msra.mxu0 %v9471_v35  ;;  %6357 = vmatprep.subr.bf16.mxu1 %v9336_v36  ;;  %v2995_v28 = vld [vmem:[#allocation12 + $0xa58] sm:$0xff]  ;;  %v9304_v8 = vcombine.high %v2867_v27, %v2871_v23  ;;  %v5819_v35 = vadd.f32 %v11018_v39, %v3185_v31 }
 0x44a   :  { %6400 = vmatprep.subr.bf16.mxu0 %v9464_v40  ;;  %v2999_v38 = vld [vmem:[#allocation12 + $0xa78] sm:$0xff] }
 0x44b   :  { %v9432_v36 = vcombine.high %v2995_v28, %v2999_v38  ;;  %v2859_v40 = vld [vmem:[#allocation12 + $0x618] sm:$0xff] }
 0x44c   :  { %6358 = vmatpush2.bf16.msra.mxu1 %v9335_v30  ;;  %v2863_v41 = vld [vmem:[#allocation12 + $0x638] sm:$0xff]  ;;  %v5862_v30 = vadd.f32 %v11032_v62, %v5819_v35 }
 0x44d   :  { %6401 = vmatpush2.bf16.msra.mxu0 %v9463_v0  ;;  %6359 = vmatprep.subr.bf16.mxu1 %v9328_v53  ;;  %v2987_v42 = vld [vmem:[#allocation12 + $0xa18] sm:$0xff]  ;;  %v9303_v0 = vcombine.low %v2867_v27, %v2871_v23  ;;  %v9431_v53 = vcombine.low %v2995_v28, %v2999_v38  ;;  %v9295_v62 = vcombine.low %v2859_v40, %v2863_v41 }
 0x44e   :  { %6402 = vmatprep.subr.bf16.mxu0 %v9456_v12  ;;  %v2991_v51 = vld [vmem:[#allocation12 + $0xa38] sm:$0xff]  ;;  %v9296_v12 = vcombine.high %v2859_v40, %v2863_v41  ;;  %v5905_v39 = vadd.f32 %v11044_v29, %v5862_v30 }
 0x44f   :  { %v9424_v3 = vcombine.high %v2987_v42, %v2991_v51  ;;  %v3107_v4 = vld [vmem:[#allocation12 + $0xdd8] sm:$0xff] }
 0x450   :  { %6360 = vmatpush2.bf16.msra.mxu1 %v9327_v9  ;;  %v3111_v58 = vld [vmem:[#allocation12 + $0xdf8] sm:$0xff]  ;;  %v5901_v9 = vadd.f32 %v11026_v1, %v5858_v54  ;;  %v5948_v61 = vadd.f32 %v11054_v63, %v5905_v39 }
 0x451   :  { %6403 = vmatpush2.bf16.msra.mxu0 %v9455_v49  ;;  %6361 = vmatprep.subr.bf16.mxu1 %v9320_v48  ;;  %v9423_v49 = vcombine.low %v2987_v42, %v2991_v51  ;;  %v9544_v48 = vcombine.high %v3107_v4, %v3111_v58  ;;  %v10066_v55 = vld [vmem:[#allocation15 + $0xe4] ss:$16 sps:$4 sm:$0xff]   ;;  %v9543_v13 = vcombine.low %v3107_v4, %v3111_v58  ;;  %v10064_v1 = vld [vmem:[#allocation15 + $0xe0] ss:$16 sps:$4 sm:$0xff]  }
 0x452   :  { %6404 = vmatprep.subr.bf16.mxu0 %v9448_v59  ;;  %v5944_v59 = vadd.f32 %v11038_v10, %v5901_v9  ;;  %v3099_v11 = vld [vmem:[#allocation12 + $0xd98] sm:$0xff]  ;;  %v6475_v7 = vmax.f32 %v5948_v61, 0.0 }
 0x453   :  { %v3103_v29 = vld [vmem:[#allocation12 + $0xdb8] sm:$0xff] }
 0x454   :  { %6362 = vmatpush2.bf16.msra.mxu1 %v9319_v16  ;;  %v6467_v63 = vmax.f32 %v5944_v59, 0.0  ;;  %v9536_v16 = vcombine.high %v3099_v11, %v3103_v29  ;;  %v10069_v10 = vld [vmem:[#allocation15 + $0xc4] ss:$16 sps:$4 sm:$0xff]   ;;  %v9535_v28 = vcombine.low %v3099_v11, %v3103_v29  ;;  %v10067_v31 = vld [vmem:[#allocation15 + $0xc0] ss:$16 sps:$4 sm:$0xff]  }
 0x455   :  { %6405 = vmatpush2.bf16.msra.mxu0 %v9447_v60  ;;  %6363 = vmatprep.subr.bf16.mxu1 %v9312_v26  ;;  %v3091_v60 = vld [vmem:[#allocation12 + $0xd58] sm:$0xff] }
 0x456   :  { %6406 = vmatprep.subr.bf16.mxu0 %v9440_v6  ;;  %v3095_v26 = vld [vmem:[#allocation12 + $0xd78] sm:$0xff]  ;;  %v11081_v27 = vpack.c.bf16 %v6475_v7, %v6467_v63 }
 0x457   :  { %v10075_v42 = vld [vmem:[#allocation15 + $0x84] ss:$16 sps:$4 sm:$0xff]   ;;  %v10076_v4 = vld [vmem:[#allocation15 + $0x60] ss:$16 sps:$4 sm:$0xff]  }
 0x458   :  { %6364 = vmatpush2.bf16.msra.mxu1 %v9311_v32  ;;  %v9528_v32 = vcombine.high %v3091_v60, %v3095_v26  ;;  %v3075_v51 = vld [vmem:[#allocation12 + $0xcd8] sm:$0xff] }
 0x459   :  { %6407 = vmatpush2.bf16.msra.mxu0 %v9439_v33  ;;  %6365 = vmatprep.subr.bf16.mxu1 %v9304_v8  ;;  %v3083_v33 = vld [vmem:[#allocation12 + $0xd18] sm:$0xff] }
 0x45a   :  { %6408 = vmatprep.subr.bf16.mxu0 %v9432_v36  ;;  %v3087_v8 = vld [vmem:[#allocation12 + $0xd38] sm:$0xff] }
 0x45b   :  { %v9520_v36 = vcombine.high %v3083_v33, %v3087_v8  ;;  %v3079_v57 = vld [vmem:[#allocation12 + $0xcf8] sm:$0xff] }
 0x45c   :  { %6366 = vmatpush2.bf16.msra.mxu1 %v9303_v0  ;;  %v9519_v0 = vcombine.low %v3083_v33, %v3087_v8  ;;  %v3067_v54 = vld [vmem:[#allocation12 + $0xc98] sm:$0xff] }
 0x45d   :  { %6409 = vmatpush2.bf16.msra.mxu0 %v9431_v53  ;;  %6367 = vmatprep.subr.bf16.mxu1 %v9296_v12  ;;  %v10073_v53 = vld [vmem:[#allocation15 + $0x80] ss:$16 sps:$4 sm:$0xff]   ;;  %v10078_v12 = vld [vmem:[#allocation15 + $0x64] ss:$16 sps:$4 sm:$0xff]  }
 0x45e   :  { %6410 = vmatprep.subr.bf16.mxu0 %v9424_v3  ;;  %v3071_v39 = vld [vmem:[#allocation12 + $0xcb8] sm:$0xff]  ;;  %v9511_v3 = vcombine.low %v3075_v51, %v3079_v57 }
 0x45f   :  { %v9504_v58 = vcombine.high %v3067_v54, %v3071_v39  ;;  %v10081_v9 = vld [vmem:[#allocation15 + $0x44] ss:$16 sps:$4 sm:$0xff]  }
 0x460   :  { %6368 = vmatpush2.bf16.msra.mxu1 %v9295_v62  ;;  %v3059_v61 = vld [vmem:[#allocation12 + $0xc58] sm:$0xff] }
 0x461   :  { %6411 = vmatpush2.bf16.msra.mxu0 %v9423_v49  ;;  %6423 = vmatprep.subr.bf16.mxu1 %v9544_v48  ;;  %v3063_v62 = vld [vmem:[#allocation12 + $0xc78] sm:$0xff]  ;;  %v9503_v49 = vcombine.low %v3067_v54, %v3071_v39 }
 0x462   :  { %8048 = vmatprep.subr.bf16.mxu0 %v10066_v55  ;;  %v10079_v48 = vld [vmem:[#allocation15 + $0x40] ss:$16 sps:$4 sm:$0xff]   ;;  %v9496_v59 = vcombine.high %v3059_v61, %v3063_v62  ;;  %v10084_v55 = vld [vmem:[#allocation15 + $0x24] ss:$16 sps:$4 sm:$0xff]   ;;  %v9495_v7 = vcombine.low %v3059_v61, %v3063_v62  ;;  %v3193_v62 = vrot.slane %v11048_v17, %v10878_v20 }
 0x463   :  { %v6113_v6 = vpop.f32.mrf.mxu1  ;;  %6370 = vmatmul.mubr.bf16.vlgmr.msra.gmra.mxu1 %v10952_v14  ;;  %v10072_v14 = vld [vmem:[#allocation15 + $0xa4] ss:$16 sps:$4 sm:$0xff]   ;;  %v10097_v39 = vld [vmem:[#allocation15 + $0x180] ss:$16 sps:$4 sm:$0xff]  }
 0x464   :  { %v6114_v23 = vadd.f32 %v6113_v6, %v11063_v43  ;;  %6413 = vmatmul.mubr.bf16.vlgmr.msra.gmra.mxu0 %v10982_v52  ;;  %6424 = vmatpush1.bf16.msra.mxu1 %v9543_v13  ;;  %v9527_v52 = vcombine.low %v3091_v60, %v3095_v26  ;;  %v3051_v11 = vld [vmem:[#allocation12 + $0xc18] sm:$0xff] }
 0x465   :  { %6455 = vmatprep.mubr.bf16.mxu1 %v10993_v44  ;;  %8049 = vmatpush1.bf16.msra.mxu0 %v10064_v1  ;;  %v11086_v38 = vpop.f32.mrf.mxu1  ;;  %v10070_v44 = vld [vmem:[#allocation15 + $0xa0] ss:$16 sps:$4 sm:$0xff]   ;;  %v10087_v63 = vld [vmem:[#allocation15 + $0x4] ss:$16 sps:$4 sm:$0xff]  }
 0x466   :  { %8080 = vmatprep.mubr.bf16.mxu0 %v11081_v27  ;;  %6425 = vmatprep.subr.bf16.mxu1 %v9536_v16  ;;  %v6468_v40 = vmax.f32 %v6114_v23, 0.0  ;;  %v3055_v29 = vld [vmem:[#allocation12 + $0xc38] sm:$0xff] }
 0x467   :  { %v6117_v35 = vpop.f32.mrf.mxu1  ;;  %8050 = vmatprep.subr.bf16.mxu0 %v10069_v10  ;;  %v10082_v13 = vld [vmem:[#allocation15 + $0x20] ss:$16 sps:$4 sm:$0xff]   ;;  %v9488_v1 = vcombine.high %v3051_v11, %v3055_v29  ;;  %v9487_v26 = vcombine.low %v3051_v11, %v3055_v29  ;;  %v10090_v23 = vld [vmem:[#allocation15 + $0x1e4] ss:$16 sps:$4 sm:$0xff]   ;;  %v5991_v29 = vadd.f32 %v11052_v25, %v3193_v62 }
 0x468   :  { %v6118_v43 = vadd.f32 %v6117_v35, %v11066_v24  ;;  %6426 = vmatpush1.bf16.msra.mxu1 %v9535_v28  ;;  %v9512_v24 = vcombine.high %v3075_v51, %v3079_v57  ;;  %v3171_v16 = vld [vmem:[#allocation12 + $0xfd8] sm:$0xff] }
 0x469   :  { %8051 = vmatpush1.bf16.msra.mxu0 %v10067_v31  ;;  %6427 = vmatprep.subr.bf16.mxu1 %v9528_v32  ;;  %v3175_v60 = vld [vmem:[#allocation12 + $0xff8] sm:$0xff] }
 0x46a   :  { %v6476_v41 = vmax.f32 %v6118_v43, 0.0  ;;  %8052 = vmatprep.subr.bf16.mxu0 %v10072_v14  ;;  %v10085_v6 = vld [vmem:[#allocation15] ss:$16 sps:$4 sm:$0xff]   ;;  %v9608_v10 = vcombine.high %v3171_v16, %v3175_v60  ;;  %v9607_v32 = vcombine.low %v3171_v16, %v3175_v60  ;;  %v10093_v8 = vld [vmem:[#allocation15 + $0x1c4] ss:$16 sps:$4 sm:$0xff]  }
 0x46b   :  { %v3163_v28 = vld [vmem:[#allocation12 + $0xf98] sm:$0xff] }
 0x46c   :  { %v11090_v30 = vpack.c.bf16 %v6476_v41, %v6468_v40  ;;  %6428 = vmatpush1.bf16.msra.mxu1 %v9527_v52  ;;  %v3167_v31 = vld [vmem:[#allocation12 + $0xfb8] sm:$0xff] }
 0x46d   :  { %8053 = vmatpush1.bf16.msra.mxu0 %v10070_v44  ;;  %6429 = vmatprep.subr.bf16.mxu1 %v9520_v36  ;;  %v10088_v14 = vld [vmem:[#allocation15 + $0x1e0] ss:$16 sps:$4 sm:$0xff]   ;;  %v9600_v33 = vcombine.high %v3163_v28, %v3167_v31  ;;  %v9599_v52 = vcombine.low %v3163_v28, %v3167_v31  ;;  %v10096_v40 = vld [vmem:[#allocation15 + $0x1a4] ss:$16 sps:$4 sm:$0xff]  }
 0x46e   :  { %8054 = vmatprep.subr.bf16.mxu0 %v10075_v42  ;;  %v3155_v35 = vld [vmem:[#allocation12 + $0xf58] sm:$0xff] }
 0x46f   :  { %v3159_v43 = vld [vmem:[#allocation12 + $0xf78] sm:$0xff] }
 0x470   :  { %6430 = vmatpush1.bf16.msra.mxu1 %v9519_v0  ;;  %v10091_v44 = vld [vmem:[#allocation15 + $0x1c0] ss:$16 sps:$4 sm:$0xff]   ;;  %v9592_v36 = vcombine.high %v3155_v35, %v3159_v43  ;;  %v9591_v51 = vcombine.low %v3155_v35, %v3159_v43  ;;  %v10108_v16 = vld [vmem:[#allocation15 + $0x124] ss:$16 sps:$4 sm:$0xff]  }
 0x471   :  { %8055 = vmatpush1.bf16.msra.mxu0 %v10073_v53  ;;  %6431 = vmatprep.subr.bf16.mxu1 %v9512_v24  ;;  %v3147_v41 = vld [vmem:[#allocation12 + $0xf18] sm:$0xff] }
 0x472   :  { %8056 = vmatprep.subr.bf16.mxu0 %v10078_v12  ;;  %v3151_v42 = vld [vmem:[#allocation12 + $0xf38] sm:$0xff] }
 0x473   :  { %v10094_v57 = vld [vmem:[#allocation15 + $0x1a0] ss:$16 sps:$4 sm:$0xff]   ;;  %v9584_v0 = vcombine.high %v3147_v41, %v3151_v42  ;;  %v10099_v53 = vld [vmem:[#allocation15 + $0x184] ss:$16 sps:$4 sm:$0xff]   ;;  %v9583_v54 = vcombine.low %v3147_v41, %v3151_v42 }
 0x474   :  { %6432 = vmatpush1.bf16.msra.mxu1 %v9511_v3  ;;  %v3139_v24 = vld [vmem:[#allocation12 + $0xed8] sm:$0xff] }
 0x475   :  { %8057 = vmatpush1.bf16.msra.mxu0 %v10076_v4  ;;  %6433 = vmatprep.subr.bf16.mxu1 %v9504_v58  ;;  %v3143_v12 = vld [vmem:[#allocation12 + $0xef8] sm:$0xff] }
 0x476   :  { %8058 = vmatprep.subr.bf16.mxu0 %v10081_v9  ;;  %v9576_v3 = vcombine.high %v3139_v24, %v3143_v12  ;;  %v10102_v4 = vld [vmem:[#allocation15 + $0x164] ss:$16 sps:$4 sm:$0xff]   ;;  %v9575_v61 = vcombine.low %v3139_v24, %v3143_v12  ;;  %v10124_v41 = vld [vmem:[#allocation15 + $0x4e0] ss:$16 sps:$4 sm:$0xff]  }
 0x477   :  { %v3131_v58 = vld [vmem:[#allocation12 + $0xe98] sm:$0xff] }
 0x478   :  { %6434 = vmatpush1.bf16.msra.mxu1 %v9503_v49  ;;  %v3135_v9 = vld [vmem:[#allocation12 + $0xeb8] sm:$0xff] }
 0x479   :  { %8059 = vmatpush1.bf16.msra.mxu0 %v10079_v48  ;;  %6435 = vmatprep.subr.bf16.mxu1 %v9496_v59  ;;  %v10100_v49 = vld [vmem:[#allocation15 + $0x160] ss:$16 sps:$4 sm:$0xff]   ;;  %v9568_v48 = vcombine.high %v3131_v58, %v3135_v9  ;;  %v10105_v59 = vld [vmem:[#allocation15 + $0x144] ss:$16 sps:$4 sm:$0xff]  }
 0x47a   :  { %8060 = vmatprep.subr.bf16.mxu0 %v10084_v55  ;;  %v3123_v55 = vld [vmem:[#allocation12 + $0xe58] sm:$0xff] }
 0x47b   :  { %v3127_v11 = vld [vmem:[#allocation12 + $0xe78] sm:$0xff] }
 0x47c   :  { %6436 = vmatpush1.bf16.msra.mxu1 %v9495_v7  ;;  %v9567_v7 = vcombine.low %v3131_v58, %v3135_v9  ;;  %v9560_v17 = vcombine.high %v3123_v55, %v3127_v11  ;;  %v3115_v60 = vld [vmem:[#allocation12 + $0xe18] sm:$0xff]  ;;  %v9559_v25 = vcombine.low %v3123_v55, %v3127_v11 }
 0x47d   :  { %8061 = vmatpush1.bf16.msra.mxu0 %v10082_v13  ;;  %6437 = vmatprep.subr.bf16.mxu1 %v9488_v1  ;;  %v5987_v13 = vadd.f32 %v11046_v45, %v3193_v62  ;;  %v6034_v1 = vadd.f32 %v11078_v15, %v5991_v29  ;;  %v10106_v45 = vld [vmem:[#allocation15 + $0x120] ss:$16 sps:$4 sm:$0xff]   ;;  %v10111_v15 = vld [vmem:[#allocation15 + $0x104] ss:$16 sps:$4 sm:$0xff]  }
 0x47e   :  { %8062 = vmatprep.subr.bf16.mxu0 %v10087_v63  ;;  %v10103_v63 = vld [vmem:[#allocation15 + $0x140] ss:$16 sps:$4 sm:$0xff]   ;;  %v10114_v35 = vld [vmem:[#allocation15 + $0x2e4] ss:$16 sps:$4 sm:$0xff]  }
 0x47f   :  { %v10126_v43 = vld [vmem:[#allocation15 + $0x4e4] ss:$16 sps:$4 sm:$0xff]   ;;  %v10115_v42 = vld [vmem:[#allocation15 + $0x2c0] ss:$16 sps:$4 sm:$0xff]  }
 0x480   :  { %6438 = vmatpush1.bf16.msra.mxu1 %v9487_v26  ;;  %v3119_v26 = vld [vmem:[#allocation12 + $0xe38] sm:$0xff] }
 0x481   :  { %8063 = vmatpush1.bf16.msra.mxu0 %v10085_v6  ;;  %6439 = vmatprep.subr.bf16.mxu1 %v9608_v10  ;;  %v6030_v6 = vadd.f32 %v11059_v34, %v5987_v13  ;;  %v6076_v10 = vpop.f32.mrf.mxu0  ;;  %v9552_v31 = vcombine.high %v3115_v60, %v3119_v26  ;;  %v10109_v34 = vld [vmem:[#allocation15 + $0x100] ss:$16 sps:$4 sm:$0xff]   ;;  %v10123_v24 = vld [vmem:[#allocation15 + $0x284] ss:$16 sps:$4 sm:$0xff]  }
 0x482   :  { %8064 = vmatprep.subr.bf16.mxu0 %v10090_v23  ;;  %v6119_v23 = vpop.f32.mrf.mxu1  ;;  %v6077_v28 = vadd.f32 %v6076_v10, %v6034_v1  ;;  %v10136_v12 = vld [vmem:[#allocation15 + $0x4a0] ss:$16 sps:$4 sm:$0xff]   ;;  %v10135_v9 = vld [vmem:[#allocation15 + $0x244] ss:$16 sps:$4 sm:$0xff]  }
 0x483   :  { %v10127_v58 = vld [vmem:[#allocation15 + $0x260] ss:$16 sps:$4 sm:$0xff]   ;;  %v10156_v62 = vld [vmem:[#allocation15 + $0x444] ss:$16 sps:$4 sm:$0xff]  }
 0x484   :  { %6440 = vmatpush2.bf16.msra.mxu1 %v9607_v32  ;;  %v6073_v32 = vadd.f32 %v11061_v37, %v6030_v6  ;;  %v10162_v55 = vld [vmem:[#allocation15 + $0x424] ss:$16 sps:$4 sm:$0xff]   ;;  %v10139_v11 = vld [vmem:[#allocation15 + $0x220] ss:$16 sps:$4 sm:$0xff]  }
 0x485   :  { %8065 = vmatpush2.bf16.msra.mxu0 %v10088_v14  ;;  %6441 = vmatprep.subr.bf16.mxu1 %v9600_v33  ;;  %v6120_v14 = vadd.f32 %v6119_v23, %v6077_v28  ;;  %v9551_v33 = vcombine.low %v3115_v60, %v3119_v26  ;;  %v10147_v29 = vld [vmem:[#allocation15 + $0x204] ss:$16 sps:$4 sm:$0xff]   ;;  %v10145_v1 = vld [vmem:[#allocation15 + $0x200] ss:$16 sps:$4 sm:$0xff]  }
 0x486   :  { %8066 = vmatprep.subr.bf16.mxu0 %v10093_v8  ;;  %v6116_v8 = vadd.f32 %v11086_v38, %v6073_v32  ;;  %v10132_v38 = vld [vmem:[#allocation15 + $0x4c4] ss:$16 sps:$4 sm:$0xff]   ;;  %v10151_v60 = vld [vmem:[#allocation15 + $0x3e0] ss:$16 sps:$4 sm:$0xff]  }
 0x487   :  { %v10168_v13 = vld [vmem:[#allocation15 + $0x404] ss:$16 sps:$4 sm:$0xff]   ;;  %v10172_v6 = vld [vmem:[#allocation15 + $0x5e0] ss:$16 sps:$4 sm:$0xff]  }
 0x488   :  { %6442 = vmatpush2.bf16.msra.mxu1 %v9599_v52  ;;  %v6477_v52 = vmax.f32 %v6120_v14, 0.0  ;;  %v10159_v26 = vld [vmem:[#allocation15 + $0x3c4] ss:$16 sps:$4 sm:$0xff]   ;;  %v10157_v23 = vld [vmem:[#allocation15 + $0x3c0] ss:$16 sps:$4 sm:$0xff]  }
 0x489   :  { %8067 = vmatpush2.bf16.msra.mxu0 %v10091_v44  ;;  %6443 = vmatprep.subr.bf16.mxu1 %v9592_v36  ;;  %v10112_v44 = vld [vmem:[#allocation15 + $0x2e0] ss:$16 sps:$4 sm:$0xff]   ;;  %v6469_v36 = vmax.f32 %v6116_v8, 0.0  ;;  %v10180_v10 = vld [vmem:[#allocation15 + $0x5c4] ss:$16 sps:$4 sm:$0xff]   ;;  %v6156_v8 = vpop.f32.mrf.mxu0 }
 0x48a   :  { %8068 = vmatprep.subr.bf16.mxu0 %v10096_v40  ;;  %v10117_v40 = vld [vmem:[#allocation15 + $0x2c4] ss:$16 sps:$4 sm:$0xff]   ;;  %v10178_v28 = vld [vmem:[#allocation15 + $0x5c0] ss:$16 sps:$4 sm:$0xff]  }
 0x48b   :  { %v11100_v37 = vpack.c.bf16 %v6477_v52, %v6469_v36  ;;  %v10184_v32 = vld [vmem:[#allocation15 + $0x5a0] ss:$16 sps:$4 sm:$0xff]   ;;  %v10192_v14 = vld [vmem:[#allocation15 + $0x584] ss:$16 sps:$4 sm:$0xff]  }
 0x48c   :  { %6444 = vmatpush2.bf16.msra.mxu1 %v9591_v51  ;;  %v10120_v51 = vld [vmem:[#allocation15 + $0x2a4] ss:$16 sps:$4 sm:$0xff]   ;;  %v10175_v52 = vld [vmem:[#allocation15 + $0x360] ss:$16 sps:$4 sm:$0xff]  }
 0x48d   :  { %8069 = vmatpush2.bf16.msra.mxu0 %v10094_v57  ;;  %6445 = vmatprep.subr.bf16.mxu1 %v9584_v0  ;;  %v10130_v57 = vld [vmem:[#allocation15 + $0x4c0] ss:$16 sps:$4 sm:$0xff]   ;;  %v10138_v0 = vld [vmem:[#allocation15 + $0x4a4] ss:$16 sps:$4 sm:$0xff]  }
 0x48e   :  { %8070 = vmatprep.subr.bf16.mxu0 %v10099_v53  ;;  %v10118_v53 = vld [vmem:[#allocation15 + $0x2a0] ss:$16 sps:$4 sm:$0xff]   ;;  %v10183_v36 = vld [vmem:[#allocation15 + $0x344] ss:$16 sps:$4 sm:$0xff]  }
 0x490   :  { %6446 = vmatpush2.bf16.msra.mxu1 %v9583_v54  ;;  %v10121_v54 = vld [vmem:[#allocation15 + $0x280] ss:$16 sps:$4 sm:$0xff]  }
 0x491   :  { %8071 = vmatpush2.bf16.msra.mxu0 %v10097_v39  ;;  %6447 = vmatprep.subr.bf16.mxu1 %v9576_v3  ;;  %v10129_v39 = vld [vmem:[#allocation15 + $0x264] ss:$16 sps:$4 sm:$0xff]   ;;  %v10142_v3 = vld [vmem:[#allocation15 + $0x480] ss:$16 sps:$4 sm:$0xff]  }
 0x492   :  { %8072 = vmatprep.subr.bf16.mxu0 %v10102_v4  ;;  %v10150_v4 = vld [vmem:[#allocation15 + $0x464] ss:$16 sps:$4 sm:$0xff]  }
 0x494   :  { %6448 = vmatpush2.bf16.msra.mxu1 %v9575_v61  ;;  %v10148_v61 = vld [vmem:[#allocation15 + $0x460] ss:$16 sps:$4 sm:$0xff]  }
 0x495   :  { %8073 = vmatpush2.bf16.msra.mxu0 %v10100_v49  ;;  %6449 = vmatprep.subr.bf16.mxu1 %v9568_v48  ;;  %v10133_v49 = vld [vmem:[#allocation15 + $0x240] ss:$16 sps:$4 sm:$0xff]   ;;  %v10141_v48 = vld [vmem:[#allocation15 + $0x224] ss:$16 sps:$4 sm:$0xff]  }
 0x496   :  { %8074 = vmatprep.subr.bf16.mxu0 %v10105_v59  ;;  %v10154_v59 = vld [vmem:[#allocation15 + $0x440] ss:$16 sps:$4 sm:$0xff]  }
 0x498   :  { %6450 = vmatpush2.bf16.msra.mxu1 %v9567_v7  ;;  %v10160_v7 = vld [vmem:[#allocation15 + $0x420] ss:$16 sps:$4 sm:$0xff]  }
 0x499   :  { %8075 = vmatpush2.bf16.msra.mxu0 %v10103_v63  ;;  %6451 = vmatprep.subr.bf16.mxu1 %v9560_v17  ;;  %v10153_v63 = vld [vmem:[#allocation15 + $0x3e4] ss:$16 sps:$4 sm:$0xff]   ;;  %v10166_v17 = vld [vmem:[#allocation15 + $0x400] ss:$16 sps:$4 sm:$0xff]  }
 0x49a   :  { %8076 = vmatprep.subr.bf16.mxu0 %v10108_v16  ;;  %v10174_v16 = vld [vmem:[#allocation15 + $0x5e4] ss:$16 sps:$4 sm:$0xff]  }
 0x49c   :  { %6452 = vmatpush2.bf16.msra.mxu1 %v9559_v25  ;;  %v10165_v25 = vld [vmem:[#allocation15 + $0x3a4] ss:$16 sps:$4 sm:$0xff]  }
 0x49d   :  { %8077 = vmatpush2.bf16.msra.mxu0 %v10106_v45  ;;  %6453 = vmatprep.subr.bf16.mxu1 %v9552_v31  ;;  %v10186_v45 = vld [vmem:[#allocation15 + $0x5a4] ss:$16 sps:$4 sm:$0xff]   ;;  %v10163_v31 = vld [vmem:[#allocation15 + $0x3a0] ss:$16 sps:$4 sm:$0xff]  }
 0x49e   :  { %8078 = vmatprep.subr.bf16.mxu0 %v10111_v15  ;;  %v10171_v15 = vld [vmem:[#allocation15 + $0x384] ss:$16 sps:$4 sm:$0xff]  }
 0x4a0   :  { %6454 = vmatpush2.bf16.msra.mxu1 %v9551_v33  ;;  %v10169_v33 = vld [vmem:[#allocation15 + $0x380] ss:$16 sps:$4 sm:$0xff]  }
 0x4a1   :  { %8079 = vmatpush2.bf16.msra.mxu0 %v10109_v34  ;;  %8091 = vmatprep.subr.bf16.mxu1 %v10114_v35  ;;  %v10177_v34 = vld [vmem:[#allocation15 + $0x364] ss:$16 sps:$4 sm:$0xff]   ;;  %v10190_v35 = vld [vmem:[#allocation15 + $0x580] ss:$16 sps:$4 sm:$0xff]  }
 0x4a2   :  { %8134 = vmatprep.subr.bf16.mxu0 %v10126_v43  ;;  %v10198_v43 = vld [vmem:[#allocation15 + $0x564] ss:$16 sps:$4 sm:$0xff]  }
 0x4a3   :  { %6456 = vmatmul.mubr.bf16.vlgmr.msra.gmra.mxu1 %v10995_v46  ;;  %v10144_v46 = vld [vmem:[#allocation15 + $0x484] ss:$16 sps:$4 sm:$0xff]  }
 0x4a4   :  { %8081 = vmatmul.mubr.bf16.vlgmr.msra.gmra.mxu0 %v11042_v50  ;;  %8092 = vmatpush1.bf16.msra.mxu1 %v10112_v44  ;;  %v6158_v44 = vpop.f32.mrf.mxu0 }
 0x4a5   :  { %8123 = vmatprep.mubr.bf16.mxu1 %v11100_v37  ;;  %8093 = vmatprep.subr.bf16.mxu1 %v10117_v40  ;;  %v10196_v40 = vld [vmem:[#allocation15 + $0x560] ss:$16 sps:$4 sm:$0xff]  }
 0x4a6   :  { %8135 = vmatpush1.bf16.msra.mxu0 %v10124_v41  ;;  %v10201_v41 = vld [vmem:[#allocation15 + $0x544] ss:$16 sps:$4 sm:$0xff]  }
 0x4a7   :  { %8136 = vmatprep.subr.bf16.mxu0 %v10132_v38  ;;  %v10181_v38 = vld [vmem:[#allocation15 + $0x340] ss:$16 sps:$4 sm:$0xff]  }
 0x4a8   :  { %8094 = vmatpush1.bf16.msra.mxu1 %v10115_v42  ;;  %v6160_v42 = vpop.f32.mrf.mxu0 }
 0x4a9   :  { %8095 = vmatprep.subr.bf16.mxu1 %v10120_v51  ;;  %v6199_v51 = vpop.f32.mrf.mxu1 }
 0x4aa   :  { %8137 = vmatpush1.bf16.msra.mxu0 %v10130_v57  ;;  %v10189_v57 = vld [vmem:[#allocation15 + $0x324] ss:$16 sps:$4 sm:$0xff]  }
 0x4ab   :  { %8138 = vmatprep.subr.bf16.mxu0 %v10138_v0  ;;  %v10199_v0 = vld [vmem:[#allocation15 + $0x540] ss:$16 sps:$4 sm:$0xff]  }
 0x4ac   :  { %8096 = vmatpush1.bf16.msra.mxu1 %v10118_v53  ;;  %v10204_v53 = vld [vmem:[#allocation15 + $0x524] ss:$16 sps:$4 sm:$0xff]  }
 0x4ad   :  { %8097 = vmatprep.subr.bf16.mxu1 %v10123_v24  ;;  %v10187_v24 = vld [vmem:[#allocation15 + $0x320] ss:$16 sps:$4 sm:$0xff]  }
 0x4ae   :  { %8139 = vmatpush1.bf16.msra.mxu0 %v10136_v12  ;;  %v6162_v12 = vpop.f32.mrf.mxu0 }
 0x4af   :  { %8140 = vmatprep.subr.bf16.mxu0 %v10144_v46  ;;  %v6201_v46 = vpop.f32.mrf.mxu1 }
 0x4b0   :  { %8098 = vmatpush1.bf16.msra.mxu1 %v10121_v54  ;;  %v10195_v54 = vld [vmem:[#allocation15 + $0x304] ss:$16 sps:$4 sm:$0xff]  }
 0x4b1   :  { %8099 = vmatprep.subr.bf16.mxu1 %v10129_v39  ;;  %v10202_v39 = vld [vmem:[#allocation15 + $0x520] ss:$16 sps:$4 sm:$0xff]  }
 0x4b2   :  { %8141 = vmatpush1.bf16.msra.mxu0 %v10142_v3  ;;  %v6242_v3 = vpop.f32.mrf.mxu0 }
 0x4b3   :  { %8142 = vmatprep.subr.bf16.mxu0 %v10150_v4  ;;  %v10207_v4 = vld [vmem:[#allocation15 + $0x504] ss:$16 sps:$4 sm:$0xff]  }
 0x4b4   :  { %8100 = vmatpush1.bf16.msra.mxu1 %v10127_v58  ;;  %v11105_v58 = vld [vmem:[#allocation14] sm:$0xff] }
 0x4b5   :  { %8101 = vmatprep.subr.bf16.mxu1 %v10135_v9  ;;  %v3201_v9 = vrot.slane %v11105_v58, %v998_v2 }
 0x4b6   :  { %8143 = vmatpush1.bf16.msra.mxu0 %v10148_v61  ;;  %v10193_v61 = vld [vmem:[#allocation15 + $0x300] ss:$16 sps:$4 sm:$0xff]  }
 0x4b7   :  { %8144 = vmatprep.subr.bf16.mxu0 %v10156_v62  ;;  %v3197_v62 = vrot.slane %v11105_v58, %v994_v5 }
 0x4b8   :  { %8102 = vmatpush1.bf16.msra.mxu1 %v10133_v49  ;;  %v6203_v49 = vpop.f32.mrf.mxu1 }
 0x4b9   :  { %8103 = vmatprep.subr.bf16.mxu1 %v10141_v48  ;;  %v10258_v48 = vld [vmem:[#allocation15 + $0x6e4] ss:$16 sps:$4 sm:$0xff]  }
 0x4ba   :  { %8145 = vmatpush1.bf16.msra.mxu0 %v10154_v59  ;;  %v10205_v59 = vld [vmem:[#allocation15 + $0x500] ss:$16 sps:$4 sm:$0xff]   ;;  %v6205_v2 = vpop.f32.mrf.mxu1 }
 0x4bb   :  { %8146 = vmatprep.subr.bf16.mxu0 %v10162_v55  ;;  %v6244_v55 = vpop.f32.mrf.mxu0 }
 0x4bc   :  { %8104 = vmatpush1.bf16.msra.mxu1 %v10139_v11  ;;  %v10210_v11 = vld [vmem:[#allocation15 + $0xec] ss:$16 sps:$4 sm:$0xff]  }
 0x4bd   :  { %8105 = vmatprep.subr.bf16.mxu1 %v10147_v29  ;;  %v6159_v29 = vadd.f32 %v6158_v44, %v3201_v9  ;;  %v10276_v44 = vld [vmem:[#allocation15 + $0x684] ss:$16 sps:$4 sm:$0xff]  }
 0x4be   :  { %8147 = vmatpush1.bf16.msra.mxu0 %v10160_v7  ;;  %v6161_v7 = vadd.f32 %v6160_v42, %v3197_v62  ;;  %v10274_v42 = vld [vmem:[#allocation15 + $0x680] ss:$16 sps:$4 sm:$0xff]  }
 0x4bf   :  { %8148 = vmatprep.subr.bf16.mxu0 %v10168_v13  ;;  %v10256_v13 = vld [vmem:[#allocation15 + $0x6e0] ss:$16 sps:$4 sm:$0xff]  }
 0x4c0   :  { %8106 = vmatpush1.bf16.msra.mxu1 %v10145_v1  ;;  %v6157_v1 = vadd.f32 %v6156_v8, %v3197_v62  ;;  %v10219_v62 = vld [vmem:[#allocation15 + $0x8c] ss:$16 sps:$4 sm:$0xff]  }
 0x4c1   :  { %8107 = vmatprep.subr.bf16.mxu1 %v10153_v63  ;;  %v10264_v63 = vld [vmem:[#allocation15 + $0x6c4] ss:$16 sps:$4 sm:$0xff]  }
 0x4c2   :  { %8149 = vmatpush1.bf16.msra.mxu0 %v10166_v17  ;;  %v6163_v17 = vadd.f32 %v6162_v12, %v3201_v9  ;;  %v6200_v5 = vadd.f32 %v6199_v51, %v6157_v1  ;;  %v10213_v12 = vld [vmem:[#allocation15 + $0xcc] ss:$16 sps:$4 sm:$0xff]   ;;  %v10294_v9 = vld [vmem:[#allocation15 + $0x624] ss:$16 sps:$4 sm:$0xff]  }
 0x4c3   :  { %8150 = vmatprep.subr.bf16.mxu0 %v10174_v16  ;;  %v6202_v16 = vadd.f32 %v6201_v46, %v6159_v29  ;;  %v10280_v46 = vld [vmem:[#allocation15 + $0x660] ss:$16 sps:$4 sm:$0xff]   ;;  %v10220_v29 = vld [vmem:[#allocation15 + $0x68] ss:$16 sps:$4 sm:$0xff]   ;;  %v10312_v1 = vld [vmem:[#allocation15 + $0x7c4] ss:$16 sps:$4 sm:$0xff]  }
 0x4c4   :  { %8108 = vmatpush2.bf16.msra.mxu1 %v10151_v60  ;;  %v6204_v60 = vadd.f32 %v6203_v49, %v6161_v7  ;;  %v10292_v49 = vld [vmem:[#allocation15 + $0x620] ss:$16 sps:$4 sm:$0xff]   ;;  %v10225_v7 = vld [vmem:[#allocation15 + $0x4c] ss:$16 sps:$4 sm:$0xff]  }
 0x4c5   :  { %8109 = vmatprep.subr.bf16.mxu1 %v10159_v26  ;;  %v6246_v26 = vpop.f32.mrf.mxu0 }
 0x4c6   :  { %8151 = vmatpush2.bf16.msra.mxu0 %v10172_v6 }
 0x4c7   :  { %8152 = vmatprep.subr.bf16.mxu0 %v10180_v10  ;;  %v6206_v10 = vadd.f32 %v6205_v2, %v6163_v17  ;;  %v10223_v2 = vld [vmem:[#allocation15 + $0x48] ss:$16 sps:$4 sm:$0xff]   ;;  %v10310_v17 = vld [vmem:[#allocation15 + $0x7c0] ss:$16 sps:$4 sm:$0xff]  }
 0x4c8   :  { %8110 = vmatpush2.bf16.msra.mxu1 %v10157_v23  ;;  %v10262_v23 = vld [vmem:[#allocation15 + $0x6c0] ss:$16 sps:$4 sm:$0xff]  }
 0x4c9   :  { %8111 = vmatprep.subr.bf16.mxu1 %v10165_v25 }
 0x4ca   :  { %8153 = vmatpush2.bf16.msra.mxu0 %v10178_v28  ;;  %v10270_v28 = vld [vmem:[#allocation15 + $0x6a4] ss:$16 sps:$4 sm:$0xff]  }
 0x4cb   :  { %8154 = vmatprep.subr.bf16.mxu0 %v10186_v45  ;;  %v6245_v45 = vadd.f32 %v6244_v55, %v6202_v16  ;;  %v10222_v55 = vld [vmem:[#allocation15 + $0x6c] ss:$16 sps:$4 sm:$0xff]   ;;  %v10318_v16 = vld [vmem:[#allocation15 + $0x7a4] ss:$16 sps:$4 sm:$0xff]  }
 0x4cc   :  { %8112 = vmatpush2.bf16.msra.mxu1 %v10163_v31  ;;  %v6247_v31 = vadd.f32 %v6246_v26, %v6204_v60  ;;  %v10226_v60 = vld [vmem:[#allocation15 + $0x28] ss:$16 sps:$4 sm:$0xff]   ;;  %v10316_v26 = vld [vmem:[#allocation15 + $0x7a0] ss:$16 sps:$4 sm:$0xff]  }
 0x4cd   :  { %8113 = vmatprep.subr.bf16.mxu1 %v10171_v15  ;;  %v6243_v15 = vadd.f32 %v6242_v3, %v6200_v5  ;;  %v10216_v3 = vld [vmem:[#allocation15 + $0xac] ss:$16 sps:$4 sm:$0xff]  }
 0x4ce   :  { %8155 = vmatpush2.bf16.msra.mxu0 %v10184_v32  ;;  %v6248_v32 = vpop.f32.mrf.mxu0  ;;  %v10231_v5 = vld [vmem:[#allocation15 + $0xc] ss:$16 sps:$4 sm:$0xff]  }
 0x4cf   :  { %8156 = vmatprep.subr.bf16.mxu0 %v10192_v14 }
 0x4d0   :  { %8114 = vmatpush2.bf16.msra.mxu1 %v10169_v33  ;;  %v6249_v33 = vadd.f32 %v6248_v32, %v6206_v10  ;;  %v10229_v10 = vld [vmem:[#allocation15 + $0x8] ss:$16 sps:$4 sm:$0xff]   ;;  %v10336_v32 = vld [vmem:[#allocation15 + $0x744] ss:$16 sps:$4 sm:$0xff]  }
 0x4d1   :  { %8115 = vmatprep.subr.bf16.mxu1 %v10177_v34 }
 0x4d2   :  { %8157 = vmatpush2.bf16.msra.mxu0 %v10190_v35  ;;  %v10268_v35 = vld [vmem:[#allocation15 + $0x6a0] ss:$16 sps:$4 sm:$0xff]  }
 0x4d3   :  { %8158 = vmatprep.subr.bf16.mxu0 %v10198_v43 }
 0x4d4   :  { %8116 = vmatpush2.bf16.msra.mxu1 %v10175_v52 }
 0x4d5   :  { %8117 = vmatprep.subr.bf16.mxu1 %v10183_v36 }
 0x4d6   :  { %8159 = vmatpush2.bf16.msra.mxu0 %v10196_v40 }
 0x4d7   :  { %8160 = vmatprep.subr.bf16.mxu0 %v10201_v41 }
 0x4d8   :  { %8118 = vmatpush2.bf16.msra.mxu1 %v10181_v38 }
 0x4d9   :  { %8119 = vmatprep.subr.bf16.mxu1 %v10189_v57  ;;  %v10282_v57 = vld [vmem:[#allocation15 + $0x664] ss:$16 sps:$4 sm:$0xff]  }
 0x4da   :  { %8161 = vmatpush2.bf16.msra.mxu0 %v10199_v0 }
 0x4db   :  { %8162 = vmatprep.subr.bf16.mxu0 %v10204_v53  ;;  %v10208_v53 = vld [vmem:[#allocation15 + $0xe8] ss:$16 sps:$4 sm:$0xff]  }
 0x4dc   :  { %8120 = vmatpush2.bf16.msra.mxu1 %v10187_v24 }
 0x4dd   :  { %8121 = vmatprep.subr.bf16.mxu1 %v10195_v54  ;;  %v10288_v54 = vld [vmem:[#allocation15 + $0x644] ss:$16 sps:$4 sm:$0xff]  }
 0x4de   :  { %8163 = vmatpush2.bf16.msra.mxu0 %v10202_v39  ;;  %v10211_v39 = vld [vmem:[#allocation15 + $0xc8] ss:$16 sps:$4 sm:$0xff]  }
 0x4df   :  { %8164 = vmatprep.subr.bf16.mxu0 %v10207_v4  ;;  %v10286_v4 = vld [vmem:[#allocation15 + $0x640] ss:$16 sps:$4 sm:$0xff]  }
 0x4e0   :  { %8122 = vmatpush2.bf16.msra.mxu1 %v10193_v61  ;;  %v10214_v61 = vld [vmem:[#allocation15 + $0xa8] ss:$16 sps:$4 sm:$0xff]  }
 0x4e1   :  { %8177 = vmatprep.subr.bf16.mxu1 %v10258_v48  ;;  %v10300_v48 = vld [vmem:[#allocation15 + $0x604] ss:$16 sps:$4 sm:$0xff]  }
 0x4e2   :  { %8165 = vmatpush2.bf16.msra.mxu0 %v10205_v59  ;;  %v10217_v59 = vld [vmem:[#allocation15 + $0x88] ss:$16 sps:$4 sm:$0xff]  }
 0x4e3   :  { %v6285_v6 = vpop.f32.mrf.mxu1  ;;  %8124 = vmatmul.mubr.bf16.vlgmr.msra.gmra.mxu1 %v11090_v30  ;;  %8220 = vmatprep.subr.bf16.mxu0 %v10210_v11  ;;  %v10306_v11 = vld [vmem:[#allocation15 + $0x7e4] ss:$16 sps:$4 sm:$0xff]  }
 0x4e4   :  { %8178 = vmatpush1.bf16.msra.mxu1 %v10256_v13  ;;  %v6286_v43 = vadd.f32 %v6285_v6, %v6243_v15  ;;  %v10304_v13 = vld [vmem:[#allocation15 + $0x7e0] ss:$16 sps:$4 sm:$0xff]   ;;  %v10324_v6 = vld [vmem:[#allocation15 + $0x784] ss:$16 sps:$4 sm:$0xff]  }
 0x4e5   :  { %v6287_v25 = vpop.f32.mrf.mxu1  ;;  %8179 = vmatprep.subr.bf16.mxu1 %v10264_v63  ;;  %v10228_v63 = vld [vmem:[#allocation15 + $0x2c] ss:$16 sps:$4 sm:$0xff]   ;;  %v10328_v15 = vld [vmem:[#allocation15 + $0x760] ss:$16 sps:$4 sm:$0xff]  }
 0x4e6   :  { %v6288_v8 = vadd.f32 %v6287_v25, %v6245_v45  ;;  %v6470_v51 = vmax.f32 %v6286_v43, 0.0  ;;  %v10322_v25 = vld [vmem:[#allocation15 + $0x780] ss:$16 sps:$4 sm:$0xff]   ;;  %v10232_v45 = vld [vmem:[#allocation15 + $0x1e8] ss:$16 sps:$4 sm:$0xff]  }
 0x4e7   :  { %v6289_v14 = vpop.f32.mrf.mxu1  ;;  %v10243_v43 = vld [vmem:[#allocation15 + $0x18c] ss:$16 sps:$4 sm:$0xff]  }
 0x4e8   :  { %v6290_v34 = vadd.f32 %v6289_v14, %v6247_v31  ;;  %8180 = vmatpush1.bf16.msra.mxu1 %v10262_v23  ;;  %v6471_v41 = vmax.f32 %v6288_v8, 0.0  ;;  %v10234_v23 = vld [vmem:[#allocation15 + $0x1ec] ss:$16 sps:$4 sm:$0xff]   ;;  %v10235_v14 = vld [vmem:[#allocation15 + $0x1c8] ss:$16 sps:$4 sm:$0xff]  }
 0x4e9   :  { %v6291_v52 = vpop.f32.mrf.mxu1  ;;  %8181 = vmatprep.subr.bf16.mxu1 %v10270_v28  ;;  %v10330_v28 = vld [vmem:[#allocation15 + $0x764] ss:$16 sps:$4 sm:$0xff]   ;;  %v10237_v31 = vld [vmem:[#allocation15 + $0x1cc] ss:$16 sps:$4 sm:$0xff]   ;;  %v10334_v8 = vld [vmem:[#allocation15 + $0x740] ss:$16 sps:$4 sm:$0xff]  }
 0x4ea   :  { %v6292_v36 = vadd.f32 %v6291_v52, %v6249_v33  ;;  %v6478_v40 = vmax.f32 %v6290_v34, 0.0  ;;  %v10240_v33 = vld [vmem:[#allocation15 + $0x1ac] ss:$16 sps:$4 sm:$0xff]   ;;  %v10342_v34 = vld [vmem:[#allocation15 + $0x724] ss:$16 sps:$4 sm:$0xff]  }
 0x4eb   :  { %v10340_v52 = vld [vmem:[#allocation15 + $0x720] ss:$16 sps:$4 sm:$0xff]  }
 0x4ec   :  { %v6479_v38 = vmax.f32 %v6292_v36, 0.0  ;;  %8182 = vmatpush1.bf16.msra.mxu1 %v10268_v35  ;;  %v11116_v24 = vpack.c.bf16 %v6478_v40, %v6470_v51  ;;  %v10238_v35 = vld [vmem:[#allocation15 + $0x1a8] ss:$16 sps:$4 sm:$0xff]   ;;  %v10246_v40 = vld [vmem:[#allocation15 + $0x16c] ss:$16 sps:$4 sm:$0xff]  }
 0x4ed   :  { %8183 = vmatprep.subr.bf16.mxu1 %v10276_v44  ;;  %v10348_v44 = vld [vmem:[#allocation15 + $0x704] ss:$16 sps:$4 sm:$0xff]   ;;  %v10241_v36 = vld [vmem:[#allocation15 + $0x188] ss:$16 sps:$4 sm:$0xff]   ;;  %v10249_v51 = vld [vmem:[#allocation15 + $0x14c] ss:$16 sps:$4 sm:$0xff]  }
 0x4ee   :  { %v11114_v0 = vpack.c.bf16 %v6479_v38, %v6471_v41  ;;  %v10346_v41 = vld [vmem:[#allocation15 + $0x700] ss:$16 sps:$4 sm:$0xff]   ;;  %v10354_v38 = vld [vmem:[#allocation15 + $0x2ec] ss:$16 sps:$4 sm:$0xff]  }
 0x4f0   :  { %8166 = vmatprep.mubr.bf16.mxu0 %v11114_v0  ;;  %8184 = vmatpush1.bf16.msra.mxu1 %v10274_v42  ;;  %v10244_v42 = vld [vmem:[#allocation15 + $0x168] ss:$16 sps:$4 sm:$0xff]  }
 0x4f1   :  { %8167 = vmatmul.mubr.bf16.vlgmr.msra.gmra.mxu0 %v11116_v24  ;;  %8185 = vmatprep.subr.bf16.mxu1 %v10282_v57  ;;  %v10247_v57 = vld [vmem:[#allocation15 + $0x148] ss:$16 sps:$4 sm:$0xff]  }
 0x4f2   :  { %8221 = vmatpush1.bf16.msra.mxu0 %v10208_v53  ;;  %8252 = vmatprep.mubr.bf16.mxu0 %v11081_v27  ;;  %v10298_v27 = vld [vmem:[#allocation15 + $0x600] ss:$16 sps:$4 sm:$0xff]   ;;  %v10252_v53 = vld [vmem:[#allocation15 + $0x12c] ss:$16 sps:$4 sm:$0xff]  }
 0x4f3   :  { %8222 = vmatprep.subr.bf16.mxu0 %v10213_v12  ;;  %v10250_v12 = vld [vmem:[#allocation15 + $0x128] ss:$16 sps:$4 sm:$0xff]  }
 0x4f4   :  { %8186 = vmatpush1.bf16.msra.mxu1 %v10280_v46  ;;  %v10255_v46 = vld [vmem:[#allocation15 + $0x10c] ss:$16 sps:$4 sm:$0xff]  }
 0x4f5   :  { %8187 = vmatprep.subr.bf16.mxu1 %v10288_v54  ;;  %v10253_v54 = vld [vmem:[#allocation15 + $0x108] ss:$16 sps:$4 sm:$0xff]  }
 0x4f6   :  { %8223 = vmatpush1.bf16.msra.mxu0 %v10211_v39  ;;  %v10261_v39 = vld [vmem:[#allocation15 + $0x4ec] ss:$16 sps:$4 sm:$0xff]  }
 0x4f7   :  { %8224 = vmatprep.subr.bf16.mxu0 %v10216_v3  ;;  %v10259_v3 = vld [vmem:[#allocation15 + $0x4e8] ss:$16 sps:$4 sm:$0xff]  }
 0x4f8   :  { %8188 = vmatpush1.bf16.msra.mxu1 %v10286_v4  ;;  %v10267_v4 = vld [vmem:[#allocation15 + $0x4cc] ss:$16 sps:$4 sm:$0xff]  }
 0x4f9   :  { %8189 = vmatprep.subr.bf16.mxu1 %v10294_v9  ;;  %v10265_v9 = vld [vmem:[#allocation15 + $0x4c8] ss:$16 sps:$4 sm:$0xff]  }
 0x4fa   :  { %8225 = vmatpush1.bf16.msra.mxu0 %v10214_v61  ;;  %v10273_v61 = vld [vmem:[#allocation15 + $0x4ac] ss:$16 sps:$4 sm:$0xff]  }
 0x4fb   :  { %8226 = vmatprep.subr.bf16.mxu0 %v10219_v62  ;;  %v10271_v62 = vld [vmem:[#allocation15 + $0x4a8] ss:$16 sps:$4 sm:$0xff]  }
 0x4fc   :  { %8190 = vmatpush1.bf16.msra.mxu1 %v10292_v49  ;;  %v10279_v49 = vld [vmem:[#allocation15 + $0x48c] ss:$16 sps:$4 sm:$0xff]  }
 0x4fd   :  { %8191 = vmatprep.subr.bf16.mxu1 %v10300_v48  ;;  %v10277_v48 = vld [vmem:[#allocation15 + $0x488] ss:$16 sps:$4 sm:$0xff]  }
 0x4fe   :  { %8227 = vmatpush1.bf16.msra.mxu0 %v10217_v59  ;;  %v10285_v59 = vld [vmem:[#allocation15 + $0x46c] ss:$16 sps:$4 sm:$0xff]  }
 0x4ff   :  { %8228 = vmatprep.subr.bf16.mxu0 %v10222_v55  ;;  %v10283_v55 = vld [vmem:[#allocation15 + $0x468] ss:$16 sps:$4 sm:$0xff]  }
 0x500   :  { %8192 = vmatpush1.bf16.msra.mxu1 %v10298_v27  ;;  %v10291_v27 = vld [vmem:[#allocation15 + $0x44c] ss:$16 sps:$4 sm:$0xff]  }
 0x501   :  { %8193 = vmatprep.subr.bf16.mxu1 %v10306_v11  ;;  %v10297_v11 = vld [vmem:[#allocation15 + $0x42c] ss:$16 sps:$4 sm:$0xff]  }
 0x502   :  { %8229 = vmatpush1.bf16.msra.mxu0 %v10220_v29  ;;  %v10303_v29 = vld [vmem:[#allocation15 + $0x40c] ss:$16 sps:$4 sm:$0xff]  }
 0x503   :  { %8230 = vmatprep.subr.bf16.mxu0 %v10225_v7  ;;  %v10301_v7 = vld [vmem:[#allocation15 + $0x408] ss:$16 sps:$4 sm:$0xff]  }
 0x504   :  { %8194 = vmatpush2.bf16.msra.mxu1 %v10304_v13  ;;  %v10309_v13 = vld [vmem:[#allocation15 + $0x5ec] ss:$16 sps:$4 sm:$0xff]  }
 0x505   :  { %8195 = vmatprep.subr.bf16.mxu1 %v10312_v1  ;;  %v6328_v1 = vpop.f32.mrf.mxu0 }
 0x506   :  { %8231 = vmatpush1.bf16.msra.mxu0 %v10223_v2  ;;  %v10307_v2 = vld [vmem:[#allocation15 + $0x5e8] ss:$16 sps:$4 sm:$0xff]  }
 0x507   :  { %8232 = vmatprep.subr.bf16.mxu0 %v10228_v63  ;;  %v10315_v63 = vld [vmem:[#allocation15 + $0x5cc] ss:$16 sps:$4 sm:$0xff]  }
 0x508   :  { %8196 = vmatpush2.bf16.msra.mxu1 %v10310_v17  ;;  %v6330_v17 = vpop.f32.mrf.mxu0 }
 0x509   :  { %8197 = vmatprep.subr.bf16.mxu1 %v10318_v16  ;;  %v10313_v16 = vld [vmem:[#allocation15 + $0x5c8] ss:$16 sps:$4 sm:$0xff]  }
 0x50a   :  { %8233 = vmatpush1.bf16.msra.mxu0 %v10226_v60  ;;  %v10321_v60 = vld [vmem:[#allocation15 + $0x5ac] ss:$16 sps:$4 sm:$0xff]  }
 0x50b   :  { %8234 = vmatprep.subr.bf16.mxu0 %v10231_v5  ;;  %v6332_v5 = vpop.f32.mrf.mxu0 }
 0x50c   :  { %8198 = vmatpush2.bf16.msra.mxu1 %v10316_v26 }
 0x50d   :  { %8199 = vmatprep.subr.bf16.mxu1 %v10324_v6  ;;  %v10319_v6 = vld [vmem:[#allocation15 + $0x5a8] ss:$16 sps:$4 sm:$0xff]  }
 0x50e   :  { %8235 = vmatpush1.bf16.msra.mxu0 %v10229_v10  ;;  %v10327_v10 = vld [vmem:[#allocation15 + $0x58c] ss:$16 sps:$4 sm:$0xff]  }
 0x50f   :  { %8236 = vmatprep.subr.bf16.mxu0 %v10234_v23  ;;  %v6334_v23 = vpop.f32.mrf.mxu0 }
 0x510   :  { %8200 = vmatpush2.bf16.msra.mxu1 %v10322_v25 }
 0x511   :  { %8201 = vmatprep.subr.bf16.mxu1 %v10330_v28  ;;  %v10325_v28 = vld [vmem:[#allocation15 + $0x588] ss:$16 sps:$4 sm:$0xff]  }
 0x512   :  { %8237 = vmatpush2.bf16.msra.mxu0 %v10232_v45 }
 0x513   :  { %8238 = vmatprep.subr.bf16.mxu0 %v10237_v31  ;;  %v10333_v31 = vld [vmem:[#allocation15 + $0x56c] ss:$16 sps:$4 sm:$0xff]  }
 0x514   :  { %8202 = vmatpush2.bf16.msra.mxu1 %v10328_v15  ;;  %v3209_v15 = vrot.slane %v11105_v58, %v1006_v47 }
 0x515   :  { %8203 = vmatprep.subr.bf16.mxu1 %v10336_v32  ;;  %v3205_v32 = vrot.slane %v11105_v58, %v1002_v56  ;;  %v10345_v56 = vld [vmem:[#allocation15 + $0x52c] ss:$16 sps:$4 sm:$0xff]  }
 0x516   :  { %8239 = vmatpush2.bf16.msra.mxu0 %v10235_v14 }
 0x517   :  { %8240 = vmatprep.subr.bf16.mxu0 %v10240_v33  ;;  %v10331_v33 = vld [vmem:[#allocation15 + $0x568] ss:$16 sps:$4 sm:$0xff]  }
 0x518   :  { %8204 = vmatpush2.bf16.msra.mxu1 %v10334_v8 }
 0x519   :  { %8205 = vmatprep.subr.bf16.mxu1 %v10342_v34  ;;  %v10339_v34 = vld [vmem:[#allocation15 + $0x54c] ss:$16 sps:$4 sm:$0xff]  }
 0x51a   :  { %8241 = vmatpush2.bf16.msra.mxu0 %v10238_v35  ;;  %v6331_v35 = vadd.f32 %v6330_v17, %v3209_v15  ;;  %v10363_v17 = vld [vmem:[#allocation15 + $0x28c] ss:$16 sps:$4 sm:$0xff]  }
 0x51b   :  { %8242 = vmatprep.subr.bf16.mxu0 %v10243_v43  ;;  %v6333_v43 = vadd.f32 %v6332_v5, %v3205_v32  ;;  %v10450_v5 = vld [vmem:[#allocation18 + $0x70] sm:$0xff]  }
 0x51c   :  { %8206 = vmatpush2.bf16.msra.mxu1 %v10340_v52  ;;  %v6329_v52 = vadd.f32 %v6328_v1, %v3205_v32  ;;  %v10355_v1 = vld [vmem:[#allocation15 + $0x2c8] ss:$16 sps:$4 sm:$0xff]   ;;  %v10456_v32 = vld [vmem:[#allocation18 + $0x58] sm:$0xff]  }
 0x51d   :  { %8207 = vmatprep.subr.bf16.mxu1 %v10348_v44 }
 0x51e   :  { %8243 = vmatpush2.bf16.msra.mxu0 %v10241_v36  ;;  %v6335_v36 = vadd.f32 %v6334_v23, %v3209_v15  ;;  %v10369_v23 = vld [vmem:[#allocation15 + $0x24c] ss:$16 sps:$4 sm:$0xff]   ;;  %v10455_v15 = vld [vmem:[#allocation18 + $0x20] sm:$0xff]  }
 0x51f   :  { %8244 = vmatprep.subr.bf16.mxu0 %v10246_v40 }
 0x520   :  { %8208 = vmatpush2.bf16.msra.mxu1 %v10346_v41 }
 0x521   :  { %8263 = vmatprep.subr.bf16.mxu1 %v10354_v38  ;;  %v10337_v38 = vld [vmem:[#allocation15 + $0x548] ss:$16 sps:$4 sm:$0xff]  }
 0x522   :  { %8245 = vmatpush2.bf16.msra.mxu0 %v10244_v42 }
 0x523   :  { %8246 = vmatprep.subr.bf16.mxu0 %v10249_v51  ;;  %v6371_v26 = vpop.f32.mrf.mxu1 }
 0x524   :  { %v6414_v45 = vpop.f32.mrf.mxu0  ;;  %v6372_v47 = vadd.f32 %v6371_v26, %v6329_v52  ;;  %v10361_v26 = vld [vmem:[#allocation15 + $0x288] ss:$16 sps:$4 sm:$0xff]  }
 0x525   :  { %v6373_v25 = vpop.f32.mrf.mxu1  ;;  %v10379_v52 = vld [vmem:[#allocation15 + $0x3c8] ss:$16 sps:$4 sm:$0xff]  }
 0x526   :  { %8247 = vmatpush2.bf16.msra.mxu0 %v10247_v57  ;;  %v6416_v8 = vpop.f32.mrf.mxu0  ;;  %v6374_v40 = vadd.f32 %v6373_v25, %v6331_v35  ;;  %v10453_v25 = vld [vmem:[#allocation18 + $0x28] sm:$0xff]   ;;  %v10376_v35 = vld [vmem:[#allocation15 + $0x3e8] ss:$16 sps:$4 sm:$0xff]  }
 0x527   :  { %8248 = vmatprep.subr.bf16.mxu0 %v10252_v53  ;;  %v6375_v14 = vpop.f32.mrf.mxu1 }
 0x528   :  { %v6376_v41 = vadd.f32 %v6375_v14, %v6333_v43  ;;  %v6418_v42 = vpop.f32.mrf.mxu0  ;;  %v6417_v57 = vadd.f32 %v6416_v8, %v6374_v40  ;;  %v10370_v14 = vld [vmem:[#allocation15 + $0x228] ss:$16 sps:$4 sm:$0xff]   ;;  %v10381_v43 = vld [vmem:[#allocation15 + $0x3cc] ss:$16 sps:$4 sm:$0xff]  }
 0x529   :  { %v6377_v44 = vpop.f32.mrf.mxu1  ;;  %v10373_v8 = vld [vmem:[#allocation15 + $0x208] ss:$16 sps:$4 sm:$0xff]   ;;  %v10387_v40 = vld [vmem:[#allocation15 + $0x38c] ss:$16 sps:$4 sm:$0xff]  }
 0x52a   :  { %8249 = vmatpush2.bf16.msra.mxu0 %v10250_v12  ;;  %v6378_v58 = vadd.f32 %v6377_v44, %v6335_v36  ;;  %v6419_v53 = vadd.f32 %v6418_v42, %v6376_v41  ;;  %v10343_v12 = vld [vmem:[#allocation15 + $0x528] ss:$16 sps:$4 sm:$0xff]   ;;  %v10384_v44 = vld [vmem:[#allocation15 + $0x3ac] ss:$16 sps:$4 sm:$0xff]  }
 0x52b   :  { %8250 = vmatprep.subr.bf16.mxu0 %v10255_v46  ;;  %v6415_v46 = vadd.f32 %v6414_v45, %v6372_v47  ;;  %v10367_v45 = vld [vmem:[#allocation15 + $0x248] ss:$16 sps:$4 sm:$0xff]   ;;  %v10393_v42 = vld [vmem:[#allocation15 + $0x34c] ss:$16 sps:$4 sm:$0xff]  }
 0x52c   :  { %v10382_v36 = vld [vmem:[#allocation15 + $0x3a8] ss:$16 sps:$4 sm:$0xff]  }
 0x52d   :  { %v10385_v41 = vld [vmem:[#allocation15 + $0x388] ss:$16 sps:$4 sm:$0xff]  }
 0x52e   :  { %8251 = vmatpush2.bf16.msra.mxu0 %v10253_v54  ;;  %v6420_v54 = vpop.f32.mrf.mxu0  ;;  %v10388_v47 = vld [vmem:[#allocation15 + $0x368] ss:$16 sps:$4 sm:$0xff]  }
 0x52f   :  { %8306 = vmatprep.subr.bf16.mxu0 %v10261_v39 }
 0x531   :  { %8253 = vmatmul.mubr.bf16.vlgmr.msra.gmra.mxu0 %v11042_v50  ;;  %v10289_v50 = vld [vmem:[#allocation15 + $0x448] ss:$16 sps:$4 sm:$0xff]  }
 0x532   :  { %8307 = vmatpush1.bf16.msra.mxu0 %v10259_v3  ;;  %8338 = vmatprep.mubr.bf16.mxu0 %v11114_v0  ;;  %v10295_v0 = vld [vmem:[#allocation15 + $0x428] ss:$16 sps:$4 sm:$0xff]   ;;  %v10351_v3 = vld [vmem:[#allocation15 + $0x50c] ss:$16 sps:$4 sm:$0xff]  }
 0x533   :  { %8308 = vmatprep.subr.bf16.mxu0 %v10267_v4  ;;  %v6421_v4 = vadd.f32 %v6420_v54, %v6378_v58  ;;  %v10394_v58 = vld [vmem:[#allocation15 + $0x328] ss:$16 sps:$4 sm:$0xff]   ;;  %v10457_v54 = vld [vmem:[#allocation18 + $0x18] sm:$0xff]  }
 0x536   :  { %8309 = vmatpush1.bf16.msra.mxu0 %v10265_v9 }
 0x537   :  { %8310 = vmatprep.subr.bf16.mxu0 %v10273_v61 }
 0x53a   :  { %8311 = vmatpush1.bf16.msra.mxu0 %v10271_v62 }
 0x53b   :  { %8312 = vmatprep.subr.bf16.mxu0 %v10279_v49 }
 0x53e   :  { %8313 = vmatpush1.bf16.msra.mxu0 %v10277_v48 }
 0x53f   :  { %8314 = vmatprep.subr.bf16.mxu0 %v10285_v59  ;;  %v10349_v59 = vld [vmem:[#allocation15 + $0x508] ss:$16 sps:$4 sm:$0xff]  }
 0x542   :  { %8315 = vmatpush1.bf16.msra.mxu0 %v10283_v55 }
 0x543   :  { %8316 = vmatprep.subr.bf16.mxu0 %v10291_v27 }
 0x546   :  { %8317 = vmatpush1.bf16.msra.mxu0 %v10289_v50 }
 0x547   :  { %8318 = vmatprep.subr.bf16.mxu0 %v10297_v11 }
 0x54a   :  { %8319 = vmatpush1.bf16.msra.mxu0 %v10295_v0 }
 0x54b   :  { %8320 = vmatprep.subr.bf16.mxu0 %v10303_v29  ;;  %v10352_v29 = vld [vmem:[#allocation15 + $0x2e8] ss:$16 sps:$4 sm:$0xff]  }
 0x54e   :  { %8321 = vmatpush1.bf16.msra.mxu0 %v10301_v7 }
 0x54f   :  { %8322 = vmatprep.subr.bf16.mxu0 %v10309_v13  ;;  %v10357_v13 = vld [vmem:[#allocation15 + $0x2cc] ss:$16 sps:$4 sm:$0xff]  }
 0x552   :  { %8323 = vmatpush2.bf16.msra.mxu0 %v10307_v2  ;;  %v10360_v2 = vld [vmem:[#allocation15 + $0x2ac] ss:$16 sps:$4 sm:$0xff]  }
 0x553   :  { %8324 = vmatprep.subr.bf16.mxu0 %v10315_v63  ;;  %v10358_v63 = vld [vmem:[#allocation15 + $0x2a8] ss:$16 sps:$4 sm:$0xff]  }
 0x556   :  { %8325 = vmatpush2.bf16.msra.mxu0 %v10313_v16  ;;  %v10448_v16 = vld [vmem:[#allocation18 + $0x78] sm:$0xff]  }
 0x557   :  { %8326 = vmatprep.subr.bf16.mxu0 %v10321_v60  ;;  %v10449_v60 = vld [vmem:[#allocation18 + $0x38] sm:$0xff]  }
 0x55a   :  { %8327 = vmatpush2.bf16.msra.mxu0 %v10319_v6  ;;  %v10451_v6 = vld [vmem:[#allocation18 + $0x30] sm:$0xff]  }
 0x55b   :  { %8328 = vmatprep.subr.bf16.mxu0 %v10327_v10  ;;  %v10452_v10 = vld [vmem:[#allocation18 + $0x68] sm:$0xff]  }
 0x55e   :  { %8329 = vmatpush2.bf16.msra.mxu0 %v10325_v28  ;;  %v10454_v28 = vld [vmem:[#allocation18 + $0x60] sm:$0xff]  }
 0x55f   :  { %8330 = vmatprep.subr.bf16.mxu0 %v10333_v31  ;;  %v10372_v31 = vld [vmem:[#allocation15 + $0x22c] ss:$16 sps:$4 sm:$0xff]  }
 0x562   :  { %8331 = vmatpush2.bf16.msra.mxu0 %v10331_v33  ;;  %v10375_v33 = vld [vmem:[#allocation15 + $0x20c] ss:$16 sps:$4 sm:$0xff]  }
 0x563   :  { %v6457_v18 = vpop.f32.mrf.mxu1  ;;  %8332 = vmatprep.subr.bf16.mxu0 %v10339_v34  ;;  %v10378_v34 = vld [vmem:[#allocation15 + $0x3ec] ss:$16 sps:$4 sm:$0xff]  }
 0x564   :  { %v6458_v62 = vadd.f32 %v6457_v18, %v6415_v46  ;;  %v10391_v18 = vld [vmem:[#allocation15 + $0x348] ss:$16 sps:$4 sm:$0xff]   ;;  %v10405_v46 = vld [vmem:[#allocation15 + $0x6cc] ss:$16 sps:$4 sm:$0xff]  }
 0x565   :  { %v6459_v51 = vpop.f32.mrf.mxu1 }
 0x566   :  { %8333 = vmatpush2.bf16.msra.mxu0 %v10337_v38  ;;  %v6460_v9 = vadd.f32 %v6459_v51, %v6417_v57  ;;  %v6472_v11 = vmax.f32 %v6458_v62, 0.0  ;;  %v10390_v38 = vld [vmem:[#allocation15 + $0x36c] ss:$16 sps:$4 sm:$0xff]   ;;  %v10397_v57 = vld [vmem:[#allocation15 + $0x308] ss:$16 sps:$4 sm:$0xff]  }
 0x567   :  { %v6461_v39 = vpop.f32.mrf.mxu1  ;;  %8334 = vmatprep.subr.bf16.mxu0 %v10345_v56  ;;  %v10396_v56 = vld [vmem:[#allocation15 + $0x32c] ss:$16 sps:$4 sm:$0xff]  }
 0x568   :  { %v6462_v61 = vadd.f32 %v6461_v39, %v6419_v53  ;;  %v6473_v27 = vmax.f32 %v6460_v9, 0.0  ;;  %v10399_v51 = vld [vmem:[#allocation15 + $0x30c] ss:$16 sps:$4 sm:$0xff]   ;;  %v10403_v39 = vld [vmem:[#allocation15 + $0x6c8] ss:$16 sps:$4 sm:$0xff]  }
 0x569   :  { %v6463_v49 = vpop.f32.mrf.mxu1  ;;  %v10402_v53 = vld [vmem:[#allocation15 + $0x6ec] ss:$16 sps:$4 sm:$0xff]   ;;  %v10459_v9 = vld [vmem:[#allocation18 + $0x10] sm:$0xff]  }
 0x56a   :  { %v6464_v48 = vadd.f32 %v6463_v49, %v6421_v4  ;;  %8335 = vmatpush2.bf16.msra.mxu0 %v10343_v12  ;;  %v6480_v55 = vmax.f32 %v6462_v61, 0.0  ;;  %v10400_v12 = vld [vmem:[#allocation15 + $0x6e8] ss:$16 sps:$4 sm:$0xff]   ;;  %v10411_v62 = vld [vmem:[#allocation15 + $0x68c] ss:$16 sps:$4 sm:$0xff]  }
 0x56b   :  { %8336 = vmatprep.subr.bf16.mxu0 %v10351_v3  ;;  %v10408_v3 = vld [vmem:[#allocation15 + $0x6ac] ss:$16 sps:$4 sm:$0xff]   ;;  %v10458_v4 = vld [vmem:[#allocation18 + $0x50] sm:$0xff]  }
 0x56c   :  { %v6481_v50 = vmax.f32 %v6464_v48, 0.0  ;;  %v11131_v7 = vpack.c.bf16 %v6480_v55, %v6472_v11  ;;  %v10406_v61 = vld [vmem:[#allocation15 + $0x6a8] ss:$16 sps:$4 sm:$0xff]   ;;  %v10460_v49 = vld [vmem:[#allocation18 + $0x48] sm:$0xff]  }
 0x56d   :  { %v10461_v48 = vld [vmem:[#allocation18 + $0x8] sm:$0xff]   ;;  %v10462_v55 = vld [vmem:[#allocation18 + $0x40] sm:$0xff]  }
 0x56e   :  { %v11129_v0 = vpack.c.bf16 %v6481_v50, %v6473_v27  ;;  %8337 = vmatpush2.bf16.msra.mxu0 %v10349_v59  ;;  %v10414_v59 = vld [vmem:[#allocation15 + $0x66c] ss:$16 sps:$4 sm:$0xff]   ;;  %v10463_v27 = vld [vmem:[#allocation18] sm:$0xff]  }
 0x56f   :  { %9900 = vmatprep.subr.bf16.mxu0 %v10448_v16  ;;  %v10412_v50 = vld [vmem:[#allocation15 + $0x668] ss:$16 sps:$4 sm:$0xff]   ;;  %v10417_v11 = vld [vmem:[#allocation15 + $0x64c] ss:$16 sps:$4 sm:$0xff]  }
 0x570   :  { %8209 = vmatprep.mubr.bf16.mxu1 %v11129_v0  ;;  %v10429_v16 = vld [vmem:[#allocation15 + $0x7cc] ss:$16 sps:$4 sm:$0xff]  }
 0x571   :  { %8339 = vmatmul.mubr.bf16.vlgmr.msra.gmra.mxu0 %v11116_v24  ;;  %8210 = vmatmul.mubr.bf16.vlgmr.msra.gmra.mxu1 %v11131_v7  ;;  %v10366_v24 = vld [vmem:[#allocation15 + $0x26c] ss:$16 sps:$4 sm:$0xff]  }
 0x572   :  { %8264 = vmatpush1.bf16.msra.mxu1 %v10352_v29  ;;  %8295 = vmatprep.mubr.bf16.mxu1 %v11100_v37  ;;  %v10364_v37 = vld [vmem:[#allocation15 + $0x268] ss:$16 sps:$4 sm:$0xff]   ;;  %v10420_v29 = vld [vmem:[#allocation15 + $0x62c] ss:$16 sps:$4 sm:$0xff]  }
 0x573   :  { %8265 = vmatprep.subr.bf16.mxu1 %v10357_v13  ;;  %9901 = vmatpush3.bf16.msra.mxu0 %v10449_v60  ;;  %v10418_v13 = vld [vmem:[#allocation15 + $0x628] ss:$16 sps:$4 sm:$0xff]  }
 0x574   :  { %9902 = vmatprep.subr.bf16.mxu0 %v10450_v5  ;;  %v10427_v60 = vld [vmem:[#allocation15 + $0x7c8] ss:$16 sps:$4 sm:$0xff]   ;;  %v10432_v5 = vld [vmem:[#allocation15 + $0x7ac] ss:$16 sps:$4 sm:$0xff]  }
 0x576   :  { %8266 = vmatpush1.bf16.msra.mxu1 %v10355_v1  ;;  %v10423_v1 = vld [vmem:[#allocation15 + $0x60c] ss:$16 sps:$4 sm:$0xff]  }
 0x577   :  { %8267 = vmatprep.subr.bf16.mxu1 %v10360_v2  ;;  %9903 = vmatpush3.bf16.msra.mxu0 %v10451_v6  ;;  %v10421_v2 = vld [vmem:[#allocation15 + $0x608] ss:$16 sps:$4 sm:$0xff]  }
 0x578   :  { %9904 = vmatprep.subr.bf16.mxu0 %v10452_v10  ;;  %v10433_v6 = vld [vmem:[#allocation15 + $0x788] ss:$16 sps:$4 sm:$0xff]   ;;  %v10438_v10 = vld [vmem:[#allocation15 + $0x76c] ss:$16 sps:$4 sm:$0xff]  }
 0x57a   :  { %8268 = vmatpush1.bf16.msra.mxu1 %v10358_v63  ;;  %v10426_v63 = vld [vmem:[#allocation15 + $0x7ec] ss:$16 sps:$4 sm:$0xff]  }
 0x57b   :  { %8269 = vmatprep.subr.bf16.mxu1 %v10363_v17  ;;  %9905 = vmatpush3.bf16.msra.mxu0 %v10453_v25  ;;  %v10424_v17 = vld [vmem:[#allocation15 + $0x7e8] ss:$16 sps:$4 sm:$0xff]  }
 0x57c   :  { %9906 = vmatprep.subr.bf16.mxu0 %v10454_v28  ;;  %v10439_v25 = vld [vmem:[#allocation15 + $0x748] ss:$16 sps:$4 sm:$0xff]   ;;  %v10444_v28 = vld [vmem:[#allocation15 + $0x72c] ss:$16 sps:$4 sm:$0xff]  }
 0x57e   :  { %8270 = vmatpush1.bf16.msra.mxu1 %v10361_v26  ;;  %v10430_v26 = vld [vmem:[#allocation15 + $0x7a8] ss:$16 sps:$4 sm:$0xff]  }
 0x57f   :  { %8271 = vmatprep.subr.bf16.mxu1 %v10366_v24  ;;  %9907 = vmatpush3.bf16.msra.mxu0 %v10455_v15  ;;  %v10435_v24 = vld [vmem:[#allocation15 + $0x78c] ss:$16 sps:$4 sm:$0xff]   ;;  %v10445_v15 = vld [vmem:[#allocation15 + $0x708] ss:$16 sps:$4 sm:$0xff]  }
 0x580   :  { %9908 = vmatprep.subr.bf16.mxu0 %v10456_v32  ;;  %v10464_v32 = vld [vmem:[#allocation18 + $0xf8] sm:$0xff]  }
 0x582   :  { %8272 = vmatpush1.bf16.msra.mxu1 %v10364_v37  ;;  %v10436_v37 = vld [vmem:[#allocation15 + $0x768] ss:$16 sps:$4 sm:$0xff]  }
 0x583   :  { %8273 = vmatprep.subr.bf16.mxu1 %v10369_v23  ;;  %9909 = vmatpush3.bf16.msra.mxu0 %v10457_v54  ;;  %v10441_v23 = vld [vmem:[#allocation15 + $0x74c] ss:$16 sps:$4 sm:$0xff]  }
 0x584   :  { %9910 = vmatprep.subr.bf16.mxu0 %v10458_v4 }
 0x586   :  { %8274 = vmatpush1.bf16.msra.mxu1 %v10367_v45  ;;  %v10442_v45 = vld [vmem:[#allocation15 + $0x728] ss:$16 sps:$4 sm:$0xff]  }
 0x587   :  { %8275 = vmatprep.subr.bf16.mxu1 %v10372_v31  ;;  %9911 = vmatpush3.bf16.msra.mxu0 %v10459_v9  ;;  %v10447_v31 = vld [vmem:[#allocation15 + $0x70c] ss:$16 sps:$4 sm:$0xff]  }
 0x588   :  { %9912 = vmatprep.subr.bf16.mxu0 %v10460_v49  ;;  %v10474_v49 = vld [vmem:[#allocation18 + $0xd0] sm:$0xff]  }
 0x58a   :  { %8276 = vmatpush1.bf16.msra.mxu1 %v10370_v14  ;;  %v10465_v14 = vld [vmem:[#allocation18 + $0xb8] sm:$0xff]  }
 0x58b   :  { %8277 = vmatprep.subr.bf16.mxu1 %v10375_v33  ;;  %9913 = vmatpush3.bf16.msra.mxu0 %v10461_v48  ;;  %v10466_v33 = vld [vmem:[#allocation18 + $0xf0] sm:$0xff]  }
 0x58c   :  { %9914 = vmatprep.subr.bf16.mxu0 %v10462_v55  ;;  %v10475_v55 = vld [vmem:[#allocation18 + $0x90] sm:$0xff]  }
 0x58e   :  { %8278 = vmatpush1.bf16.msra.mxu1 %v10373_v8  ;;  %v10467_v8 = vld [vmem:[#allocation18 + $0xb0] sm:$0xff]  }
 0x58f   :  { %8279 = vmatprep.subr.bf16.mxu1 %v10378_v34  ;;  %9915 = vmatpush3.bf16.msra.mxu0 %v10463_v27  ;;  %v10468_v34 = vld [vmem:[#allocation18 + $0xe8] sm:$0xff]  }
 0x592   :  { %8280 = vmatpush2.bf16.msra.mxu1 %v10376_v35  ;;  %v10469_v35 = vld [vmem:[#allocation18 + $0xa8] sm:$0xff]  }
 0x593   :  { %8281 = vmatprep.subr.bf16.mxu1 %v10381_v43  ;;  %v10470_v43 = vld [vmem:[#allocation18 + $0xe0] sm:$0xff]  }
 0x596   :  { %8282 = vmatpush2.bf16.msra.mxu1 %v10379_v52  ;;  %v10471_v52 = vld [vmem:[#allocation18 + $0xa0] sm:$0xff]  }
 0x597   :  { %8283 = vmatprep.subr.bf16.mxu1 %v10384_v44  ;;  %v10472_v44 = vld [vmem:[#allocation18 + $0xd8] sm:$0xff]  }
 0x59a   :  { %8284 = vmatpush2.bf16.msra.mxu1 %v10382_v36  ;;  %v10473_v36 = vld [vmem:[#allocation18 + $0x98] sm:$0xff]  }
 0x59b   :  { %8285 = vmatprep.subr.bf16.mxu1 %v10387_v40 }
 0x59e   :  { %8286 = vmatpush2.bf16.msra.mxu1 %v10385_v41 }
 0x59f   :  { %8287 = vmatprep.subr.bf16.mxu1 %v10390_v38 }
 0x5a2   :  { %8288 = vmatpush2.bf16.msra.mxu1 %v10388_v47 }
 0x5a3   :  { %8289 = vmatprep.subr.bf16.mxu1 %v10393_v42  ;;  %v8125_v38 = vpop.f32.mrf.mxu1 }
 0x5a5   :  { %v8127_v42 = vpop.f32.mrf.mxu1 }
 0x5a6   :  { %8290 = vmatpush2.bf16.msra.mxu1 %v10391_v18 }
 0x5a7   :  { %8291 = vmatprep.subr.bf16.mxu1 %v10396_v56  ;;  %v6746_v56 = vld [vmem:[#allocation17] sm:$0xf] }
 0x5aa   :  { %8292 = vmatpush2.bf16.msra.mxu1 %v10394_v58  ;;  %v8129_v58 = vpop.f32.mrf.mxu1 }
 0x5ab   :  { %8293 = vmatprep.subr.bf16.mxu1 %v10399_v51 }
 0x5ae   :  { %8294 = vmatpush2.bf16.msra.mxu1 %v10397_v57  ;;  %v6755_v57 = vrot.slane %v6746_v56, %v10875_v19 }
 0x5af   :  { %8349 = vmatprep.subr.bf16.mxu1 %v10402_v53  ;;  %v6751_v53 = vrot.slane %v6746_v56, %v10881_v21 }
 0x5b1   :  { %8296 = vmatmul.mubr.bf16.vlgmr.msra.gmra.mxu1 %v11090_v30  ;;  %v10409_v30 = vld [vmem:[#allocation15 + $0x688] ss:$16 sps:$4 sm:$0xff]  }
 0x5b2   :  { %8350 = vmatpush1.bf16.msra.mxu1 %v10400_v12  ;;  %8381 = vmatprep.mubr.bf16.mxu1 %v11129_v0  ;;  %v10415_v0 = vld [vmem:[#allocation15 + $0x648] ss:$16 sps:$4 sm:$0xff]   ;;  %v8131_v12 = vpop.f32.mrf.mxu1 }
 0x5b3   :  { %8351 = vmatprep.subr.bf16.mxu1 %v10405_v46 }
 0x5b6   :  { %8352 = vmatpush1.bf16.msra.mxu1 %v10403_v39 }
 0x5b7   :  { %8353 = vmatprep.subr.bf16.mxu1 %v10408_v3 }
 0x5ba   :  { %8354 = vmatpush1.bf16.msra.mxu1 %v10406_v61 }
 0x5bb   :  { %8355 = vmatprep.subr.bf16.mxu1 %v10411_v62 }
 0x5be   :  { %8356 = vmatpush1.bf16.msra.mxu1 %v10409_v30 }
 0x5bf   :  { %8357 = vmatprep.subr.bf16.mxu1 %v10414_v59 }
 0x5c2   :  { %8358 = vmatpush1.bf16.msra.mxu1 %v10412_v50 }
 0x5c3   :  { %8359 = vmatprep.subr.bf16.mxu1 %v10417_v11 }
 0x5c6   :  { %8360 = vmatpush1.bf16.msra.mxu1 %v10415_v0 }
 0x5c7   :  { %8361 = vmatprep.subr.bf16.mxu1 %v10420_v29 }
 0x5ca   :  { %8362 = vmatpush1.bf16.msra.mxu1 %v10418_v13 }
 0x5cb   :  { %8363 = vmatprep.subr.bf16.mxu1 %v10423_v1  ;;  %v10476_v1 = vld [vmem:[#allocation18 + $0xc8] sm:$0xff]  }
 0x5ce   :  { %8364 = vmatpush1.bf16.msra.mxu1 %v10421_v2 }
 0x5cf   :  { %8365 = vmatprep.subr.bf16.mxu1 %v10426_v63 }
 0x5d2   :  { %8366 = vmatpush2.bf16.msra.mxu1 %v10424_v17  ;;  %v10477_v17 = vld [vmem:[#allocation18 + $0x88] sm:$0xff]  }
 0x5d3   :  { %8367 = vmatprep.subr.bf16.mxu1 %v10429_v16 }
 0x5d6   :  { %8368 = vmatpush2.bf16.msra.mxu1 %v10427_v60 }
 0x5d7   :  { %8369 = vmatprep.subr.bf16.mxu1 %v10432_v5 }
 0x5da   :  { %8370 = vmatpush2.bf16.msra.mxu1 %v10430_v26 }
 0x5db   :  { %8371 = vmatprep.subr.bf16.mxu1 %v10435_v24  ;;  %v10478_v24 = vld [vmem:[#allocation18 + $0xc0] sm:$0xff]  }
 0x5de   :  { %8372 = vmatpush2.bf16.msra.mxu1 %v10433_v6 }
 0x5df   :  { %8373 = vmatprep.subr.bf16.mxu1 %v10438_v10  ;;  %v10479_v10 = vld [vmem:[#allocation18 + $0x80] sm:$0xff]  }
 0x5e2   :  { %8374 = vmatpush2.bf16.msra.mxu1 %v10436_v37 }
 0x5e3   :  { %8375 = vmatprep.subr.bf16.mxu1 %v10441_v23 }
 0x5e6   :  { %8376 = vmatpush2.bf16.msra.mxu1 %v10439_v25 }
 0x5e7   :  { %8377 = vmatprep.subr.bf16.mxu1 %v10444_v28 }
 0x5ea   :  { %8378 = vmatpush2.bf16.msra.mxu1 %v10442_v45 }
 0x5eb   :  { %8379 = vmatprep.subr.bf16.mxu1 %v10447_v31 }
 0x5ee   :  { %8380 = vmatpush2.bf16.msra.mxu1 %v10445_v15 }
 0x5ef   :  { %9922 = vmatprep.subr.bf16.mxu1 %v10464_v32 }
 0x5f1   :  { %8382 = vmatmul.mubr.bf16.vlgmr.msra.gmra.mxu1 %v11131_v7  ;;  %v8082_v7 = vpop.f32.mrf.mxu0 }
 0x5f2   :  { %9923 = vmatpush3.bf16.msra.mxu1 %v10465_v14  ;;  %v8083_v3 = vadd.f32 %v8082_v7, %v6751_v53 }
 0x5f3   :  { %9924 = vmatprep.subr.bf16.mxu1 %v10466_v33  ;;  %v8084_v40 = vpop.f32.mrf.mxu0  ;;  %v6763_v33 = vrot.slane %v6746_v56, %v10878_v20 }
 0x5f4   :  { %v8085_v54 = vadd.f32 %v8084_v40, %v6755_v57  ;;  %v8126_v48 = vadd.f32 %v8125_v38, %v8083_v3 }
 0x5f5   :  { %v8086_v41 = vpop.f32.mrf.mxu0 }
 0x5f6   :  { %9925 = vmatpush3.bf16.msra.mxu1 %v10467_v8  ;;  %v8087_v39 = vadd.f32 %v8086_v41, %v6751_v53  ;;  %v8128_v61 = vadd.f32 %v8127_v42, %v8085_v54  ;;  %v6759_v8 = vrot.slane %v6746_v56, %v10884_v22 }
 0x5f7   :  { %9926 = vmatprep.subr.bf16.mxu1 %v10468_v34  ;;  %v8088_v47 = vpop.f32.mrf.mxu0 }
 0x5f8   :  { %v8089_v9 = vadd.f32 %v8088_v47, %v6755_v57  ;;  %v8130_v62 = vadd.f32 %v8129_v58, %v8087_v39 }
 0x5f9   :  { %v8168_v18 = vpop.f32.mrf.mxu0 }
 0x5fa   :  { %9927 = vmatpush3.bf16.msra.mxu1 %v10469_v35  ;;  %v8132_v27 = vadd.f32 %v8131_v12, %v8089_v9  ;;  %v8169_v19 = vadd.f32 %v8168_v18, %v8126_v48 }
 0x5fb   :  { %9928 = vmatprep.subr.bf16.mxu1 %v10470_v43  ;;  %v8170_v51 = vpop.f32.mrf.mxu0 }
 0x5fc   :  { %v8171_v50 = vadd.f32 %v8170_v51, %v8128_v61 }
 0x5fd   :  { %v8172_v46 = vpop.f32.mrf.mxu0 }
 0x5fe   :  { %9929 = vmatpush3.bf16.msra.mxu1 %v10471_v52  ;;  %v8173_v11 = vadd.f32 %v8172_v46, %v8130_v62 }
 0x5ff   :  { %9930 = vmatprep.subr.bf16.mxu1 %v10472_v44  ;;  %v8174_v30 = vpop.f32.mrf.mxu0 }
 0x600   :  { %v8175_v0 = vadd.f32 %v8174_v30, %v8132_v27 }
 0x601   :  { %v8254_v25 = vpop.f32.mrf.mxu0 }
 0x602   :  { %9931 = vmatpush3.bf16.msra.mxu1 %v10473_v36  ;;  %v8255_v44 = vadd.f32 %v8254_v25, %v6759_v8 }
 0x603   :  { %9932 = vmatprep.subr.bf16.mxu1 %v10474_v49  ;;  %v8256_v28 = vpop.f32.mrf.mxu0 }
 0x604   :  { %v8257_v43 = vadd.f32 %v8256_v28, %v6763_v33 }
 0x605   :  { %v8258_v45 = vpop.f32.mrf.mxu0 }
 0x606   :  { %9933 = vmatpush3.bf16.msra.mxu1 %v10475_v55  ;;  %v8259_v52 = vadd.f32 %v8258_v45, %v6759_v8 }
 0x607   :  { %9934 = vmatprep.subr.bf16.mxu1 %v10476_v1  ;;  %v8260_v15 = vpop.f32.mrf.mxu0 }
 0x608   :  { %v8261_v7 = vadd.f32 %v8260_v15, %v6763_v33 }
 0x60a   :  { %9935 = vmatpush3.bf16.msra.mxu1 %v10477_v17 }
 0x60b   :  { %9936 = vmatprep.subr.bf16.mxu1 %v10478_v24 }
 0x60e   :  { %9937 = vmatpush3.bf16.msra.mxu1 %v10479_v10 }
 0x631   :  { %v8211_v4 = vpop.f32.mrf.mxu1  ;;  %v8340_v14 = vpop.f32.mrf.mxu0 }
 0x632   :  { %v8212_v2 = vadd.f32 %v8211_v4, %v8169_v19 }
 0x633   :  { %v8213_v59 = vpop.f32.mrf.mxu1  ;;  %v8342_v35 = vpop.f32.mrf.mxu0 }
 0x634   :  { %v8214_v29 = vadd.f32 %v8213_v59, %v8171_v50  ;;  %v8392_v6 = vmax.f32 %v8212_v2, 0.0  ;;  %v9865_v50 = vld [vmem:[#allocation20] ss:$0 sm:$0xff] }
 0x635   :  { %v8215_v21 = vpop.f32.mrf.mxu1  ;;  %v8344_v38 = vpop.f32.mrf.mxu0 }
 0x636   :  { %v8216_v13 = vadd.f32 %v8215_v21, %v8173_v11  ;;  %v8393_v5 = vmax.f32 %v8214_v29, 0.0 }
 0x637   :  { %v8217_v63 = vpop.f32.mrf.mxu1  ;;  %v8346_v53 = vpop.f32.mrf.mxu0 }
 0x638   :  { %v8218_v16 = vadd.f32 %v8217_v63, %v8175_v0  ;;  %v8396_v60 = vmax.f32 %v8216_v13, 0.0 }
 0x63a   :  { %v8397_v26 = vmax.f32 %v8218_v16, 0.0  ;;  %v8400_v23 = vpack.c.bf16 %v8396_v60, %v8392_v6 }
 0x63c   :  { %v8401_v37 = vpack.c.bf16 %v8397_v26, %v8393_v5 }
 0x63e   :  { %8699 = vmatprep.mubr.bf16.mxu0 %v8401_v37 }
 0x63f   :  { %8700 = vmatmul.mubr.bf16.vlgmr.msra.gmra.mxu0 %v8400_v23 }
 0x671   :  { %v8297_v31 = vpop.f32.mrf.mxu1 }
 0x672   :  { %v8298_v47 = vadd.f32 %v8297_v31, %v8255_v44 }
 0x673   :  { %v8299_v32 = vpop.f32.mrf.mxu1 }
 0x674   :  { %v8300_v40 = vadd.f32 %v8299_v32, %v8257_v43  ;;  %v8341_v20 = vadd.f32 %v8340_v14, %v8298_v47 }
 0x675   :  { %v8301_v34 = vpop.f32.mrf.mxu1 }
 0x676   :  { %v8302_v41 = vadd.f32 %v8301_v34, %v8259_v52  ;;  %v8343_v51 = vadd.f32 %v8342_v35, %v8300_v40 }
 0x677   :  { %v8303_v36 = vpop.f32.mrf.mxu1 }
 0x678   :  { %v8304_v18 = vadd.f32 %v8303_v36, %v8261_v7  ;;  %v8345_v57 = vadd.f32 %v8344_v38, %v8302_v41 }
 0x67a   :  { %v8347_v46 = vadd.f32 %v8346_v53, %v8304_v18 }
 0x6b1   :  { %v8383_v42 = vpop.f32.mrf.mxu1 }
 0x6b2   :  { %v8384_v54 = vadd.f32 %v8383_v42, %v8341_v20 }
 0x6b3   :  { %v8385_v58 = vpop.f32.mrf.mxu1 }
 0x6b4   :  { %v8386_v22 = vadd.f32 %v8385_v58, %v8343_v51  ;;  %v8394_v62 = vmax.f32 %v8384_v54, 0.0 }
 0x6b5   :  { %v8387_v12 = vpop.f32.mrf.mxu1 }
 0x6b6   :  { %v8388_v56 = vadd.f32 %v8387_v12, %v8345_v57  ;;  %v8395_v9 = vmax.f32 %v8386_v22, 0.0 }
 0x6b7   :  { %v8389_v39 = vpop.f32.mrf.mxu1 }
 0x6b8   :  { %v8390_v3 = vadd.f32 %v8389_v39, %v8347_v46  ;;  %v8398_v4 = vmax.f32 %v8388_v56, 0.0 }
 0x6ba   :  { %v8399_v61 = vmax.f32 %v8390_v3, 0.0  ;;  %v8402_v48 = vpack.c.bf16 %v8398_v4, %v8394_v62 }
 0x6bc   :  { %v8403_v49 = vpack.c.bf16 %v8399_v61, %v8395_v9 }
 0x6be   :  { %8740 = vmatprep.mubr.bf16.mxu1 %v8403_v49 }
 0x6bf   :  { %8741 = vmatmul.mubr.bf16.vlgmr.msra.gmra.mxu1 %v8402_v48 }
 0x6ff   :  { %v9916_v30 = vpop.f32.mrf.mxu0 }
 0x701   :  { %v9917_v59 = vpop.f32.mrf.mxu0 }
 0x702   :  { %v9918_v27 = vadd.f32 %v9917_v59, %v9916_v30 }
 0x703   :  { %v9919_v55 = vpop.f32.mrf.mxu0 }
 0x704   :  { %v8702_v0 = vadd.f32 %v9918_v27, %v9865_v50 }
 0x705   :  { %v9920_v11 = vpop.f32.mrf.mxu0 }
 0x706   :  { %v9921_v29 = vadd.f32 %v9920_v11, %v9919_v55 }
 0x708   :  { %v8705_v17 = vadd.f32 %v9921_v29, %v9865_v50 }
 0x77f   :  { %v9938_v19 = vpop.f32.mrf.mxu1 }
 0x781   :  { %v9939_v21 = vpop.f32.mrf.mxu1 }
 0x782   :  { %v9940_v13 = vadd.f32 %v9939_v21, %v9938_v19 }
 0x783   :  { %v9941_v1 = vpop.f32.mrf.mxu1 }
 0x784   :  { %v8743_v2 = vadd.f32 %v9940_v13, %v8702_v0 }
 0x785   :  { %v9942_v63 = vpop.f32.mrf.mxu1 }
 0x786   :  { %8749 = vst [vmem:[#allocation21] sm:$0xff] %v8743_v2  ;;  %v9943_v16 = vadd.f32 %v9942_v63, %v9941_v1 }
 0x788   :  { %v8746_v60 = vadd.f32 %v9943_v16, %v8705_v17 }
 0x78a   :  { %8750 = vst [vmem:[#allocation21 + $0x8] sm:$0xff] %v8746_v60 }
 0x78b   :  { %10714 = shalt.err (!%p10711_p3)
}
 0x78c   :  { %s10756_s12 = smov 128   ;;  %s10757_s13 = smov 8  }
 0x78d   :  { %8762 = dma.vmem_to_hbm [thread:$0]  %s8757_s10, 256, %s11158_s11, [#allocation5], %s10756_s12, %s10756_s12, %s10757_s13  }
 0x78e   :  { %10735 = dma.done.wait [#allocation5], 256  }
 0x78f   :  { %10736 = vsyncadd [#allocation5], 4294967040 }
 0x790   :  { %8766 = vsyncpa [#allocation4], 1 }
 0x791   :  { %8767 = vsyncpa [#allocation7], 1 }
 0x792   :  { %8768 = vsyncpa [#allocation10], 1 }
 0x793   :  { %8769 = vsyncpa [#allocation13], 1 }
 0x794   :  { %8770 = vsyncpa [#allocation16], 1 }
 0x795   :  { %8771 = vsyncpa [#allocation19], 1 }
 0x796   :  { %8772 = vsyncpa [#allocation5], 1 }

</bundles_post_ra>
